<compile_context>
chip_gen: v5e
topology: v5e:2x2
jax: 0.10.0
libtpu: 0.0.40
codegen_flags: <defaults>
</compile_context>

<pallas_src>
import functools

import jax
import jax.numpy as jnp
from jax import lax
from jax.experimental import pallas as pl
from jax.experimental.pallas import tpu as pltpu

EPS = 1e-3                      # BatchNorm eps of the reference module
STREAM_DTYPE = jnp.bfloat16     # activations between kernels (halves HBM traffic)
PW_DTYPE = jnp.bfloat16         # conv weights (bf16 MXU path)


def _vmem_limit_bytes():
    # Per-generation scoped-VMEM limit: leave headroom for double-buffered blocks and
    # compiler scratch (v7x has only 64 MiB physical VMEM; v5e/v6e have 128 MiB).
    try:
        cap = int(pltpu.get_tpu_info().vmem_capacity_bytes)
    except Exception:
        cap = 128 * 1024 * 1024
    return int(min(64 * 1024 * 1024, (cap * 3) // 4))


_VMEM_LIMIT = _vmem_limit_bytes()


def _cparams(n_grid_axes):
    return pltpu.CompilerParams(
        dimension_semantics=("parallel",) * n_grid_axes,
        vmem_limit_bytes=_VMEM_LIMIT,
    )


def _row_tile(total, target=2048):
    """Largest divisor of `total` that is a multiple of 8 and <= target (else total)."""
    if total <= target or total % 8 != 0:
        return total
    best = total
    t = 8
    while t <= target:
        if total % t == 0:
            best = t
        t += 8
    return best


# ---------------------------------------------------------------------------
# DownsamplerBlock, small-Cin form: im2col + pooled lanes -> one bf16 matmul
# ---------------------------------------------------------------------------
def _ds_matmul_kernel(col_ref, w_ref, shift_ref, out_ref):
    """col_ref: (1, tile, 10*Cin) bf16 = [9 conv taps || pooled] per output pixel.
    w_ref: (10*Cin, Cout) bf16 with conv+bias+BN and pool-BN-diag folded in."""
    acc = jnp.dot(col_ref[0], w_ref[...], preferred_element_type=jnp.float32)
    out_ref[0] = jnp.maximum(acc + shift_ref[...], 0.0).astype(out_ref.dtype)


def downsampler_im2col(x, p):
    """x: (N, H, W, Cin) -> (N, H/2, W/2, Cout).  For small Cin (3, 16)."""
    N, H, W, Cin = x.shape
    assert H % 2 == 0 and W % 2 == 0
    Ho, Wo = H // 2, W // 2
    hwo = Ho * Wo
    K = 10 * Cin
    Cout = p["shift"].shape[-1]

    # Build the packed operand in the wrapper (single XLA fusion):
    #   lanes [t*Cin:(t+1)*Cin] = conv tap t (kh*3+kw), lanes [9*Cin:] = 2x2 max-pool.
    xp = jnp.pad(x, ((0, 0), (1, 1), (1, 1), (0, 0)))
    taps = [xp[:, kh:kh + H:2, kw:kw + W:2, :] for kh in range(3) for kw in range(3)]
    pooled = jnp.max(x.reshape(N, Ho, 2, Wo, 2, Cin), axis=(2, 4))
    col = jnp.concatenate(taps + [pooled], axis=-1).reshape(N, hwo, K).astype(PW_DTYPE)

    tile = _row_tile(hwo)
    # TODO(synk): present a lane-dense (N, Ho, Wo*Cout) output view (in-kernel relayout)
    # to avoid masked vst on the Cout=16 initial layer when store-bound on v5e.
    out = pl.pallas_call(
        _ds_matmul_kernel,
        out_shape=jax.ShapeDtypeStruct((N, hwo, Cout), x.dtype),
        grid=(N, hwo // tile),
        in_specs=[
            pl.BlockSpec((1, tile, K), lambda n, s: (n, s, 0)),
            pl.BlockSpec((K, Cout), lambda n, s: (0, 0)),
            pl.BlockSpec((1, Cout), lambda n, s: (0, 0)),
        ],
        out_specs=pl.BlockSpec((1, tile, Cout), lambda n, s: (n, s, 0)),
        compiler_params=_cparams(2),
    )(col, p["w"], p["shift"])
    return out.reshape(N, Ho, Wo, Cout)


# ---------------------------------------------------------------------------
# DownsamplerBlock, large-Cin form (ds2): phase slabs, bf16 taps, lane-concat pool
# ---------------------------------------------------------------------------
def _ds_phase_kernel(ph_ref, w_ref, shift_ref, pscale_ref, out_ref, *, wo):
    """ph_ref: (1, 4, Ho*Wo, Cin) bf16; slab 2a+b holds x[2i+a, 2j+b, :].
    w_ref: (9, Cin, Cconv) bf16 (bias/BN folded into shift/weights).
    out = relu([conv3x3/s2 || pooled*bn_scale] + shift), Cconv + Cin == Cout."""
    hwo = ph_ref.shape[2]
    cconv = w_ref.shape[2]
    r = lax.broadcasted_iota(jnp.int32, (hwo, 1), 0)
    valid_i = r >= wo                                        # output block-row i >= 1
    valid_j = (r % wo) != 0                                  # output block-col j >= 1

    # 3x3 stride-2 conv: 9 taps derived from the 4 phase slabs (roll + mask); each tap
    # is loaded per-iteration in bf16 (no whole-slab f32 materialization).
    acc = jnp.zeros((hwo, cconv), jnp.float32)
    for kh in range(3):
        for kw in range(3):
            dh, dw = kh - 1, kw - 1
            a = 0 if dh == 0 else 1
            b = 0 if dw == 0 else 1
            need_i, need_j = dh == -1, dw == -1
            v = ph_ref[0, 2 * a + b]                         # (HWo, Cin) bf16
            s = (wo if need_i else 0) + (1 if need_j else 0)
            if s:
                v32 = pltpu.roll(v.astype(jnp.float32), shift=s % hwo, axis=0)
                if need_i and need_j:
                    m = jnp.logical_and(valid_i, valid_j)
                elif need_i:
                    m = valid_i
                else:
                    m = valid_j
                v = jnp.where(m, v32, 0.0).astype(ph_ref.dtype)   # exact round-trip
            acc = acc + jnp.dot(v, w_ref[kh * 3 + kw],
                                preferred_element_type=jnp.float32)

    # 2x2 max-pool branch: BN scale on the VPU, then lane-concat to 128 dense lanes
    # (no pool-placement matmul since Cconv == Cin).
    pooled = jnp.maximum(jnp.maximum(ph_ref[0, 0], ph_ref[0, 1]),
                         jnp.maximum(ph_ref[0, 2], ph_ref[0, 3])).astype(jnp.float32)
    pooled = pooled * pscale_ref[...]
    full = jnp.concatenate([acc, pooled], axis=-1) + shift_ref[...]
    out_ref[0] = jnp.maximum(full, 0.0).astype(out_ref.dtype)


def downsampler_phase(x, p):
    """x: (N, H, W, Cin) -> (N, H/2, W/2, 2*Cin).  Requires Cout == 2*Cin (ds2)."""
    N, H, W, Cin = x.shape
    assert H % 2 == 0 and W % 2 == 0
    Ho, Wo = H // 2, W // 2
    hwo = Ho * Wo
    Cconv = p["w"].shape[-1]
    Cout = p["shift"].shape[-1]

    # Single space-to-depth pass: phases[n, 2a+b, i*Wo+j, c] = x[n, 2i+a, 2j+b, c].
    ph = x.reshape(N, Ho, 2, Wo, 2, Cin).transpose(0, 2, 4, 1, 3, 5)
    ph = ph.reshape(N, 4, hwo, Cin)
    # TODO(synk): have the producing nb1d kernel emit phase-ordered output (or use a
    # manual strided DMA) to drop this HBM round trip, and add a spatial grid axis with
    # a one-block-row halo for very large feature maps (v7x VMEM).
    out = pl.pallas_call(
        functools.partial(_ds_phase_kernel, wo=Wo),
        out_shape=jax.ShapeDtypeStruct((N, hwo, Cout), x.dtype),
        grid=(N,),
        in_specs=[
            pl.BlockSpec((1, 4, hwo, Cin), lambda n: (n, 0, 0, 0)),
            pl.BlockSpec((9, Cin, Cconv), lambda n: (0, 0, 0)),
            pl.BlockSpec((1, Cout), lambda n: (0, 0)),
            pl.BlockSpec((1, Cin), lambda n: (0, 0)),
        ],
        out_specs=pl.BlockSpec((1, hwo, Cout), lambda n: (n, 0, 0)),
        compiler_params=_cparams(1),
    )(ph, p["w"], p["shift"], p["pscale"])
    return out.reshape(N, Ho, Wo, Cout)


# ---------------------------------------------------------------------------
# Fused chain of non_bottleneck_1d blocks (activation stays in VMEM)
# ---------------------------------------------------------------------------
def _nb1d_chain_kernel(x_ref, pw_ref, vec_ref, out_ref, *, width, dilations):
    """x_ref: (1, H*W, C).  pw_ref: (L, 2, C, C) 1x1 weights (BN folded, bf16).
    vec_ref: (L, 10, C) f32 rows = [dw1(3), db1, pb1', dw2(3), db2, pb2']."""
    hw = x_ref.shape[1]
    # TODO(synk): keep the resident activation in bf16 on v6e/v7x (halves VMEM/roll
    # traffic) and add a spatial grid axis with a sum(1+dil)-row halo for large maps.
    x = x_ref[0].astype(jnp.float32)                         # (HW, C)
    r = lax.broadcasted_iota(jnp.int32, (hw, 1), 0)

    def shift_rows(v, s):
        # y[row] = v[row - s] with zero fill (s is a static Python int).
        if s == 0:
            return v
        if abs(s) >= hw:          # dilation taller than the feature map -> all zeros
            return jnp.zeros_like(v)
        rolled = pltpu.roll(v, shift=s % hw, axis=0)
        if s > 0:
            return jnp.where(r >= s, rolled, 0.0)
        return jnp.where(r < hw + s, rolled, 0.0)

    def dwconv_h(v, w, b, d):
        # depthwise (3,1) conv along H == +-d*width row shifts in the flat layout
        s = d * width
        return (w[0:1] * shift_rows(v, s) + w[1:2] * v
                + w[2:3] * shift_rows(v, -s) + b)

    for li, dil in enumerate(dilations):
        dw1 = vec_ref[li, 0:3]
        db1 = vec_ref[li, 3:4]
        pb1 = vec_ref[li, 4:5]
        dw2 = vec_ref[li, 5:8]
        db2 = vec_ref[li, 8:9]
        pb2 = vec_ref[li, 9:10]
        pw1 = pw_ref[li, 0]
        pw2 = pw_ref[li, 1]

        t = jnp.maximum(dwconv_h(x, dw1, db1, 1), 0.0)            # conv3x1_1 + relu
        t = jnp.dot(t.astype(pw1.dtype), pw1,
                    preferred_element_type=jnp.float32) + pb1     # conv1x1_1 + bn1
        t = jnp.maximum(t, 0.0)
        t = jnp.maximum(dwconv_h(t, dw2, db2, dil), 0.0)          # conv3x1_2 + relu
        t = jnp.dot(t.astype(pw2.dtype), pw2,
                    preferred_element_type=jnp.float32) + pb2     # conv1x1_2 + bn2
        # TODO(synk): Dropout2d(p=0.3) is identity in eval mode; training-mode channel
        # dropout and training-mode BN batch statistics are not implemented.
        x = jnp.maximum(t + x, 0.0)                               # residual + relu

    out_ref[0] = x.astype(out_ref.dtype)


def nb1d_chain(x, p, dilations):
    """Fused sequence of non_bottleneck_1d blocks. x: (N, H, W, C)."""
    N, H, W, C = x.shape
    L = p["pw"].shape[0]
    assert len(dilations) == L
    hw = H * W
    out = pl.pallas_call(
        functools.partial(_nb1d_chain_kernel, width=W, dilations=tuple(dilations)),
        out_shape=jax.ShapeDtypeStruct((N, hw, C), x.dtype),
        grid=(N,),
        in_specs=[
            pl.BlockSpec((1, hw, C), lambda n: (n, 0, 0)),
            pl.BlockSpec((L, 2, C, C), lambda n: (0, 0, 0, 0)),
            pl.BlockSpec((L, 10, C), lambda n: (0, 0, 0)),
        ],
        out_specs=pl.BlockSpec((1, hw, C), lambda n: (n, 0, 0)),
        compiler_params=_cparams(1),
    )(x.reshape(N, hw, C), p["pw"], p["vec"])
    return out.reshape(N, H, W, C)


# ---------------------------------------------------------------------------
# Deterministic parameter construction (synthetic, BN folded for inference)
# ---------------------------------------------------------------------------
def _bn_affine(key, c):
    kg, kb = jax.random.split(key)
    gamma = 1.0 + 0.1 * jax.random.normal(kg, (c,), jnp.float32)
    beta = 0.1 * jax.random.normal(kb, (c,), jnp.float32)
    # TODO(synk): for a real checkpoint, fold actual running_mean/running_var here.
    scale = gamma / jnp.sqrt(1.0 + EPS)        # inference BN, default running stats
    shift = beta
    return scale, shift


def init_downsampler_im2col(key, cin, cout):
    cconv = cout - cin
    k1, k2, k3 = jax.random.split(key, 3)
    w = 0.1 * jax.random.normal(k1, (9, cin, cconv), jnp.float32)
    b = 0.1 * jax.random.normal(k2, (cconv,), jnp.float32)
    sc, sh = _bn_affine(k3, cout)
    # Packed (10*Cin, Cout) matrix: conv taps (BN-scaled) into cols [:cconv]; pooled
    # lanes carry the pool-BN diag into cols [cconv:].  Bias+BN shift in `shift`.
    wbig = jnp.zeros((10 * cin, cout), jnp.float32)
    wbig = wbig.at[:9 * cin, :cconv].set((w * sc[:cconv]).reshape(9 * cin, cconv))
    wbig = wbig.at[9 * cin:, cconv:].set(jnp.diag(sc[cconv:]))
    shift = jnp.concatenate([b * sc[:cconv] + sh[:cconv], sh[cconv:]])
    return dict(w=wbig.astype(PW_DTYPE), shift=shift.reshape(1, cout))


def init_downsampler_phase(key, cin, cout):
    cconv = cout - cin
    assert cconv == cin, "phase-form downsampler assumes Cout == 2*Cin (ds2)"
    k1, k2, k3 = jax.random.split(key, 3)
    w = 0.1 * jax.random.normal(k1, (9, cin, cconv), jnp.float32)
    b = 0.1 * jax.random.normal(k2, (cconv,), jnp.float32)
    sc, sh = _bn_affine(k3, cout)
    wfold = (w * sc[:cconv]).astype(PW_DTYPE)                     # (9, Cin, Cconv) bf16
    shift = jnp.concatenate([b * sc[:cconv] + sh[:cconv], sh[cconv:]])
    pscale = sc[cconv:]                                           # pool BN scale
    return dict(w=wfold, shift=shift.reshape(1, cout), pscale=pscale.reshape(1, cin))


def _init_nb1d(key, c):
    ks = jax.random.split(key, 10)
    dw1 = 0.1 * jax.random.normal(ks[0], (3, c), jnp.float32)   # depthwise (3,1)
    db1 = 0.1 * jax.random.normal(ks[1], (1, c), jnp.float32)
    pw1 = 0.1 * jax.random.normal(ks[2], (c, c), jnp.float32)   # 1x1, stored (Cin,Cout)
    pb1 = 0.1 * jax.random.normal(ks[3], (1, c), jnp.float32)
    dw2 = 0.1 * jax.random.normal(ks[4], (3, c), jnp.float32)
    db2 = 0.1 * jax.random.normal(ks[5], (1, c), jnp.float32)
    pw2 = 0.1 * jax.random.normal(ks[6], (c, c), jnp.float32)
    pb2 = 0.1 * jax.random.normal(ks[7], (1, c), jnp.float32)
    s1, h1 = _bn_affine(ks[8], c)
    s2, h2 = _bn_affine(ks[9], c)
    pw1f = pw1 * s1[None, :]
    pb1f = pb1 * s1[None, :] + h1[None, :]
    pw2f = pw2 * s2[None, :]
    pb2f = pb2 * s2[None, :] + h2[None, :]
    pw = jnp.stack([pw1f, pw2f], axis=0)                        # (2, C, C)
    vec = jnp.concatenate([dw1, db1, pb1f, dw2, db2, pb2f], axis=0)   # (10, C)
    return pw, vec


def init_nb1d_chain(key, c, n_blocks):
    keys = jax.random.split(key, n_blocks)
    pws, vecs = zip(*[_init_nb1d(k, c) for k in keys])
    return dict(pw=jnp.stack(pws, 0).astype(PW_DTYPE),          # (L, 2, C, C)
                vec=jnp.stack(vecs, 0))                         # (L, 10, C) f32


def init_encoder(key, num_classes=8):
    keys = jax.random.split(key, 7)
    return dict(
        initial=init_downsampler_im2col(keys[0], 3, 16),
        ds1=init_downsampler_im2col(keys[1], 16, 64),
        nb1=init_nb1d_chain(keys[2], 64, 2),
        ds2=init_downsampler_phase(keys[3], 64, 128),
        nb2=init_nb1d_chain(keys[4], 128, 4),
        # output_conv exists in the module but is only applied when predict=True
        out_w=0.1 * jax.random.normal(keys[5], (128, num_classes), jnp.float32),
        out_b=0.1 * jax.random.normal(keys[6], (1, num_classes), jnp.float32),
    )


# ---------------------------------------------------------------------------
# Encoder forward (matches the PyTorch module; predict=False by default)
# ---------------------------------------------------------------------------
def encoder_forward(x_nchw, params, predict=False):
    x = jnp.transpose(x_nchw, (0, 2, 3, 1)).astype(STREAM_DTYPE)   # NCHW -> NHWC, bf16
    x = downsampler_im2col(x, params["initial"])    # 3  -> 16,  H/2
    x = downsampler_im2col(x, params["ds1"])        # 16 -> 64,  H/4
    x = nb1d_chain(x, params["nb1"], dilations=(1, 1))
    x = downsampler_phase(x, params["ds2"])         # 64 -> 128, H/8
    x = nb1d_chain(x, params["nb2"], dilations=(2, 4, 8, 16))
    x = x.astype(jnp.float32)
    if predict:
        N, H, W, C = x.shape
        x = x.reshape(N * H * W, C) @ params["out_w"] + params["out_b"]
        x = x.reshape(N, H, W, -1)
    return jnp.transpose(x, (0, 3, 1, 2))                          # NHWC -> NCHW


if __name__ == "__main__":
    key = jax.random.PRNGKey(0)
    pkey, xkey = jax.random.split(key)
    params = init_encoder(pkey, num_classes=8)
    # PyTorch module expects NCHW with 3 input channels
    x = jax.random.normal(xkey, (2, 3, 16, 16), jnp.float32)
    out = jax.jit(lambda a: encoder_forward(a, params))(x)
    jax.block_until_ready(out)
    assert out.shape == (2, 128, 2, 2), out.shape
    assert bool(jnp.all(jnp.isfinite(out)))
    print("KERNEL_OK")
</pallas_src>

<mosaic_0001>
module attributes {stable_mosaic.version = 11 : i64} {
  func.func @_ds_matmul_kernel(%arg0: i32, %arg1: i32, %arg2: memref<1x64x30xbf16, #tpu.memory_space<vmem>>, %arg3: memref<30x16xbf16, #tpu.memory_space<vmem>>, %arg4: memref<1x16xf32, #tpu.memory_space<vmem>>, %arg5: memref<1x64x16xbf16, #tpu.memory_space<vmem>>) attributes {dimension_semantics = [#tpu.dimension_semantics<parallel>, #tpu.dimension_semantics<parallel>], iteration_bounds = array<i64: 2, 1>, scalar_prefetch = 0 : i64, scratch_operands = 0 : i64, tpu.core_type = #tpu.core_type<tc>, window_params = [{transform_indices = @transform_0, window_bounds = array<i64: 1, 64, 30>}, {pipeline_mode = #tpu.pipeline_mode<synchronous>, transform_indices = @transform_1, window_bounds = array<i64: 30, 16>}, {pipeline_mode = #tpu.pipeline_mode<synchronous>, transform_indices = @transform_2, window_bounds = array<i64: 1, 16>}, {transform_indices = @transform_3, window_bounds = array<i64: 1, 64, 16>}]} {
    %c0 = arith.constant 0 : index
    %c0_0 = arith.constant 0 : index
    %c0_1 = arith.constant 0 : index
    %0 = vector.load %arg2[%c0, %c0_0, %c0_1] : memref<1x64x30xbf16, #tpu.memory_space<vmem>>, vector<1x64x30xbf16>
    %1 = vector.shape_cast %0 : vector<1x64x30xbf16> to vector<64x30xbf16>
    %c0_2 = arith.constant 0 : index
    %c0_3 = arith.constant 0 : index
    %2 = vector.load %arg3[%c0_2, %c0_3] : memref<30x16xbf16, #tpu.memory_space<vmem>>, vector<30x16xbf16>
    %cst = arith.constant dense<0.000000e+00> : vector<64x16xf32>
    %3 = tpu.matmul %1, %2, %cst {dimension_numbers = #tpu.dot_dimension_numbers<[1], [0], [0], [1], [0, 0, 1, 1], [], []>} : vector<64x30xbf16>, vector<30x16xbf16>, vector<64x16xf32> -> vector<64x16xf32>
    %c0_4 = arith.constant 0 : index
    %c0_5 = arith.constant 0 : index
    %4 = vector.load %arg4[%c0_4, %c0_5] : memref<1x16xf32, #tpu.memory_space<vmem>>, vector<1x16xf32>
    %5 = vector.broadcast %4 : vector<1x16xf32> to vector<64x16xf32>
    %6 = arith.addf %3, %5 : vector<64x16xf32>
    %cst_6 = arith.constant 0.000000e+00 : f32
    %7 = vector.broadcast %cst_6 : f32 to vector<64x16xf32>
    %8 = arith.maximumf %6, %7 : vector<64x16xf32>
    %9 = arith.truncf %8 : vector<64x16xf32> to vector<64x16xbf16>
    %c0_7 = arith.constant 0 : index
    %c0_8 = arith.constant 0 : index
    %c0_9 = arith.constant 0 : index
    %10 = vector.load %arg5[%c0_7, %c0_8, %c0_9] : memref<1x64x16xbf16, #tpu.memory_space<vmem>>, vector<1x64x16xbf16>
    %11 = vector.shape_cast %10 : vector<1x64x16xbf16> to vector<64x16xbf16>
    %12 = vector.shape_cast %9 : vector<64x16xbf16> to vector<1x64x16xbf16>
    tpu.vector_store %arg5[%c0_7, %c0_8, %c0_9], %12 {strides = array<i32>} : memref<1x64x16xbf16, #tpu.memory_space<vmem>>, vector<1x64x16xbf16>,
    return
  }
  func.func @transform_0(%arg0: i32, %arg1: i32) -> (i32, i32, i32) {
    %c0_i32 = arith.constant 0 : i32
    %c0_i32_0 = arith.constant 0 : i32
    return %arg0, %arg1, %c0_i32 : i32, i32, i32
  }
  func.func @transform_1(%arg0: i32, %arg1: i32) -> (i32, i32) {
    %c0_i32 = arith.constant 0 : i32
    %c0_i32_0 = arith.constant 0 : i32
    %c0_i32_1 = arith.constant 0 : i32
    return %c0_i32, %c0_i32_0 : i32, i32
  }
  func.func @transform_2(%arg0: i32, %arg1: i32) -> (i32, i32) {
    %c0_i32 = arith.constant 0 : i32
    %c0_i32_0 = arith.constant 0 : i32
    %c0_i32_1 = arith.constant 0 : i32
    return %c0_i32, %c0_i32_0 : i32, i32
  }
  func.func @transform_3(%arg0: i32, %arg1: i32) -> (i32, i32, i32) {
    %c0_i32 = arith.constant 0 : i32
    %c0_i32_0 = arith.constant 0 : i32
    return %arg0, %arg1, %c0_i32 : i32, i32, i32
  }
}

module attributes {stable_mosaic.version = 11 : i64} {
  func.func @_ds_matmul_kernel(%arg0: i32, %arg1: i32, %arg2: memref<1x16x160xbf16, #tpu.memory_space<vmem>>, %arg3: memref<160x64xbf16, #tpu.memory_space<vmem>>, %arg4: memref<1x64xf32, #tpu.memory_space<vmem>>, %arg5: memref<1x16x64xbf16, #tpu.memory_space<vmem>>) attributes {dimension_semantics = [#tpu.dimension_semantics<parallel>, #tpu.dimension_semantics<parallel>], iteration_bounds = array<i64: 2, 1>, scalar_prefetch = 0 : i64, scratch_operands = 0 : i64, tpu.core_type = #tpu.core_type<tc>, window_params = [{transform_indices = @transform_0, window_bounds = array<i64: 1, 16, 160>}, {pipeline_mode = #tpu.pipeline_mode<synchronous>, transform_indices = @transform_1, window_bounds = array<i64: 160, 64>}, {pipeline_mode = #tpu.pipeline_mode<synchronous>, transform_indices = @transform_2, window_bounds = array<i64: 1, 64>}, {transform_indices = @transform_3, window_bounds = array<i64: 1, 16, 64>}]} {
    %c0 = arith.constant 0 : index
    %c0_0 = arith.constant 0 : index
    %c0_1 = arith.constant 0 : index
    %0 = vector.load %arg2[%c0, %c0_0, %c0_1] : memref<1x16x160xbf16, #tpu.memory_space<vmem>>, vector<1x16x160xbf16>
    %1 = vector.shape_cast %0 : vector<1x16x160xbf16> to vector<16x160xbf16>
    %c0_2 = arith.constant 0 : index
    %c0_3 = arith.constant 0 : index
    %2 = vector.load %arg3[%c0_2, %c0_3] : memref<160x64xbf16, #tpu.memory_space<vmem>>, vector<160x64xbf16>
    %cst = arith.constant dense<0.000000e+00> : vector<16x64xf32>
    %3 = tpu.matmul %1, %2, %cst {dimension_numbers = #tpu.dot_dimension_numbers<[1], [0], [0], [1], [0, 0, 1, 1], [], []>} : vector<16x160xbf16>, vector<160x64xbf16>, vector<16x64xf32> -> vector<16x64xf32>
    %c0_4 = arith.constant 0 : index
    %c0_5 = arith.constant 0 : index
    %4 = vector.load %arg4[%c0_4, %c0_5] : memref<1x64xf32, #tpu.memory_space<vmem>>, vector<1x64xf32>
    %5 = vector.broadcast %4 : vector<1x64xf32> to vector<16x64xf32>
    %6 = arith.addf %3, %5 : vector<16x64xf32>
    %cst_6 = arith.constant 0.000000e+00 : f32
    %7 = vector.broadcast %cst_6 : f32 to vector<16x64xf32>
    %8 = arith.maximumf %6, %7 : vector<16x64xf32>
    %9 = arith.truncf %8 : vector<16x64xf32> to vector<16x64xbf16>
    %c0_7 = arith.constant 0 : index
    %c0_8 = arith.constant 0 : index
    %c0_9 = arith.constant 0 : index
    %10 = vector.load %arg5[%c0_7, %c0_8, %c0_9] : memref<1x16x64xbf16, #tpu.memory_space<vmem>>, vector<1x16x64xbf16>
    %11 = vector.shape_cast %10 : vector<1x16x64xbf16> to vector<16x64xbf16>
    %12 = vector.shape_cast %9 : vector<16x64xbf16> to vector<1x16x64xbf16>
    tpu.vector_store %arg5[%c0_7, %c0_8, %c0_9], %12 {strides = array<i32>} : memref<1x16x64xbf16, #tpu.memory_space<vmem>>, vector<1x16x64xbf16>,
    return
  }
  func.func @transform_0(%arg0: i32, %arg1: i32) -> (i32, i32, i32) {
    %c0_i32 = arith.constant 0 : i32
    %c0_i32_0 = arith.constant 0 : i32
    return %arg0, %arg1, %c0_i32 : i32, i32, i32
  }
  func.func @transform_1(%arg0: i32, %arg1: i32) -> (i32, i32) {
    %c0_i32 = arith.constant 0 : i32
    %c0_i32_0 = arith.constant 0 : i32
    %c0_i32_1 = arith.constant 0 : i32
    return %c0_i32, %c0_i32_0 : i32, i32
  }
  func.func @transform_2(%arg0: i32, %arg1: i32) -> (i32, i32) {
    %c0_i32 = arith.constant 0 : i32
    %c0_i32_0 = arith.constant 0 : i32
    %c0_i32_1 = arith.constant 0 : i32
    return %c0_i32, %c0_i32_0 : i32, i32
  }
  func.func @transform_3(%arg0: i32, %arg1: i32) -> (i32, i32, i32) {
    %c0_i32 = arith.constant 0 : i32
    %c0_i32_0 = arith.constant 0 : i32
    return %arg0, %arg1, %c0_i32 : i32, i32, i32
  }
}

module attributes {stable_mosaic.version = 11 : i64} {
  func.func @_nb1d_chain_kernel(%arg0: i32, %arg1: memref<1x16x64xbf16, #tpu.memory_space<vmem>>, %arg2: memref<2x2x64x64xbf16, #tpu.memory_space<vmem>>, %arg3: memref<2x10x64xf32, #tpu.memory_space<vmem>>, %arg4: memref<1x16x64xbf16, #tpu.memory_space<vmem>>) attributes {dimension_semantics = [#tpu.dimension_semantics<parallel>], iteration_bounds = array<i64: 2>, scalar_prefetch = 0 : i64, scratch_operands = 0 : i64, tpu.core_type = #tpu.core_type<tc>, window_params = [{transform_indices = @transform_0, window_bounds = array<i64: 1, 16, 64>}, {pipeline_mode = #tpu.pipeline_mode<synchronous>, transform_indices = @transform_1, window_bounds = array<i64: 2, 2, 64, 64>}, {pipeline_mode = #tpu.pipeline_mode<synchronous>, transform_indices = @transform_2, window_bounds = array<i64: 2, 10, 64>}, {transform_indices = @transform_3, window_bounds = array<i64: 1, 16, 64>}]} {
    %c0 = arith.constant 0 : index
    %c0_0 = arith.constant 0 : index
    %c0_1 = arith.constant 0 : index
    %0 = vector.load %arg1[%c0, %c0_0, %c0_1] : memref<1x16x64xbf16, #tpu.memory_space<vmem>>, vector<1x16x64xbf16>
    %1 = vector.shape_cast %0 : vector<1x16x64xbf16> to vector<16x64xbf16>
    %2 = arith.extf %1 : vector<16x64xbf16> to vector<16x64xf32>
    %3 = tpu.iota {dimensions = array<i32: 0>} : vector<16x1xi32>
    %c0_2 = arith.constant 0 : index
    %c0_3 = arith.constant 0 : index
    %c0_4 = arith.constant 0 : index
    %4 = vector.load %arg3[%c0_2, %c0_3, %c0_4] : memref<2x10x64xf32, #tpu.memory_space<vmem>>, vector<1x3x64xf32>
    %5 = vector.shape_cast %4 : vector<1x3x64xf32> to vector<3x64xf32>
    %c0_5 = arith.constant 0 : index
    %c3 = arith.constant 3 : index
    %c0_6 = arith.constant 0 : index
    %6 = vector.load %arg3[%c0_5, %c3, %c0_6] : memref<2x10x64xf32, #tpu.memory_space<vmem>>, vector<1x1x64xf32>
    %7 = vector.shape_cast %6 : vector<1x1x64xf32> to vector<1x64xf32>
    %c0_7 = arith.constant 0 : index
    %c4 = arith.constant 4 : index
    %c0_8 = arith.constant 0 : index
    %8 = vector.load %arg3[%c0_7, %c4, %c0_8] : memref<2x10x64xf32, #tpu.memory_space<vmem>>, vector<1x1x64xf32>
    %9 = vector.shape_cast %8 : vector<1x1x64xf32> to vector<1x64xf32>
    %c0_9 = arith.constant 0 : index
    %c5 = arith.constant 5 : index
    %c0_10 = arith.constant 0 : index
    %10 = vector.load %arg3[%c0_9, %c5, %c0_10] : memref<2x10x64xf32, #tpu.memory_space<vmem>>, vector<1x3x64xf32>
    %11 = vector.shape_cast %10 : vector<1x3x64xf32> to vector<3x64xf32>
    %c0_11 = arith.constant 0 : index
    %c8 = arith.constant 8 : index
    %c0_12 = arith.constant 0 : index
    %12 = vector.load %arg3[%c0_11, %c8, %c0_12] : memref<2x10x64xf32, #tpu.memory_space<vmem>>, vector<1x1x64xf32>
    %13 = vector.shape_cast %12 : vector<1x1x64xf32> to vector<1x64xf32>
    %c0_13 = arith.constant 0 : index
    %c9 = arith.constant 9 : index
    %c0_14 = arith.constant 0 : index
    %14 = vector.load %arg3[%c0_13, %c9, %c0_14] : memref<2x10x64xf32, #tpu.memory_space<vmem>>, vector<1x1x64xf32>
    %15 = vector.shape_cast %14 : vector<1x1x64xf32> to vector<1x64xf32>
    %c0_15 = arith.constant 0 : index
    %c0_16 = arith.constant 0 : index
    %c0_17 = arith.constant 0 : index
    %c0_18 = arith.constant 0 : index
    %16 = vector.load %arg2[%c0_15, %c0_16, %c0_17, %c0_18] : memref<2x2x64x64xbf16, #tpu.memory_space<vmem>>, vector<1x1x64x64xbf16>
    %17 = vector.shape_cast %16 : vector<1x1x64x64xbf16> to vector<64x64xbf16>
    %c0_19 = arith.constant 0 : index
    %c1 = arith.constant 1 : index
    %c0_20 = arith.constant 0 : index
    %c0_21 = arith.constant 0 : index
    %18 = vector.load %arg2[%c0_19, %c1, %c0_20, %c0_21] : memref<2x2x64x64xbf16, #tpu.memory_space<vmem>>, vector<1x1x64x64xbf16>
    %19 = vector.shape_cast %18 : vector<1x1x64x64xbf16> to vector<64x64xbf16>
    %20 = vector.extract_strided_slice %5 {offsets = [0, 0], sizes = [1, 64], strides = [1, 1]} : vector<3x64xf32> to vector<1x64xf32>
    %c4_i32 = arith.constant 4 : i32
    %21 = tpu.dynamic_rotate %2 by %c4_i32 dim 0 : vector<16x64xf32>, i32 -> vector<16x64xf32>
    %c4_i32_22 = arith.constant 4 : i32
    %22 = vector.broadcast %c4_i32_22 : i32 to vector<16x1xi32>
    %23 = arith.cmpi sge, %3, %22 : vector<16x1xi32>
    %cst = arith.constant 0.000000e+00 : f32
    %24 = vector.shape_cast %23 : vector<16x1xi1> to vector<16x1xi1>
    %25 = vector.broadcast %24 : vector<16x1xi1> to vector<16x64xi1>
    %26 = vector.broadcast %cst : f32 to vector<16x64xf32>
    %27 = arith.select %25, %21, %26 : vector<16x64xi1>, vector<16x64xf32>
    %28 = vector.broadcast %20 : vector<1x64xf32> to vector<16x64xf32>
    %29 = arith.mulf %28, %27 : vector<16x64xf32>
    %30 = vector.extract_strided_slice %5 {offsets = [1, 0], sizes = [1, 64], strides = [1, 1]} : vector<3x64xf32> to vector<1x64xf32>
    %31 = vector.broadcast %30 : vector<1x64xf32> to vector<16x64xf32>
    %32 = arith.mulf %31, %2 : vector<16x64xf32>
    %33 = arith.addf %29, %32 : vector<16x64xf32>
    %34 = vector.extract_strided_slice %5 {offsets = [2, 0], sizes = [1, 64], strides = [1, 1]} : vector<3x64xf32> to vector<1x64xf32>
    %c12_i32 = arith.constant 12 : i32
    %35 = tpu.dynamic_rotate %2 by %c12_i32 dim 0 : vector<16x64xf32>, i32 -> vector<16x64xf32>
    %c12_i32_23 = arith.constant 12 : i32
    %36 = vector.broadcast %c12_i32_23 : i32 to vector<16x1xi32>
    %37 = arith.cmpi slt, %3, %36 : vector<16x1xi32>
    %cst_24 = arith.constant 0.000000e+00 : f32
    %38 = vector.shape_cast %37 : vector<16x1xi1> to vector<16x1xi1>
    %39 = vector.broadcast %38 : vector<16x1xi1> to vector<16x64xi1>
    %40 = vector.broadcast %cst_24 : f32 to vector<16x64xf32>
    %41 = arith.select %39, %35, %40 : vector<16x64xi1>, vector<16x64xf32>
    %42 = vector.broadcast %34 : vector<1x64xf32> to vector<16x64xf32>
    %43 = arith.mulf %42, %41 : vector<16x64xf32>
    %44 = arith.addf %33, %43 : vector<16x64xf32>
    %45 = vector.broadcast %7 : vector<1x64xf32> to vector<16x64xf32>
    %46 = arith.addf %44, %45 : vector<16x64xf32>
    %cst_25 = arith.constant 0.000000e+00 : f32
    %47 = vector.broadcast %cst_25 : f32 to vector<16x64xf32>
    %48 = arith.maximumf %46, %47 : vector<16x64xf32>
    %49 = arith.truncf %48 : vector<16x64xf32> to vector<16x64xbf16>
    %cst_26 = arith.constant dense<0.000000e+00> : vector<16x64xf32>
    %50 = tpu.matmul %49, %17, %cst_26 {dimension_numbers = #tpu.dot_dimension_numbers<[1], [0], [0], [1], [0, 0, 1, 1], [], []>} : vector<16x64xbf16>, vector<64x64xbf16>, vector<16x64xf32> -> vector<16x64xf32>
    %51 = vector.broadcast %9 : vector<1x64xf32> to vector<16x64xf32>
    %52 = arith.addf %50, %51 : vector<16x64xf32>
    %cst_27 = arith.constant 0.000000e+00 : f32
    %53 = vector.broadcast %cst_27 : f32 to vector<16x64xf32>
    %54 = arith.maximumf %52, %53 : vector<16x64xf32>
    %55 = vector.extract_strided_slice %11 {offsets = [0, 0], sizes = [1, 64], strides = [1, 1]} : vector<3x64xf32> to vector<1x64xf32>
    %c4_i32_28 = arith.constant 4 : i32
    %56 = tpu.dynamic_rotate %54 by %c4_i32_28 dim 0 : vector<16x64xf32>, i32 -> vector<16x64xf32>
    %c4_i32_29 = arith.constant 4 : i32
    %57 = vector.broadcast %c4_i32_29 : i32 to vector<16x1xi32>
    %58 = arith.cmpi sge, %3, %57 : vector<16x1xi32>
    %cst_30 = arith.constant 0.000000e+00 : f32
    %59 = vector.shape_cast %58 : vector<16x1xi1> to vector<16x1xi1>
    %60 = vector.broadcast %59 : vector<16x1xi1> to vector<16x64xi1>
    %61 = vector.broadcast %cst_30 : f32 to vector<16x64xf32>
    %62 = arith.select %60, %56, %61 : vector<16x64xi1>, vector<16x64xf32>
    %63 = vector.broadcast %55 : vector<1x64xf32> to vector<16x64xf32>
    %64 = arith.mulf %63, %62 : vector<16x64xf32>
    %65 = vector.extract_strided_slice %11 {offsets = [1, 0], sizes = [1, 64], strides = [1, 1]} : vector<3x64xf32> to vector<1x64xf32>
    %66 = vector.broadcast %65 : vector<1x64xf32> to vector<16x64xf32>
    %67 = arith.mulf %66, %54 : vector<16x64xf32>
    %68 = arith.addf %64, %67 : vector<16x64xf32>
    %69 = vector.extract_strided_slice %11 {offsets = [2, 0], sizes = [1, 64], strides = [1, 1]} : vector<3x64xf32> to vector<1x64xf32>
    %c12_i32_31 = arith.constant 12 : i32
    %70 = tpu.dynamic_rotate %54 by %c12_i32_31 dim 0 : vector<16x64xf32>, i32 -> vector<16x64xf32>
    %c12_i32_32 = arith.constant 12 : i32
    %71 = vector.broadcast %c12_i32_32 : i32 to vector<16x1xi32>
    %72 = arith.cmpi slt, %3, %71 : vector<16x1xi32>
    %cst_33 = arith.constant 0.000000e+00 : f32
    %73 = vector.shape_cast %72 : vector<16x1xi1> to vector<16x1xi1>
    %74 = vector.broadcast %73 : vector<16x1xi1> to vector<16x64xi1>
    %75 = vector.broadcast %cst_33 : f32 to vector<16x64xf32>
    %76 = arith.select %74, %70, %75 : vector<16x64xi1>, vector<16x64xf32>
    %77 = vector.broadcast %69 : vector<1x64xf32> to vector<16x64xf32>
    %78 = arith.mulf %77, %76 : vector<16x64xf32>
    %79 = arith.addf %68, %78 : vector<16x64xf32>
    %80 = vector.broadcast %13 : vector<1x64xf32> to vector<16x64xf32>
    %81 = arith.addf %79, %80 : vector<16x64xf32>
    %cst_34 = arith.constant 0.000000e+00 : f32
    %82 = vector.broadcast %cst_34 : f32 to vector<16x64xf32>
    %83 = arith.maximumf %81, %82 : vector<16x64xf32>
    %84 = arith.truncf %83 : vector<16x64xf32> to vector<16x64xbf16>
    %cst_35 = arith.constant dense<0.000000e+00> : vector<16x64xf32>
    %85 = tpu.matmul %84, %19, %cst_35 {dimension_numbers = #tpu.dot_dimension_numbers<[1], [0], [0], [1], [0, 0, 1, 1], [], []>} : vector<16x64xbf16>, vector<64x64xbf16>, vector<16x64xf32> -> vector<16x64xf32>
    %86 = vector.broadcast %15 : vector<1x64xf32> to vector<16x64xf32>
    %87 = arith.addf %85, %86 : vector<16x64xf32>
    %88 = arith.addf %87, %2 : vector<16x64xf32>
    %cst_36 = arith.constant 0.000000e+00 : f32
    %89 = vector.broadcast %cst_36 : f32 to vector<16x64xf32>
    %90 = arith.maximumf %88, %89 : vector<16x64xf32>
    %c1_37 = arith.constant 1 : index
    %c0_38 = arith.constant 0 : index
    %c0_39 = arith.constant 0 : index
    %91 = vector.load %arg3[%c1_37, %c0_38, %c0_39] : memref<2x10x64xf32, #tpu.memory_space<vmem>>, vector<1x3x64xf32>
    %92 = vector.shape_cast %91 : vector<1x3x64xf32> to vector<3x64xf32>
    %c1_40 = arith.constant 1 : index
    %c3_41 = arith.constant 3 : index
    %c0_42 = arith.constant 0 : index
    %93 = vector.load %arg3[%c1_40, %c3_41, %c0_42] : memref<2x10x64xf32, #tpu.memory_space<vmem>>, vector<1x1x64xf32>
    %94 = vector.shape_cast %93 : vector<1x1x64xf32> to vector<1x64xf32>
    %c1_43 = arith.constant 1 : index
    %c4_44 = arith.constant 4 : index
    %c0_45 = arith.constant 0 : index
    %95 = vector.load %arg3[%c1_43, %c4_44, %c0_45] : memref<2x10x64xf32, #tpu.memory_space<vmem>>, vector<1x1x64xf32>
    %96 = vector.shape_cast %95 : vector<1x1x64xf32> to vector<1x64xf32>
    %c1_46 = arith.constant 1 : index
    %c5_47 = arith.constant 5 : index
    %c0_48 = arith.constant 0 : index
    %97 = vector.load %arg3[%c1_46, %c5_47, %c0_48] : memref<2x10x64xf32, #tpu.memory_space<vmem>>, vector<1x3x64xf32>
    %98 = vector.shape_cast %97 : vector<1x3x64xf32> to vector<3x64xf32>
    %c1_49 = arith.constant 1 : index
    %c8_50 = arith.constant 8 : index
    %c0_51 = arith.constant 0 : index
    %99 = vector.load %arg3[%c1_49, %c8_50, %c0_51] : memref<2x10x64xf32, #tpu.memory_space<vmem>>, vector<1x1x64xf32>
    %100 = vector.shape_cast %99 : vector<1x1x64xf32> to vector<1x64xf32>
    %c1_52 = arith.constant 1 : index
    %c9_53 = arith.constant 9 : index
    %c0_54 = arith.constant 0 : index
    %101 = vector.load %arg3[%c1_52, %c9_53, %c0_54] : memref<2x10x64xf32, #tpu.memory_space<vmem>>, vector<1x1x64xf32>
    %102 = vector.shape_cast %101 : vector<1x1x64xf32> to vector<1x64xf32>
    %c1_55 = arith.constant 1 : index
    %c0_56 = arith.constant 0 : index
    %c0_57 = arith.constant 0 : index
    %c0_58 = arith.constant 0 : index
    %103 = vector.load %arg2[%c1_55, %c0_56, %c0_57, %c0_58] : memref<2x2x64x64xbf16, #tpu.memory_space<vmem>>, vector<1x1x64x64xbf16>
    %104 = vector.shape_cast %103 : vector<1x1x64x64xbf16> to vector<64x64xbf16>
    %c1_59 = arith.constant 1 : index
    %c1_60 = arith.constant 1 : index
    %c0_61 = arith.constant 0 : index
    %c0_62 = arith.constant 0 : index
    %105 = vector.load %arg2[%c1_59, %c1_60, %c0_61, %c0_62] : memref<2x2x64x64xbf16, #tpu.memory_space<vmem>>, vector<1x1x64x64xbf16>
    %106 = vector.shape_cast %105 : vector<1x1x64x64xbf16> to vector<64x64xbf16>
    %107 = vector.extract_strided_slice %92 {offsets = [0, 0], sizes = [1, 64], strides = [1, 1]} : vector<3x64xf32> to vector<1x64xf32>
    %c4_i32_63 = arith.constant 4 : i32
    %108 = tpu.dynamic_rotate %90 by %c4_i32_63 dim 0 : vector<16x64xf32>, i32 -> vector<16x64xf32>
    %c4_i32_64 = arith.constant 4 : i32
    %109 = vector.broadcast %c4_i32_64 : i32 to vector<16x1xi32>
    %110 = arith.cmpi sge, %3, %109 : vector<16x1xi32>
    %cst_65 = arith.constant 0.000000e+00 : f32
    %111 = vector.shape_cast %110 : vector<16x1xi1> to vector<16x1xi1>
    %112 = vector.broadcast %111 : vector<16x1xi1> to vector<16x64xi1>
    %113 = vector.broadcast %cst_65 : f32 to vector<16x64xf32>
    %114 = arith.select %112, %108, %113 : vector<16x64xi1>, vector<16x64xf32>
    %115 = vector.broadcast %107 : vector<1x64xf32> to vector<16x64xf32>
    %116 = arith.mulf %115, %114 : vector<16x64xf32>
    %117 = vector.extract_strided_slice %92 {offsets = [1, 0], sizes = [1, 64], strides = [1, 1]} : vector<3x64xf32> to vector<1x64xf32>
    %118 = vector.broadcast %117 : vector<1x64xf32> to vector<16x64xf32>
    %119 = arith.mulf %118, %90 : vector<16x64xf32>
    %120 = arith.addf %116, %119 : vector<16x64xf32>
    %121 = vector.extract_strided_slice %92 {offsets = [2, 0], sizes = [1, 64], strides = [1, 1]} : vector<3x64xf32> to vector<1x64xf32>
    %c12_i32_66 = arith.constant 12 : i32
    %122 = tpu.dynamic_rotate %90 by %c12_i32_66 dim 0 : vector<16x64xf32>, i32 -> vector<16x64xf32>
    %c12_i32_67 = arith.constant 12 : i32
    %123 = vector.broadcast %c12_i32_67 : i32 to vector<16x1xi32>
    %124 = arith.cmpi slt, %3, %123 : vector<16x1xi32>
    %cst_68 = arith.constant 0.000000e+00 : f32
    %125 = vector.shape_cast %124 : vector<16x1xi1> to vector<16x1xi1>
    %126 = vector.broadcast %125 : vector<16x1xi1> to vector<16x64xi1>
    %127 = vector.broadcast %cst_68 : f32 to vector<16x64xf32>
    %128 = arith.select %126, %122, %127 : vector<16x64xi1>, vector<16x64xf32>
    %129 = vector.broadcast %121 : vector<1x64xf32> to vector<16x64xf32>
    %130 = arith.mulf %129, %128 : vector<16x64xf32>
    %131 = arith.addf %120, %130 : vector<16x64xf32>
    %132 = vector.broadcast %94 : vector<1x64xf32> to vector<16x64xf32>
    %133 = arith.addf %131, %132 : vector<16x64xf32>
    %cst_69 = arith.constant 0.000000e+00 : f32
    %134 = vector.broadcast %cst_69 : f32 to vector<16x64xf32>
    %135 = arith.maximumf %133, %134 : vector<16x64xf32>
    %136 = arith.truncf %135 : vector<16x64xf32> to vector<16x64xbf16>
    %cst_70 = arith.constant dense<0.000000e+00> : vector<16x64xf32>
    %137 = tpu.matmul %136, %104, %cst_70 {dimension_numbers = #tpu.dot_dimension_numbers<[1], [0], [0], [1], [0, 0, 1, 1], [], []>} : vector<16x64xbf16>, vector<64x64xbf16>, vector<16x64xf32> -> vector<16x64xf32>
    %138 = vector.broadcast %96 : vector<1x64xf32> to vector<16x64xf32>
    %139 = arith.addf %137, %138 : vector<16x64xf32>
    %cst_71 = arith.constant 0.000000e+00 : f32
    %140 = vector.broadcast %cst_71 : f32 to vector<16x64xf32>
    %141 = arith.maximumf %139, %140 : vector<16x64xf32>
    %142 = vector.extract_strided_slice %98 {offsets = [0, 0], sizes = [1, 64], strides = [1, 1]} : vector<3x64xf32> to vector<1x64xf32>
    %c4_i32_72 = arith.constant 4 : i32
    %143 = tpu.dynamic_rotate %141 by %c4_i32_72 dim 0 : vector<16x64xf32>, i32 -> vector<16x64xf32>
    %c4_i32_73 = arith.constant 4 : i32
    %144 = vector.broadcast %c4_i32_73 : i32 to vector<16x1xi32>
    %145 = arith.cmpi sge, %3, %144 : vector<16x1xi32>
    %cst_74 = arith.constant 0.000000e+00 : f32
    %146 = vector.shape_cast %145 : vector<16x1xi1> to vector<16x1xi1>
    %147 = vector.broadcast %146 : vector<16x1xi1> to vector<16x64xi1>
    %148 = vector.broadcast %cst_74 : f32 to vector<16x64xf32>
    %149 = arith.select %147, %143, %148 : vector<16x64xi1>, vector<16x64xf32>
    %150 = vector.broadcast %142 : vector<1x64xf32> to vector<16x64xf32>
    %151 = arith.mulf %150, %149 : vector<16x64xf32>
    %152 = vector.extract_strided_slice %98 {offsets = [1, 0], sizes = [1, 64], strides = [1, 1]} : vector<3x64xf32> to vector<1x64xf32>
    %153 = vector.broadcast %152 : vector<1x64xf32> to vector<16x64xf32>
    %154 = arith.mulf %153, %141 : vector<16x64xf32>
    %155 = arith.addf %151, %154 : vector<16x64xf32>
    %156 = vector.extract_strided_slice %98 {offsets = [2, 0], sizes = [1, 64], strides = [1, 1]} : vector<3x64xf32> to vector<1x64xf32>
    %c12_i32_75 = arith.constant 12 : i32
    %157 = tpu.dynamic_rotate %141 by %c12_i32_75 dim 0 : vector<16x64xf32>, i32 -> vector<16x64xf32>
    %c12_i32_76 = arith.constant 12 : i32
    %158 = vector.broadcast %c12_i32_76 : i32 to vector<16x1xi32>
    %159 = arith.cmpi slt, %3, %158 : vector<16x1xi32>
    %cst_77 = arith.constant 0.000000e+00 : f32
    %160 = vector.shape_cast %159 : vector<16x1xi1> to vector<16x1xi1>
    %161 = vector.broadcast %160 : vector<16x1xi1> to vector<16x64xi1>
    %162 = vector.broadcast %cst_77 : f32 to vector<16x64xf32>
    %163 = arith.select %161, %157, %162 : vector<16x64xi1>, vector<16x64xf32>
    %164 = vector.broadcast %156 : vector<1x64xf32> to vector<16x64xf32>
    %165 = arith.mulf %164, %163 : vector<16x64xf32>
    %166 = arith.addf %155, %165 : vector<16x64xf32>
    %167 = vector.broadcast %100 : vector<1x64xf32> to vector<16x64xf32>
    %168 = arith.addf %166, %167 : vector<16x64xf32>
    %cst_78 = arith.constant 0.000000e+00 : f32
    %169 = vector.broadcast %cst_78 : f32 to vector<16x64xf32>
    %170 = arith.maximumf %168, %169 : vector<16x64xf32>
    %171 = arith.truncf %170 : vector<16x64xf32> to vector<16x64xbf16>
    %cst_79 = arith.constant dense<0.000000e+00> : vector<16x64xf32>
    %172 = tpu.matmul %171, %106, %cst_79 {dimension_numbers = #tpu.dot_dimension_numbers<[1], [0], [0], [1], [0, 0, 1, 1], [], []>} : vector<16x64xbf16>, vector<64x64xbf16>, vector<16x64xf32> -> vector<16x64xf32>
    %173 = vector.broadcast %102 : vector<1x64xf32> to vector<16x64xf32>
    %174 = arith.addf %172, %173 : vector<16x64xf32>
    %175 = arith.addf %174, %90 : vector<16x64xf32>
    %cst_80 = arith.constant 0.000000e+00 : f32
    %176 = vector.broadcast %cst_80 : f32 to vector<16x64xf32>
    %177 = arith.maximumf %175, %176 : vector<16x64xf32>
    %178 = arith.truncf %177 : vector<16x64xf32> to vector<16x64xbf16>
    %c0_81 = arith.constant 0 : index
    %c0_82 = arith.constant 0 : index
    %c0_83 = arith.constant 0 : index
    %179 = vector.load %arg4[%c0_81, %c0_82, %c0_83] : memref<1x16x64xbf16, #tpu.memory_space<vmem>>, vector<1x16x64xbf16>
    %180 = vector.shape_cast %179 : vector<1x16x64xbf16> to vector<16x64xbf16>
    %181 = vector.shape_cast %178 : vector<16x64xbf16> to vector<1x16x64xbf16>
    tpu.vector_store %arg4[%c0_81, %c0_82, %c0_83], %181 {strides = array<i32>} : memref<1x16x64xbf16, #tpu.memory_space<vmem>>, vector<1x16x64xbf16>,
    return
  }
  func.func @transform_0(%arg0: i32) -> (i32, i32, i32) {
    %c0_i32 = arith.constant 0 : i32
    %c0_i32_0 = arith.constant 0 : i32
    %c0_i32_1 = arith.constant 0 : i32
    return %arg0, %c0_i32, %c0_i32_0 : i32, i32, i32
  }
  func.func @transform_1(%arg0: i32) -> (i32, i32, i32, i32) {
    %c0_i32 = arith.constant 0 : i32
    %c0_i32_0 = arith.constant 0 : i32
    %c0_i32_1 = arith.constant 0 : i32
    %c0_i32_2 = arith.constant 0 : i32
    %c0_i32_3 = arith.constant 0 : i32
    return %c0_i32, %c0_i32_0, %c0_i32_1, %c0_i32_2 : i32, i32, i32, i32
  }
  func.func @transform_2(%arg0: i32) -> (i32, i32, i32) {
    %c0_i32 = arith.constant 0 : i32
    %c0_i32_0 = arith.constant 0 : i32
    %c0_i32_1 = arith.constant 0 : i32
    %c0_i32_2 = arith.constant 0 : i32
    return %c0_i32, %c0_i32_0, %c0_i32_1 : i32, i32, i32
  }
  func.func @transform_3(%arg0: i32) -> (i32, i32, i32) {
    %c0_i32 = arith.constant 0 : i32
    %c0_i32_0 = arith.constant 0 : i32
    %c0_i32_1 = arith.constant 0 : i32
    return %arg0, %c0_i32, %c0_i32_0 : i32, i32, i32
  }
}

module attributes {stable_mosaic.version = 11 : i64} {
  func.func @_ds_phase_kernel(%arg0: i32, %arg1: memref<1x4x4x64xbf16, #tpu.memory_space<vmem>>, %arg2: memref<9x64x64xbf16, #tpu.memory_space<vmem>>, %arg3: memref<1x128xf32, #tpu.memory_space<vmem>>, %arg4: memref<1x64xf32, #tpu.memory_space<vmem>>, %arg5: memref<1x4x128xbf16, #tpu.memory_space<vmem>>) attributes {dimension_semantics = [#tpu.dimension_semantics<parallel>], iteration_bounds = array<i64: 2>, scalar_prefetch = 0 : i64, scratch_operands = 0 : i64, tpu.core_type = #tpu.core_type<tc>, window_params = [{transform_indices = @transform_0, window_bounds = array<i64: 1, 4, 4, 64>}, {pipeline_mode = #tpu.pipeline_mode<synchronous>, transform_indices = @transform_1, window_bounds = array<i64: 9, 64, 64>}, {pipeline_mode = #tpu.pipeline_mode<synchronous>, transform_indices = @transform_2, window_bounds = array<i64: 1, 128>}, {pipeline_mode = #tpu.pipeline_mode<synchronous>, transform_indices = @transform_3, window_bounds = array<i64: 1, 64>}, {transform_indices = @transform_4, window_bounds = array<i64: 1, 4, 128>}]} {
    %0 = tpu.iota {dimensions = array<i32: 0>} : vector<4x1xi32>
    %c2_i32 = arith.constant 2 : i32
    %1 = vector.broadcast %c2_i32 : i32 to vector<4x1xi32>
    %2 = arith.cmpi sge, %0, %1 : vector<4x1xi32>
    %c2_i32_0 = arith.constant 2 : i32
    %c0_i32 = arith.constant 0 : i32
    %3 = arith.cmpi eq, %c2_i32_0, %c0_i32 : i32
    %c1_i32 = arith.constant 1 : i32
    %4 = arith.select %3, %c1_i32, %c2_i32_0 : i32
    %5 = vector.broadcast %4 : i32 to vector<4x1xi32>
    %6 = arith.remsi %0, %5 : vector<4x1xi32>
    %c0_i32_1 = arith.constant 0 : i32
    %7 = vector.broadcast %c0_i32_1 : i32 to vector<4x1xi32>
    %8 = arith.cmpi ne, %6, %7 : vector<4x1xi32>
    %c0_i32_2 = arith.constant 0 : i32
    %9 = vector.broadcast %c0_i32_2 : i32 to vector<4x1xi32>
    %10 = arith.cmpi slt, %6, %9 : vector<4x1xi32>
    %c0_i32_3 = arith.constant 0 : i32
    %11 = arith.cmpi slt, %4, %c0_i32_3 : i32
    %12 = vector.broadcast %11 : i1 to vector<4x1xi1>
    %13 = vector.broadcast %12 : vector<4x1xi1> to vector<4x1xi1>
    %14 = arith.xori %10, %13 : vector<4x1xi1>
    %15 = arith.andi %14, %8 : vector<4x1xi1>
    %16 = vector.broadcast %4 : i32 to vector<4x1xi32>
    %17 = arith.addi %6, %16 : vector<4x1xi32>
    %18 = arith.select %15, %17, %6 : vector<4x1xi1>, vector<4x1xi32>
    %c0_i32_4 = arith.constant 0 : i32
    %19 = vector.broadcast %c0_i32_4 : i32 to vector<4x1xi32>
    %20 = arith.cmpi ne, %18, %19 : vector<4x1xi32>
    %cst = arith.constant 0.000000e+00 : f32
    %21 = vector.broadcast %cst : f32 to vector<4x64xf32>
    %c0 = arith.constant 0 : index
    %c3 = arith.constant 3 : index
    %c0_5 = arith.constant 0 : index
    %c0_6 = arith.constant 0 : index
    %22 = vector.load %arg1[%c0, %c3, %c0_5, %c0_6] : memref<1x4x4x64xbf16, #tpu.memory_space<vmem>>, vector<1x1x4x64xbf16>
    %23 = vector.shape_cast %22 : vector<1x1x4x64xbf16> to vector<4x64xbf16>
    %24 = arith.extf %23 : vector<4x64xbf16> to vector<4x64xf32>
    %c3_i32 = arith.constant 3 : i32
    %25 = tpu.dynamic_rotate %24 by %c3_i32 dim 0 : vector<4x64xf32>, i32 -> vector<4x64xf32>
    %26 = arith.andi %2, %20 : vector<4x1xi1>
    %cst_7 = arith.constant 0.000000e+00 : f32
    %27 = vector.shape_cast %26 : vector<4x1xi1> to vector<4x1xi1>
    %28 = vector.broadcast %27 : vector<4x1xi1> to vector<4x64xi1>
    %29 = vector.broadcast %cst_7 : f32 to vector<4x64xf32>
    %30 = arith.select %28, %25, %29 : vector<4x64xi1>, vector<4x64xf32>
    %31 = arith.truncf %30 : vector<4x64xf32> to vector<4x64xbf16>
    %c0_8 = arith.constant 0 : index
    %c0_9 = arith.constant 0 : index
    %c0_10 = arith.constant 0 : index
    %32 = vector.load %arg2[%c0_8, %c0_9, %c0_10] : memref<9x64x64xbf16, #tpu.memory_space<vmem>>, vector<1x64x64xbf16>
    %33 = vector.shape_cast %32 : vector<1x64x64xbf16> to vector<64x64xbf16>
    %cst_11 = arith.constant dense<0.000000e+00> : vector<4x64xf32>
    %34 = tpu.matmul %31, %33, %cst_11 {dimension_numbers = #tpu.dot_dimension_numbers<[1], [0], [0], [1], [0, 0, 1, 1], [], []>} : vector<4x64xbf16>, vector<64x64xbf16>, vector<4x64xf32> -> vector<4x64xf32>
    %35 = arith.addf %21, %34 : vector<4x64xf32>
    %c0_12 = arith.constant 0 : index
    %c2 = arith.constant 2 : index
    %c0_13 = arith.constant 0 : index
    %c0_14 = arith.constant 0 : index
    %36 = vector.load %arg1[%c0_12, %c2, %c0_13, %c0_14] : memref<1x4x4x64xbf16, #tpu.memory_space<vmem>>, vector<1x1x4x64xbf16>
    %37 = vector.shape_cast %36 : vector<1x1x4x64xbf16> to vector<4x64xbf16>
    %38 = arith.extf %37 : vector<4x64xbf16> to vector<4x64xf32>
    %c2_i32_15 = arith.constant 2 : i32
    %39 = tpu.dynamic_rotate %38 by %c2_i32_15 dim 0 : vector<4x64xf32>, i32 -> vector<4x64xf32>
    %cst_16 = arith.constant 0.000000e+00 : f32
    %40 = vector.shape_cast %2 : vector<4x1xi1> to vector<4x1xi1>
    %41 = vector.broadcast %40 : vector<4x1xi1> to vector<4x64xi1>
    %42 = vector.broadcast %cst_16 : f32 to vector<4x64xf32>
    %43 = arith.select %41, %39, %42 : vector<4x64xi1>, vector<4x64xf32>
    %44 = arith.truncf %43 : vector<4x64xf32> to vector<4x64xbf16>
    %c1 = arith.constant 1 : index
    %c0_17 = arith.constant 0 : index
    %c0_18 = arith.constant 0 : index
    %45 = vector.load %arg2[%c1, %c0_17, %c0_18] : memref<9x64x64xbf16, #tpu.memory_space<vmem>>, vector<1x64x64xbf16>
    %46 = vector.shape_cast %45 : vector<1x64x64xbf16> to vector<64x64xbf16>
    %cst_19 = arith.constant dense<0.000000e+00> : vector<4x64xf32>
    %47 = tpu.matmul %44, %46, %cst_19 {dimension_numbers = #tpu.dot_dimension_numbers<[1], [0], [0], [1], [0, 0, 1, 1], [], []>} : vector<4x64xbf16>, vector<64x64xbf16>, vector<4x64xf32> -> vector<4x64xf32>
    %48 = arith.addf %35, %47 : vector<4x64xf32>
    %c0_20 = arith.constant 0 : index
    %c3_21 = arith.constant 3 : index
    %c0_22 = arith.constant 0 : index
    %c0_23 = arith.constant 0 : index
    %49 = vector.load %arg1[%c0_20, %c3_21, %c0_22, %c0_23] : memref<1x4x4x64xbf16, #tpu.memory_space<vmem>>, vector<1x1x4x64xbf16>
    %50 = vector.shape_cast %49 : vector<1x1x4x64xbf16> to vector<4x64xbf16>
    %51 = arith.extf %50 : vector<4x64xbf16> to vector<4x64xf32>
    %c2_i32_24 = arith.constant 2 : i32
    %52 = tpu.dynamic_rotate %51 by %c2_i32_24 dim 0 : vector<4x64xf32>, i32 -> vector<4x64xf32>
    %cst_25 = arith.constant 0.000000e+00 : f32
    %53 = vector.shape_cast %2 : vector<4x1xi1> to vector<4x1xi1>
    %54 = vector.broadcast %53 : vector<4x1xi1> to vector<4x64xi1>
    %55 = vector.broadcast %cst_25 : f32 to vector<4x64xf32>
    %56 = arith.select %54, %52, %55 : vector<4x64xi1>, vector<4x64xf32>
    %57 = arith.truncf %56 : vector<4x64xf32> to vector<4x64xbf16>
    %c2_26 = arith.constant 2 : index
    %c0_27 = arith.constant 0 : index
    %c0_28 = arith.constant 0 : index
    %58 = vector.load %arg2[%c2_26, %c0_27, %c0_28] : memref<9x64x64xbf16, #tpu.memory_space<vmem>>, vector<1x64x64xbf16>
    %59 = vector.shape_cast %58 : vector<1x64x64xbf16> to vector<64x64xbf16>
    %cst_29 = arith.constant dense<0.000000e+00> : vector<4x64xf32>
    %60 = tpu.matmul %57, %59, %cst_29 {dimension_numbers = #tpu.dot_dimension_numbers<[1], [0], [0], [1], [0, 0, 1, 1], [], []>} : vector<4x64xbf16>, vector<64x64xbf16>, vector<4x64xf32> -> vector<4x64xf32>
    %61 = arith.addf %48, %60 : vector<4x64xf32>
    %c0_30 = arith.constant 0 : index
    %c1_31 = arith.constant 1 : index
    %c0_32 = arith.constant 0 : index
    %c0_33 = arith.constant 0 : index
    %62 = vector.load %arg1[%c0_30, %c1_31, %c0_32, %c0_33] : memref<1x4x4x64xbf16, #tpu.memory_space<vmem>>, vector<1x1x4x64xbf16>
    %63 = vector.shape_cast %62 : vector<1x1x4x64xbf16> to vector<4x64xbf16>
    %64 = arith.extf %63 : vector<4x64xbf16> to vector<4x64xf32>
    %c1_i32_34 = arith.constant 1 : i32
    %65 = tpu.dynamic_rotate %64 by %c1_i32_34 dim 0 : vector<4x64xf32>, i32 -> vector<4x64xf32>
    %cst_35 = arith.constant 0.000000e+00 : f32
    %66 = vector.shape_cast %20 : vector<4x1xi1> to vector<4x1xi1>
    %67 = vector.broadcast %66 : vector<4x1xi1> to vector<4x64xi1>
    %68 = vector.broadcast %cst_35 : f32 to vector<4x64xf32>
    %69 = arith.select %67, %65, %68 : vector<4x64xi1>, vector<4x64xf32>
    %70 = arith.truncf %69 : vector<4x64xf32> to vector<4x64xbf16>
    %c3_36 = arith.constant 3 : index
    %c0_37 = arith.constant 0 : index
    %c0_38 = arith.constant 0 : index
    %71 = vector.load %arg2[%c3_36, %c0_37, %c0_38] : memref<9x64x64xbf16, #tpu.memory_space<vmem>>, vector<1x64x64xbf16>
    %72 = vector.shape_cast %71 : vector<1x64x64xbf16> to vector<64x64xbf16>
    %cst_39 = arith.constant dense<0.000000e+00> : vector<4x64xf32>
    %73 = tpu.matmul %70, %72, %cst_39 {dimension_numbers = #tpu.dot_dimension_numbers<[1], [0], [0], [1], [0, 0, 1, 1], [], []>} : vector<4x64xbf16>, vector<64x64xbf16>, vector<4x64xf32> -> vector<4x64xf32>
    %74 = arith.addf %61, %73 : vector<4x64xf32>
    %c0_40 = arith.constant 0 : index
    %c0_41 = arith.constant 0 : index
    %c0_42 = arith.constant 0 : index
    %c0_43 = arith.constant 0 : index
    %75 = vector.load %arg1[%c0_40, %c0_41, %c0_42, %c0_43] : memref<1x4x4x64xbf16, #tpu.memory_space<vmem>>, vector<1x1x4x64xbf16>
    %76 = vector.shape_cast %75 : vector<1x1x4x64xbf16> to vector<4x64xbf16>
    %c4 = arith.constant 4 : index
    %c0_44 = arith.constant 0 : index
    %c0_45 = arith.constant 0 : index
    %77 = vector.load %arg2[%c4, %c0_44, %c0_45] : memref<9x64x64xbf16, #tpu.memory_space<vmem>>, vector<1x64x64xbf16>
    %78 = vector.shape_cast %77 : vector<1x64x64xbf16> to vector<64x64xbf16>
    %cst_46 = arith.constant dense<0.000000e+00> : vector<4x64xf32>
    %79 = tpu.matmul %76, %78, %cst_46 {dimension_numbers = #tpu.dot_dimension_numbers<[1], [0], [0], [1], [0, 0, 1, 1], [], []>} : vector<4x64xbf16>, vector<64x64xbf16>, vector<4x64xf32> -> vector<4x64xf32>
    %80 = arith.addf %74, %79 : vector<4x64xf32>
    %c0_47 = arith.constant 0 : index
    %c1_48 = arith.constant 1 : index
    %c0_49 = arith.constant 0 : index
    %c0_50 = arith.constant 0 : index
    %81 = vector.load %arg1[%c0_47, %c1_48, %c0_49, %c0_50] : memref<1x4x4x64xbf16, #tpu.memory_space<vmem>>, vector<1x1x4x64xbf16>
    %82 = vector.shape_cast %81 : vector<1x1x4x64xbf16> to vector<4x64xbf16>
    %c5 = arith.constant 5 : index
    %c0_51 = arith.constant 0 : index
    %c0_52 = arith.constant 0 : index
    %83 = vector.load %arg2[%c5, %c0_51, %c0_52] : memref<9x64x64xbf16, #tpu.memory_space<vmem>>, vector<1x64x64xbf16>
    %84 = vector.shape_cast %83 : vector<1x64x64xbf16> to vector<64x64xbf16>
    %cst_53 = arith.constant dense<0.000000e+00> : vector<4x64xf32>
    %85 = tpu.matmul %82, %84, %cst_53 {dimension_numbers = #tpu.dot_dimension_numbers<[1], [0], [0], [1], [0, 0, 1, 1], [], []>} : vector<4x64xbf16>, vector<64x64xbf16>, vector<4x64xf32> -> vector<4x64xf32>
    %86 = arith.addf %80, %85 : vector<4x64xf32>
    %c0_54 = arith.constant 0 : index
    %c3_55 = arith.constant 3 : index
    %c0_56 = arith.constant 0 : index
    %c0_57 = arith.constant 0 : index
    %87 = vector.load %arg1[%c0_54, %c3_55, %c0_56, %c0_57] : memref<1x4x4x64xbf16, #tpu.memory_space<vmem>>, vector<1x1x4x64xbf16>
    %88 = vector.shape_cast %87 : vector<1x1x4x64xbf16> to vector<4x64xbf16>
    %89 = arith.extf %88 : vector<4x64xbf16> to vector<4x64xf32>
    %c1_i32_58 = arith.constant 1 : i32
    %90 = tpu.dynamic_rotate %89 by %c1_i32_58 dim 0 : vector<4x64xf32>, i32 -> vector<4x64xf32>
    %cst_59 = arith.constant 0.000000e+00 : f32
    %91 = vector.shape_cast %20 : vector<4x1xi1> to vector<4x1xi1>
    %92 = vector.broadcast %91 : vector<4x1xi1> to vector<4x64xi1>
    %93 = vector.broadcast %cst_59 : f32 to vector<4x64xf32>
    %94 = arith.select %92, %90, %93 : vector<4x64xi1>, vector<4x64xf32>
    %95 = arith.truncf %94 : vector<4x64xf32> to vector<4x64xbf16>
    %c6 = arith.constant 6 : index
    %c0_60 = arith.constant 0 : index
    %c0_61 = arith.constant 0 : index
    %96 = vector.load %arg2[%c6, %c0_60, %c0_61] : memref<9x64x64xbf16, #tpu.memory_space<vmem>>, vector<1x64x64xbf16>
    %97 = vector.shape_cast %96 : vector<1x64x64xbf16> to vector<64x64xbf16>
    %cst_62 = arith.constant dense<0.000000e+00> : vector<4x64xf32>
    %98 = tpu.matmul %95, %97, %cst_62 {dimension_numbers = #tpu.dot_dimension_numbers<[1], [0], [0], [1], [0, 0, 1, 1], [], []>} : vector<4x64xbf16>, vector<64x64xbf16>, vector<4x64xf32> -> vector<4x64xf32>
    %99 = arith.addf %86, %98 : vector<4x64xf32>
    %c0_63 = arith.constant 0 : index
    %c2_64 = arith.constant 2 : index
    %c0_65 = arith.constant 0 : index
    %c0_66 = arith.constant 0 : index
    %100 = vector.load %arg1[%c0_63, %c2_64, %c0_65, %c0_66] : memref<1x4x4x64xbf16, #tpu.memory_space<vmem>>, vector<1x1x4x64xbf16>
    %101 = vector.shape_cast %100 : vector<1x1x4x64xbf16> to vector<4x64xbf16>
    %c7 = arith.constant 7 : index
    %c0_67 = arith.constant 0 : index
    %c0_68 = arith.constant 0 : index
    %102 = vector.load %arg2[%c7, %c0_67, %c0_68] : memref<9x64x64xbf16, #tpu.memory_space<vmem>>, vector<1x64x64xbf16>
    %103 = vector.shape_cast %102 : vector<1x64x64xbf16> to vector<64x64xbf16>
    %cst_69 = arith.constant dense<0.000000e+00> : vector<4x64xf32>
    %104 = tpu.matmul %101, %103, %cst_69 {dimension_numbers = #tpu.dot_dimension_numbers<[1], [0], [0], [1], [0, 0, 1, 1], [], []>} : vector<4x64xbf16>, vector<64x64xbf16>, vector<4x64xf32> -> vector<4x64xf32>
    %105 = arith.addf %99, %104 : vector<4x64xf32>
    %c0_70 = arith.constant 0 : index
    %c3_71 = arith.constant 3 : index
    %c0_72 = arith.constant 0 : index
    %c0_73 = arith.constant 0 : index
    %106 = vector.load %arg1[%c0_70, %c3_71, %c0_72, %c0_73] : memref<1x4x4x64xbf16, #tpu.memory_space<vmem>>, vector<1x1x4x64xbf16>
    %107 = vector.shape_cast %106 : vector<1x1x4x64xbf16> to vector<4x64xbf16>
    %c8 = arith.constant 8 : index
    %c0_74 = arith.constant 0 : index
    %c0_75 = arith.constant 0 : index
    %108 = vector.load %arg2[%c8, %c0_74, %c0_75] : memref<9x64x64xbf16, #tpu.memory_space<vmem>>, vector<1x64x64xbf16>
    %109 = vector.shape_cast %108 : vector<1x64x64xbf16> to vector<64x64xbf16>
    %cst_76 = arith.constant dense<0.000000e+00> : vector<4x64xf32>
    %110 = tpu.matmul %107, %109, %cst_76 {dimension_numbers = #tpu.dot_dimension_numbers<[1], [0], [0], [1], [0, 0, 1, 1], [], []>} : vector<4x64xbf16>, vector<64x64xbf16>, vector<4x64xf32> -> vector<4x64xf32>
    %111 = arith.addf %105, %110 : vector<4x64xf32>
    %c0_77 = arith.constant 0 : index
    %c0_78 = arith.constant 0 : index
    %c0_79 = arith.constant 0 : index
    %c0_80 = arith.constant 0 : index
    %112 = vector.load %arg1[%c0_77, %c0_78, %c0_79, %c0_80] : memref<1x4x4x64xbf16, #tpu.memory_space<vmem>>, vector<1x1x4x64xbf16>
    %113 = vector.shape_cast %112 : vector<1x1x4x64xbf16> to vector<4x64xbf16>
    %c0_81 = arith.constant 0 : index
    %c1_82 = arith.constant 1 : index
    %c0_83 = arith.constant 0 : index
    %c0_84 = arith.constant 0 : index
    %114 = vector.load %arg1[%c0_81, %c1_82, %c0_83, %c0_84] : memref<1x4x4x64xbf16, #tpu.memory_space<vmem>>, vector<1x1x4x64xbf16>
    %115 = vector.shape_cast %114 : vector<1x1x4x64xbf16> to vector<4x64xbf16>
    %116 = arith.maximumf %113, %115 : vector<4x64xbf16>
    %c0_85 = arith.constant 0 : index
    %c2_86 = arith.constant 2 : index
    %c0_87 = arith.constant 0 : index
    %c0_88 = arith.constant 0 : index
    %117 = vector.load %arg1[%c0_85, %c2_86, %c0_87, %c0_88] : memref<1x4x4x64xbf16, #tpu.memory_space<vmem>>, vector<1x1x4x64xbf16>
    %118 = vector.shape_cast %117 : vector<1x1x4x64xbf16> to vector<4x64xbf16>
    %c0_89 = arith.constant 0 : index
    %c3_90 = arith.constant 3 : index
    %c0_91 = arith.constant 0 : index
    %c0_92 = arith.constant 0 : index
    %119 = vector.load %arg1[%c0_89, %c3_90, %c0_91, %c0_92] : memref<1x4x4x64xbf16, #tpu.memory_space<vmem>>, vector<1x1x4x64xbf16>
    %120 = vector.shape_cast %119 : vector<1x1x4x64xbf16> to vector<4x64xbf16>
    %121 = arith.maximumf %118, %120 : vector<4x64xbf16>
    %122 = arith.maximumf %116, %121 : vector<4x64xbf16>
    %123 = arith.extf %122 : vector<4x64xbf16> to vector<4x64xf32>
    %c0_93 = arith.constant 0 : index
    %c0_94 = arith.constant 0 : index
    %124 = vector.load %arg4[%c0_93, %c0_94] : memref<1x64xf32, #tpu.memory_space<vmem>>, vector<1x64xf32>
    %125 = vector.broadcast %124 : vector<1x64xf32> to vector<4x64xf32>
    %126 = arith.mulf %123, %125 : vector<4x64xf32>
    %127 = tpu.concatenate %111, %126 in 1 : vector<4x64xf32>, vector<4x64xf32> -> vector<4x128xf32>
    %c0_95 = arith.constant 0 : index
    %c0_96 = arith.constant 0 : index
    %128 = vector.load %arg3[%c0_95, %c0_96] : memref<1x128xf32, #tpu.memory_space<vmem>>, vector<1x128xf32>
    %129 = vector.broadcast %128 : vector<1x128xf32> to vector<4x128xf32>
    %130 = arith.addf %127, %129 : vector<4x128xf32>
    %cst_97 = arith.constant 0.000000e+00 : f32
    %131 = vector.broadcast %cst_97 : f32 to vector<4x128xf32>
    %132 = arith.maximumf %130, %131 : vector<4x128xf32>
    %133 = arith.truncf %132 : vector<4x128xf32> to vector<4x128xbf16>
    %c0_98 = arith.constant 0 : index
    %c0_99 = arith.constant 0 : index
    %c0_100 = arith.constant 0 : index
    %134 = vector.load %arg5[%c0_98, %c0_99, %c0_100] : memref<1x4x128xbf16, #tpu.memory_space<vmem>>, vector<1x4x128xbf16>
    %135 = vector.shape_cast %134 : vector<1x4x128xbf16> to vector<4x128xbf16>
    %136 = vector.shape_cast %133 : vector<4x128xbf16> to vector<1x4x128xbf16>
    tpu.vector_store %arg5[%c0_98, %c0_99, %c0_100], %136 {strides = array<i32>} : memref<1x4x128xbf16, #tpu.memory_space<vmem>>, vector<1x4x128xbf16>,
    return
  }
  func.func @transform_0(%arg0: i32) -> (i32, i32, i32, i32) {
    %c0_i32 = arith.constant 0 : i32
    %c0_i32_0 = arith.constant 0 : i32
    %c0_i32_1 = arith.constant 0 : i32
    %c0_i32_2 = arith.constant 0 : i32
    return %arg0, %c0_i32, %c0_i32_0, %c0_i32_1 : i32, i32, i32, i32
  }
  func.func @transform_1(%arg0: i32) -> (i32, i32, i32) {
    %c0_i32 = arith.constant 0 : i32
    %c0_i32_0 = arith.constant 0 : i32
    %c0_i32_1 = arith.constant 0 : i32
    %c0_i32_2 = arith.constant 0 : i32
    return %c0_i32, %c0_i32_0, %c0_i32_1 : i32, i32, i32
  }
  func.func @transform_2(%arg0: i32) -> (i32, i32) {
    %c0_i32 = arith.constant 0 : i32
    %c0_i32_0 = arith.constant 0 : i32
    %c0_i32_1 = arith.constant 0 : i32
    return %c0_i32, %c0_i32_0 : i32, i32
  }
  func.func @transform_3(%arg0: i32) -> (i32, i32) {
    %c0_i32 = arith.constant 0 : i32
    %c0_i32_0 = arith.constant 0 : i32
    %c0_i32_1 = arith.constant 0 : i32
    return %c0_i32, %c0_i32_0 : i32, i32
  }
  func.func @transform_4(%arg0: i32) -> (i32, i32, i32) {
    %c0_i32 = arith.constant 0 : i32
    %c0_i32_0 = arith.constant 0 : i32
    %c0_i32_1 = arith.constant 0 : i32
    return %arg0, %c0_i32, %c0_i32_0 : i32, i32, i32
  }
}

module attributes {stable_mosaic.version = 11 : i64} {
  func.func @_nb1d_chain_kernel(%arg0: i32, %arg1: memref<1x4x128xbf16, #tpu.memory_space<vmem>>, %arg2: memref<4x2x128x128xbf16, #tpu.memory_space<vmem>>, %arg3: memref<4x10x128xf32, #tpu.memory_space<vmem>>, %arg4: memref<1x4x128xbf16, #tpu.memory_space<vmem>>) attributes {dimension_semantics = [#tpu.dimension_semantics<parallel>], iteration_bounds = array<i64: 2>, scalar_prefetch = 0 : i64, scratch_operands = 0 : i64, tpu.core_type = #tpu.core_type<tc>, window_params = [{transform_indices = @transform_0, window_bounds = array<i64: 1, 4, 128>}, {pipeline_mode = #tpu.pipeline_mode<synchronous>, transform_indices = @transform_1, window_bounds = array<i64: 4, 2, 128, 128>}, {pipeline_mode = #tpu.pipeline_mode<synchronous>, transform_indices = @transform_2, window_bounds = array<i64: 4, 10, 128>}, {transform_indices = @transform_3, window_bounds = array<i64: 1, 4, 128>}]} {
    %c0 = arith.constant 0 : index
    %c0_0 = arith.constant 0 : index
    %c0_1 = arith.constant 0 : index
    %0 = vector.load %arg1[%c0, %c0_0, %c0_1] : memref<1x4x128xbf16, #tpu.memory_space<vmem>>, vector<1x4x128xbf16>
    %1 = vector.shape_cast %0 : vector<1x4x128xbf16> to vector<4x128xbf16>
    %2 = arith.extf %1 : vector<4x128xbf16> to vector<4x128xf32>
    %3 = tpu.iota {dimensions = array<i32: 0>} : vector<4x1xi32>
    %c0_2 = arith.constant 0 : index
    %c0_3 = arith.constant 0 : index
    %c0_4 = arith.constant 0 : index
    %4 = vector.load %arg3[%c0_2, %c0_3, %c0_4] : memref<4x10x128xf32, #tpu.memory_space<vmem>>, vector<1x3x128xf32>
    %5 = vector.shape_cast %4 : vector<1x3x128xf32> to vector<3x128xf32>
    %c0_5 = arith.constant 0 : index
    %c3 = arith.constant 3 : index
    %c0_6 = arith.constant 0 : index
    %6 = vector.load %arg3[%c0_5, %c3, %c0_6] : memref<4x10x128xf32, #tpu.memory_space<vmem>>, vector<1x1x128xf32>
    %7 = vector.shape_cast %6 : vector<1x1x128xf32> to vector<1x128xf32>
    %c0_7 = arith.constant 0 : index
    %c4 = arith.constant 4 : index
    %c0_8 = arith.constant 0 : index
    %8 = vector.load %arg3[%c0_7, %c4, %c0_8] : memref<4x10x128xf32, #tpu.memory_space<vmem>>, vector<1x1x128xf32>
    %9 = vector.shape_cast %8 : vector<1x1x128xf32> to vector<1x128xf32>
    %c0_9 = arith.constant 0 : index
    %c5 = arith.constant 5 : index
    %c0_10 = arith.constant 0 : index
    %10 = vector.load %arg3[%c0_9, %c5, %c0_10] : memref<4x10x128xf32, #tpu.memory_space<vmem>>, vector<1x3x128xf32>
    %11 = vector.shape_cast %10 : vector<1x3x128xf32> to vector<3x128xf32>
    %c0_11 = arith.constant 0 : index
    %c8 = arith.constant 8 : index
    %c0_12 = arith.constant 0 : index
    %12 = vector.load %arg3[%c0_11, %c8, %c0_12] : memref<4x10x128xf32, #tpu.memory_space<vmem>>, vector<1x1x128xf32>
    %13 = vector.shape_cast %12 : vector<1x1x128xf32> to vector<1x128xf32>
    %c0_13 = arith.constant 0 : index
    %c9 = arith.constant 9 : index
    %c0_14 = arith.constant 0 : index
    %14 = vector.load %arg3[%c0_13, %c9, %c0_14] : memref<4x10x128xf32, #tpu.memory_space<vmem>>, vector<1x1x128xf32>
    %15 = vector.shape_cast %14 : vector<1x1x128xf32> to vector<1x128xf32>
    %c0_15 = arith.constant 0 : index
    %c0_16 = arith.constant 0 : index
    %c0_17 = arith.constant 0 : index
    %c0_18 = arith.constant 0 : index
    %16 = vector.load %arg2[%c0_15, %c0_16, %c0_17, %c0_18] : memref<4x2x128x128xbf16, #tpu.memory_space<vmem>>, vector<1x1x128x128xbf16>
    %17 = vector.shape_cast %16 : vector<1x1x128x128xbf16> to vector<128x128xbf16>
    %c0_19 = arith.constant 0 : index
    %c1 = arith.constant 1 : index
    %c0_20 = arith.constant 0 : index
    %c0_21 = arith.constant 0 : index
    %18 = vector.load %arg2[%c0_19, %c1, %c0_20, %c0_21] : memref<4x2x128x128xbf16, #tpu.memory_space<vmem>>, vector<1x1x128x128xbf16>
    %19 = vector.shape_cast %18 : vector<1x1x128x128xbf16> to vector<128x128xbf16>
    %20 = vector.extract_strided_slice %5 {offsets = [0, 0], sizes = [1, 128], strides = [1, 1]} : vector<3x128xf32> to vector<1x128xf32>
    %c2_i32 = arith.constant 2 : i32
    %21 = tpu.dynamic_rotate %2 by %c2_i32 dim 0 : vector<4x128xf32>, i32 -> vector<4x128xf32>
    %c2_i32_22 = arith.constant 2 : i32
    %22 = vector.broadcast %c2_i32_22 : i32 to vector<4x1xi32>
    %23 = arith.cmpi sge, %3, %22 : vector<4x1xi32>
    %cst = arith.constant 0.000000e+00 : f32
    %24 = vector.shape_cast %23 : vector<4x1xi1> to vector<4x1xi1>
    %25 = vector.broadcast %24 : vector<4x1xi1> to vector<4x128xi1>
    %26 = vector.broadcast %cst : f32 to vector<4x128xf32>
    %27 = arith.select %25, %21, %26 : vector<4x128xi1>, vector<4x128xf32>
    %28 = vector.broadcast %20 : vector<1x128xf32> to vector<4x128xf32>
    %29 = arith.mulf %28, %27 : vector<4x128xf32>
    %30 = vector.extract_strided_slice %5 {offsets = [1, 0], sizes = [1, 128], strides = [1, 1]} : vector<3x128xf32> to vector<1x128xf32>
    %31 = vector.broadcast %30 : vector<1x128xf32> to vector<4x128xf32>
    %32 = arith.mulf %31, %2 : vector<4x128xf32>
    %33 = arith.addf %29, %32 : vector<4x128xf32>
    %34 = vector.extract_strided_slice %5 {offsets = [2, 0], sizes = [1, 128], strides = [1, 1]} : vector<3x128xf32> to vector<1x128xf32>
    %c2_i32_23 = arith.constant 2 : i32
    %35 = tpu.dynamic_rotate %2 by %c2_i32_23 dim 0 : vector<4x128xf32>, i32 -> vector<4x128xf32>
    %c2_i32_24 = arith.constant 2 : i32
    %36 = vector.broadcast %c2_i32_24 : i32 to vector<4x1xi32>
    %37 = arith.cmpi slt, %3, %36 : vector<4x1xi32>
    %cst_25 = arith.constant 0.000000e+00 : f32
    %38 = vector.shape_cast %37 : vector<4x1xi1> to vector<4x1xi1>
    %39 = vector.broadcast %38 : vector<4x1xi1> to vector<4x128xi1>
    %40 = vector.broadcast %cst_25 : f32 to vector<4x128xf32>
    %41 = arith.select %39, %35, %40 : vector<4x128xi1>, vector<4x128xf32>
    %42 = vector.broadcast %34 : vector<1x128xf32> to vector<4x128xf32>
    %43 = arith.mulf %42, %41 : vector<4x128xf32>
    %44 = arith.addf %33, %43 : vector<4x128xf32>
    %45 = vector.broadcast %7 : vector<1x128xf32> to vector<4x128xf32>
    %46 = arith.addf %44, %45 : vector<4x128xf32>
    %cst_26 = arith.constant 0.000000e+00 : f32
    %47 = vector.broadcast %cst_26 : f32 to vector<4x128xf32>
    %48 = arith.maximumf %46, %47 : vector<4x128xf32>
    %49 = arith.truncf %48 : vector<4x128xf32> to vector<4x128xbf16>
    %cst_27 = arith.constant dense<0.000000e+00> : vector<4x128xf32>
    %50 = tpu.matmul %49, %17, %cst_27 {dimension_numbers = #tpu.dot_dimension_numbers<[1], [0], [0], [1], [0, 0, 1, 1], [], []>} : vector<4x128xbf16>, vector<128x128xbf16>, vector<4x128xf32> -> vector<4x128xf32>
    %51 = vector.broadcast %9 : vector<1x128xf32> to vector<4x128xf32>
    %52 = arith.addf %50, %51 : vector<4x128xf32>
    %cst_28 = arith.constant 0.000000e+00 : f32
    %53 = vector.broadcast %cst_28 : f32 to vector<4x128xf32>
    %54 = arith.maximumf %52, %53 : vector<4x128xf32>
    %55 = vector.extract_strided_slice %11 {offsets = [0, 0], sizes = [1, 128], strides = [1, 1]} : vector<3x128xf32> to vector<1x128xf32>
    %cst_29 = arith.constant 0.000000e+00 : f32
    %56 = vector.broadcast %cst_29 : f32 to vector<4x128xf32>
    %57 = vector.broadcast %55 : vector<1x128xf32> to vector<4x128xf32>
    %58 = arith.mulf %57, %56 : vector<4x128xf32>
    %59 = vector.extract_strided_slice %11 {offsets = [1, 0], sizes = [1, 128], strides = [1, 1]} : vector<3x128xf32> to vector<1x128xf32>
    %60 = vector.broadcast %59 : vector<1x128xf32> to vector<4x128xf32>
    %61 = arith.mulf %60, %54 : vector<4x128xf32>
    %62 = arith.addf %58, %61 : vector<4x128xf32>
    %63 = vector.extract_strided_slice %11 {offsets = [2, 0], sizes = [1, 128], strides = [1, 1]} : vector<3x128xf32> to vector<1x128xf32>
    %cst_30 = arith.constant 0.000000e+00 : f32
    %64 = vector.broadcast %cst_30 : f32 to vector<4x128xf32>
    %65 = vector.broadcast %63 : vector<1x128xf32> to vector<4x128xf32>
    %66 = arith.mulf %65, %64 : vector<4x128xf32>
    %67 = arith.addf %62, %66 : vector<4x128xf32>
    %68 = vector.broadcast %13 : vector<1x128xf32> to vector<4x128xf32>
    %69 = arith.addf %67, %68 : vector<4x128xf32>
    %cst_31 = arith.constant 0.000000e+00 : f32
    %70 = vector.broadcast %cst_31 : f32 to vector<4x128xf32>
    %71 = arith.maximumf %69, %70 : vector<4x128xf32>
    %72 = arith.truncf %71 : vector<4x128xf32> to vector<4x128xbf16>
    %cst_32 = arith.constant dense<0.000000e+00> : vector<4x128xf32>
    %73 = tpu.matmul %72, %19, %cst_32 {dimension_numbers = #tpu.dot_dimension_numbers<[1], [0], [0], [1], [0, 0, 1, 1], [], []>} : vector<4x128xbf16>, vector<128x128xbf16>, vector<4x128xf32> -> vector<4x128xf32>
    %74 = vector.broadcast %15 : vector<1x128xf32> to vector<4x128xf32>
    %75 = arith.addf %73, %74 : vector<4x128xf32>
    %76 = arith.addf %75, %2 : vector<4x128xf32>
    %cst_33 = arith.constant 0.000000e+00 : f32
    %77 = vector.broadcast %cst_33 : f32 to vector<4x128xf32>
    %78 = arith.maximumf %76, %77 : vector<4x128xf32>
    %c1_34 = arith.constant 1 : index
    %c0_35 = arith.constant 0 : index
    %c0_36 = arith.constant 0 : index
    %79 = vector.load %arg3[%c1_34, %c0_35, %c0_36] : memref<4x10x128xf32, #tpu.memory_space<vmem>>, vector<1x3x128xf32>
    %80 = vector.shape_cast %79 : vector<1x3x128xf32> to vector<3x128xf32>
    %c1_37 = arith.constant 1 : index
    %c3_38 = arith.constant 3 : index
    %c0_39 = arith.constant 0 : index
    %81 = vector.load %arg3[%c1_37, %c3_38, %c0_39] : memref<4x10x128xf32, #tpu.memory_space<vmem>>, vector<1x1x128xf32>
    %82 = vector.shape_cast %81 : vector<1x1x128xf32> to vector<1x128xf32>
    %c1_40 = arith.constant 1 : index
    %c4_41 = arith.constant 4 : index
    %c0_42 = arith.constant 0 : index
    %83 = vector.load %arg3[%c1_40, %c4_41, %c0_42] : memref<4x10x128xf32, #tpu.memory_space<vmem>>, vector<1x1x128xf32>
    %84 = vector.shape_cast %83 : vector<1x1x128xf32> to vector<1x128xf32>
    %c1_43 = arith.constant 1 : index
    %c5_44 = arith.constant 5 : index
    %c0_45 = arith.constant 0 : index
    %85 = vector.load %arg3[%c1_43, %c5_44, %c0_45] : memref<4x10x128xf32, #tpu.memory_space<vmem>>, vector<1x3x128xf32>
    %86 = vector.shape_cast %85 : vector<1x3x128xf32> to vector<3x128xf32>
    %c1_46 = arith.constant 1 : index
    %c8_47 = arith.constant 8 : index
    %c0_48 = arith.constant 0 : index
    %87 = vector.load %arg3[%c1_46, %c8_47, %c0_48] : memref<4x10x128xf32, #tpu.memory_space<vmem>>, vector<1x1x128xf32>
    %88 = vector.shape_cast %87 : vector<1x1x128xf32> to vector<1x128xf32>
    %c1_49 = arith.constant 1 : index
    %c9_50 = arith.constant 9 : index
    %c0_51 = arith.constant 0 : index
    %89 = vector.load %arg3[%c1_49, %c9_50, %c0_51] : memref<4x10x128xf32, #tpu.memory_space<vmem>>, vector<1x1x128xf32>
    %90 = vector.shape_cast %89 : vector<1x1x128xf32> to vector<1x128xf32>
    %c1_52 = arith.constant 1 : index
    %c0_53 = arith.constant 0 : index
    %c0_54 = arith.constant 0 : index
    %c0_55 = arith.constant 0 : index
    %91 = vector.load %arg2[%c1_52, %c0_53, %c0_54, %c0_55] : memref<4x2x128x128xbf16, #tpu.memory_space<vmem>>, vector<1x1x128x128xbf16>
    %92 = vector.shape_cast %91 : vector<1x1x128x128xbf16> to vector<128x128xbf16>
    %c1_56 = arith.constant 1 : index
    %c1_57 = arith.constant 1 : index
    %c0_58 = arith.constant 0 : index
    %c0_59 = arith.constant 0 : index
    %93 = vector.load %arg2[%c1_56, %c1_57, %c0_58, %c0_59] : memref<4x2x128x128xbf16, #tpu.memory_space<vmem>>, vector<1x1x128x128xbf16>
    %94 = vector.shape_cast %93 : vector<1x1x128x128xbf16> to vector<128x128xbf16>
    %95 = vector.extract_strided_slice %80 {offsets = [0, 0], sizes = [1, 128], strides = [1, 1]} : vector<3x128xf32> to vector<1x128xf32>
    %c2_i32_60 = arith.constant 2 : i32
    %96 = tpu.dynamic_rotate %78 by %c2_i32_60 dim 0 : vector<4x128xf32>, i32 -> vector<4x128xf32>
    %c2_i32_61 = arith.constant 2 : i32
    %97 = vector.broadcast %c2_i32_61 : i32 to vector<4x1xi32>
    %98 = arith.cmpi sge, %3, %97 : vector<4x1xi32>
    %cst_62 = arith.constant 0.000000e+00 : f32
    %99 = vector.shape_cast %98 : vector<4x1xi1> to vector<4x1xi1>
    %100 = vector.broadcast %99 : vector<4x1xi1> to vector<4x128xi1>
    %101 = vector.broadcast %cst_62 : f32 to vector<4x128xf32>
    %102 = arith.select %100, %96, %101 : vector<4x128xi1>, vector<4x128xf32>
    %103 = vector.broadcast %95 : vector<1x128xf32> to vector<4x128xf32>
    %104 = arith.mulf %103, %102 : vector<4x128xf32>
    %105 = vector.extract_strided_slice %80 {offsets = [1, 0], sizes = [1, 128], strides = [1, 1]} : vector<3x128xf32> to vector<1x128xf32>
    %106 = vector.broadcast %105 : vector<1x128xf32> to vector<4x128xf32>
    %107 = arith.mulf %106, %78 : vector<4x128xf32>
    %108 = arith.addf %104, %107 : vector<4x128xf32>
    %109 = vector.extract_strided_slice %80 {offsets = [2, 0], sizes = [1, 128], strides = [1, 1]} : vector<3x128xf32> to vector<1x128xf32>
    %c2_i32_63 = arith.constant 2 : i32
    %110 = tpu.dynamic_rotate %78 by %c2_i32_63 dim 0 : vector<4x128xf32>, i32 -> vector<4x128xf32>
    %c2_i32_64 = arith.constant 2 : i32
    %111 = vector.broadcast %c2_i32_64 : i32 to vector<4x1xi32>
    %112 = arith.cmpi slt, %3, %111 : vector<4x1xi32>
    %cst_65 = arith.constant 0.000000e+00 : f32
    %113 = vector.shape_cast %112 : vector<4x1xi1> to vector<4x1xi1>
    %114 = vector.broadcast %113 : vector<4x1xi1> to vector<4x128xi1>
    %115 = vector.broadcast %cst_65 : f32 to vector<4x128xf32>
    %116 = arith.select %114, %110, %115 : vector<4x128xi1>, vector<4x128xf32>
    %117 = vector.broadcast %109 : vector<1x128xf32> to vector<4x128xf32>
    %118 = arith.mulf %117, %116 : vector<4x128xf32>
    %119 = arith.addf %108, %118 : vector<4x128xf32>
    %120 = vector.broadcast %82 : vector<1x128xf32> to vector<4x128xf32>
    %121 = arith.addf %119, %120 : vector<4x128xf32>
    %cst_66 = arith.constant 0.000000e+00 : f32
    %122 = vector.broadcast %cst_66 : f32 to vector<4x128xf32>
    %123 = arith.maximumf %121, %122 : vector<4x128xf32>
    %124 = arith.truncf %123 : vector<4x128xf32> to vector<4x128xbf16>
    %cst_67 = arith.constant dense<0.000000e+00> : vector<4x128xf32>
    %125 = tpu.matmul %124, %92, %cst_67 {dimension_numbers = #tpu.dot_dimension_numbers<[1], [0], [0], [1], [0, 0, 1, 1], [], []>} : vector<4x128xbf16>, vector<128x128xbf16>, vector<4x128xf32> -> vector<4x128xf32>
    %126 = vector.broadcast %84 : vector<1x128xf32> to vector<4x128xf32>
    %127 = arith.addf %125, %126 : vector<4x128xf32>
    %cst_68 = arith.constant 0.000000e+00 : f32
    %128 = vector.broadcast %cst_68 : f32 to vector<4x128xf32>
    %129 = arith.maximumf %127, %128 : vector<4x128xf32>
    %130 = vector.extract_strided_slice %86 {offsets = [0, 0], sizes = [1, 128], strides = [1, 1]} : vector<3x128xf32> to vector<1x128xf32>
    %cst_69 = arith.constant 0.000000e+00 : f32
    %131 = vector.broadcast %cst_69 : f32 to vector<4x128xf32>
    %132 = vector.broadcast %130 : vector<1x128xf32> to vector<4x128xf32>
    %133 = arith.mulf %132, %131 : vector<4x128xf32>
    %134 = vector.extract_strided_slice %86 {offsets = [1, 0], sizes = [1, 128], strides = [1, 1]} : vector<3x128xf32> to vector<1x128xf32>
    %135 = vector.broadcast %134 : vector<1x128xf32> to vector<4x128xf32>
    %136 = arith.mulf %135, %129 : vector<4x128xf32>
    %137 = arith.addf %133, %136 : vector<4x128xf32>
    %138 = vector.extract_strided_slice %86 {offsets = [2, 0], sizes = [1, 128], strides = [1, 1]} : vector<3x128xf32> to vector<1x128xf32>
    %cst_70 = arith.constant 0.000000e+00 : f32
    %139 = vector.broadcast %cst_70 : f32 to vector<4x128xf32>
    %140 = vector.broadcast %138 : vector<1x128xf32> to vector<4x128xf32>
    %141 = arith.mulf %140, %139 : vector<4x128xf32>
    %142 = arith.addf %137, %141 : vector<4x128xf32>
    %143 = vector.broadcast %88 : vector<1x128xf32> to vector<4x128xf32>
    %144 = arith.addf %142, %143 : vector<4x128xf32>
    %cst_71 = arith.constant 0.000000e+00 : f32
    %145 = vector.broadcast %cst_71 : f32 to vector<4x128xf32>
    %146 = arith.maximumf %144, %145 : vector<4x128xf32>
    %147 = arith.truncf %146 : vector<4x128xf32> to vector<4x128xbf16>
    %cst_72 = arith.constant dense<0.000000e+00> : vector<4x128xf32>
    %148 = tpu.matmul %147, %94, %cst_72 {dimension_numbers = #tpu.dot_dimension_numbers<[1], [0], [0], [1], [0, 0, 1, 1], [], []>} : vector<4x128xbf16>, vector<128x128xbf16>, vector<4x128xf32> -> vector<4x128xf32>
    %149 = vector.broadcast %90 : vector<1x128xf32> to vector<4x128xf32>
    %150 = arith.addf %148, %149 : vector<4x128xf32>
    %151 = arith.addf %150, %78 : vector<4x128xf32>
    %cst_73 = arith.constant 0.000000e+00 : f32
    %152 = vector.broadcast %cst_73 : f32 to vector<4x128xf32>
    %153 = arith.maximumf %151, %152 : vector<4x128xf32>
    %c2 = arith.constant 2 : index
    %c0_74 = arith.constant 0 : index
    %c0_75 = arith.constant 0 : index
    %154 = vector.load %arg3[%c2, %c0_74, %c0_75] : memref<4x10x128xf32, #tpu.memory_space<vmem>>, vector<1x3x128xf32>
    %155 = vector.shape_cast %154 : vector<1x3x128xf32> to vector<3x128xf32>
    %c2_76 = arith.constant 2 : index
    %c3_77 = arith.constant 3 : index
    %c0_78 = arith.constant 0 : index
    %156 = vector.load %arg3[%c2_76, %c3_77, %c0_78] : memref<4x10x128xf32, #tpu.memory_space<vmem>>, vector<1x1x128xf32>
    %157 = vector.shape_cast %156 : vector<1x1x128xf32> to vector<1x128xf32>
    %c2_79 = arith.constant 2 : index
    %c4_80 = arith.constant 4 : index
    %c0_81 = arith.constant 0 : index
    %158 = vector.load %arg3[%c2_79, %c4_80, %c0_81] : memref<4x10x128xf32, #tpu.memory_space<vmem>>, vector<1x1x128xf32>
    %159 = vector.shape_cast %158 : vector<1x1x128xf32> to vector<1x128xf32>
    %c2_82 = arith.constant 2 : index
    %c5_83 = arith.constant 5 : index
    %c0_84 = arith.constant 0 : index
    %160 = vector.load %arg3[%c2_82, %c5_83, %c0_84] : memref<4x10x128xf32, #tpu.memory_space<vmem>>, vector<1x3x128xf32>
    %161 = vector.shape_cast %160 : vector<1x3x128xf32> to vector<3x128xf32>
    %c2_85 = arith.constant 2 : index
    %c8_86 = arith.constant 8 : index
    %c0_87 = arith.constant 0 : index
    %162 = vector.load %arg3[%c2_85, %c8_86, %c0_87] : memref<4x10x128xf32, #tpu.memory_space<vmem>>, vector<1x1x128xf32>
    %163 = vector.shape_cast %162 : vector<1x1x128xf32> to vector<1x128xf32>
    %c2_88 = arith.constant 2 : index
    %c9_89 = arith.constant 9 : index
    %c0_90 = arith.constant 0 : index
    %164 = vector.load %arg3[%c2_88, %c9_89, %c0_90] : memref<4x10x128xf32, #tpu.memory_space<vmem>>, vector<1x1x128xf32>
    %165 = vector.shape_cast %164 : vector<1x1x128xf32> to vector<1x128xf32>
    %c2_91 = arith.constant 2 : index
    %c0_92 = arith.constant 0 : index
    %c0_93 = arith.constant 0 : index
    %c0_94 = arith.constant 0 : index
    %166 = vector.load %arg2[%c2_91, %c0_92, %c0_93, %c0_94] : memref<4x2x128x128xbf16, #tpu.memory_space<vmem>>, vector<1x1x128x128xbf16>
    %167 = vector.shape_cast %166 : vector<1x1x128x128xbf16> to vector<128x128xbf16>
    %c2_95 = arith.constant 2 : index
    %c1_96 = arith.constant 1 : index
    %c0_97 = arith.constant 0 : index
    %c0_98 = arith.constant 0 : index
    %168 = vector.load %arg2[%c2_95, %c1_96, %c0_97, %c0_98] : memref<4x2x128x128xbf16, #tpu.memory_space<vmem>>, vector<1x1x128x128xbf16>
    %169 = vector.shape_cast %168 : vector<1x1x128x128xbf16> to vector<128x128xbf16>
    %170 = vector.extract_strided_slice %155 {offsets = [0, 0], sizes = [1, 128], strides = [1, 1]} : vector<3x128xf32> to vector<1x128xf32>
    %c2_i32_99 = arith.constant 2 : i32
    %171 = tpu.dynamic_rotate %153 by %c2_i32_99 dim 0 : vector<4x128xf32>, i32 -> vector<4x128xf32>
    %c2_i32_100 = arith.constant 2 : i32
    %172 = vector.broadcast %c2_i32_100 : i32 to vector<4x1xi32>
    %173 = arith.cmpi sge, %3, %172 : vector<4x1xi32>
    %cst_101 = arith.constant 0.000000e+00 : f32
    %174 = vector.shape_cast %173 : vector<4x1xi1> to vector<4x1xi1>
    %175 = vector.broadcast %174 : vector<4x1xi1> to vector<4x128xi1>
    %176 = vector.broadcast %cst_101 : f32 to vector<4x128xf32>
    %177 = arith.select %175, %171, %176 : vector<4x128xi1>, vector<4x128xf32>
    %178 = vector.broadcast %170 : vector<1x128xf32> to vector<4x128xf32>
    %179 = arith.mulf %178, %177 : vector<4x128xf32>
    %180 = vector.extract_strided_slice %155 {offsets = [1, 0], sizes = [1, 128], strides = [1, 1]} : vector<3x128xf32> to vector<1x128xf32>
    %181 = vector.broadcast %180 : vector<1x128xf32> to vector<4x128xf32>
    %182 = arith.mulf %181, %153 : vector<4x128xf32>
    %183 = arith.addf %179, %182 : vector<4x128xf32>
    %184 = vector.extract_strided_slice %155 {offsets = [2, 0], sizes = [1, 128], strides = [1, 1]} : vector<3x128xf32> to vector<1x128xf32>
    %c2_i32_102 = arith.constant 2 : i32
    %185 = tpu.dynamic_rotate %153 by %c2_i32_102 dim 0 : vector<4x128xf32>, i32 -> vector<4x128xf32>
    %c2_i32_103 = arith.constant 2 : i32
    %186 = vector.broadcast %c2_i32_103 : i32 to vector<4x1xi32>
    %187 = arith.cmpi slt, %3, %186 : vector<4x1xi32>
    %cst_104 = arith.constant 0.000000e+00 : f32
    %188 = vector.shape_cast %187 : vector<4x1xi1> to vector<4x1xi1>
    %189 = vector.broadcast %188 : vector<4x1xi1> to vector<4x128xi1>
    %190 = vector.broadcast %cst_104 : f32 to vector<4x128xf32>
    %191 = arith.select %189, %185, %190 : vector<4x128xi1>, vector<4x128xf32>
    %192 = vector.broadcast %184 : vector<1x128xf32> to vector<4x128xf32>
    %193 = arith.mulf %192, %191 : vector<4x128xf32>
    %194 = arith.addf %183, %193 : vector<4x128xf32>
    %195 = vector.broadcast %157 : vector<1x128xf32> to vector<4x128xf32>
    %196 = arith.addf %194, %195 : vector<4x128xf32>
    %cst_105 = arith.constant 0.000000e+00 : f32
    %197 = vector.broadcast %cst_105 : f32 to vector<4x128xf32>
    %198 = arith.maximumf %196, %197 : vector<4x128xf32>
    %199 = arith.truncf %198 : vector<4x128xf32> to vector<4x128xbf16>
    %cst_106 = arith.constant dense<0.000000e+00> : vector<4x128xf32>
    %200 = tpu.matmul %199, %167, %cst_106 {dimension_numbers = #tpu.dot_dimension_numbers<[1], [0], [0], [1], [0, 0, 1, 1], [], []>} : vector<4x128xbf16>, vector<128x128xbf16>, vector<4x128xf32> -> vector<4x128xf32>
    %201 = vector.broadcast %159 : vector<1x128xf32> to vector<4x128xf32>
    %202 = arith.addf %200, %201 : vector<4x128xf32>
    %cst_107 = arith.constant 0.000000e+00 : f32
    %203 = vector.broadcast %cst_107 : f32 to vector<4x128xf32>
    %204 = arith.maximumf %202, %203 : vector<4x128xf32>
    %205 = vector.extract_strided_slice %161 {offsets = [0, 0], sizes = [1, 128], strides = [1, 1]} : vector<3x128xf32> to vector<1x128xf32>
    %cst_108 = arith.constant 0.000000e+00 : f32
    %206 = vector.broadcast %cst_108 : f32 to vector<4x128xf32>
    %207 = vector.broadcast %205 : vector<1x128xf32> to vector<4x128xf32>
    %208 = arith.mulf %207, %206 : vector<4x128xf32>
    %209 = vector.extract_strided_slice %161 {offsets = [1, 0], sizes = [1, 128], strides = [1, 1]} : vector<3x128xf32> to vector<1x128xf32>
    %210 = vector.broadcast %209 : vector<1x128xf32> to vector<4x128xf32>
    %211 = arith.mulf %210, %204 : vector<4x128xf32>
    %212 = arith.addf %208, %211 : vector<4x128xf32>
    %213 = vector.extract_strided_slice %161 {offsets = [2, 0], sizes = [1, 128], strides = [1, 1]} : vector<3x128xf32> to vector<1x128xf32>
    %cst_109 = arith.constant 0.000000e+00 : f32
    %214 = vector.broadcast %cst_109 : f32 to vector<4x128xf32>
    %215 = vector.broadcast %213 : vector<1x128xf32> to vector<4x128xf32>
    %216 = arith.mulf %215, %214 : vector<4x128xf32>
    %217 = arith.addf %212, %216 : vector<4x128xf32>
    %218 = vector.broadcast %163 : vector<1x128xf32> to vector<4x128xf32>
    %219 = arith.addf %217, %218 : vector<4x128xf32>
    %cst_110 = arith.constant 0.000000e+00 : f32
    %220 = vector.broadcast %cst_110 : f32 to vector<4x128xf32>
    %221 = arith.maximumf %219, %220 : vector<4x128xf32>
    %222 = arith.truncf %221 : vector<4x128xf32> to vector<4x128xbf16>
    %cst_111 = arith.constant dense<0.000000e+00> : vector<4x128xf32>
    %223 = tpu.matmul %222, %169, %cst_111 {dimension_numbers = #tpu.dot_dimension_numbers<[1], [0], [0], [1], [0, 0, 1, 1], [], []>} : vector<4x128xbf16>, vector<128x128xbf16>, vector<4x128xf32> -> vector<4x128xf32>
    %224 = vector.broadcast %165 : vector<1x128xf32> to vector<4x128xf32>
    %225 = arith.addf %223, %224 : vector<4x128xf32>
    %226 = arith.addf %225, %153 : vector<4x128xf32>
    %cst_112 = arith.constant 0.000000e+00 : f32
    %227 = vector.broadcast %cst_112 : f32 to vector<4x128xf32>
    %228 = arith.maximumf %226, %227 : vector<4x128xf32>
    %c3_113 = arith.constant 3 : index
    %c0_114 = arith.constant 0 : index
    %c0_115 = arith.constant 0 : index
    %229 = vector.load %arg3[%c3_113, %c0_114, %c0_115] : memref<4x10x128xf32, #tpu.memory_space<vmem>>, vector<1x3x128xf32>
    %230 = vector.shape_cast %229 : vector<1x3x128xf32> to vector<3x128xf32>
    %c3_116 = arith.constant 3 : index
    %c3_117 = arith.constant 3 : index
    %c0_118 = arith.constant 0 : index
    %231 = vector.load %arg3[%c3_116, %c3_117, %c0_118] : memref<4x10x128xf32, #tpu.memory_space<vmem>>, vector<1x1x128xf32>
    %232 = vector.shape_cast %231 : vector<1x1x128xf32> to vector<1x128xf32>
    %c3_119 = arith.constant 3 : index
    %c4_120 = arith.constant 4 : index
    %c0_121 = arith.constant 0 : index
    %233 = vector.load %arg3[%c3_119, %c4_120, %c0_121] : memref<4x10x128xf32, #tpu.memory_space<vmem>>, vector<1x1x128xf32>
    %234 = vector.shape_cast %233 : vector<1x1x128xf32> to vector<1x128xf32>
    %c3_122 = arith.constant 3 : index
    %c5_123 = arith.constant 5 : index
    %c0_124 = arith.constant 0 : index
    %235 = vector.load %arg3[%c3_122, %c5_123, %c0_124] : memref<4x10x128xf32, #tpu.memory_space<vmem>>, vector<1x3x128xf32>
    %236 = vector.shape_cast %235 : vector<1x3x128xf32> to vector<3x128xf32>
    %c3_125 = arith.constant 3 : index
    %c8_126 = arith.constant 8 : index
    %c0_127 = arith.constant 0 : index
    %237 = vector.load %arg3[%c3_125, %c8_126, %c0_127] : memref<4x10x128xf32, #tpu.memory_space<vmem>>, vector<1x1x128xf32>
    %238 = vector.shape_cast %237 : vector<1x1x128xf32> to vector<1x128xf32>
    %c3_128 = arith.constant 3 : index
    %c9_129 = arith.constant 9 : index
    %c0_130 = arith.constant 0 : index
    %239 = vector.load %arg3[%c3_128, %c9_129, %c0_130] : memref<4x10x128xf32, #tpu.memory_space<vmem>>, vector<1x1x128xf32>
    %240 = vector.shape_cast %239 : vector<1x1x128xf32> to vector<1x128xf32>
    %c3_131 = arith.constant 3 : index
    %c0_132 = arith.constant 0 : index
    %c0_133 = arith.constant 0 : index
    %c0_134 = arith.constant 0 : index
    %241 = vector.load %arg2[%c3_131, %c0_132, %c0_133, %c0_134] : memref<4x2x128x128xbf16, #tpu.memory_space<vmem>>, vector<1x1x128x128xbf16>
    %242 = vector.shape_cast %241 : vector<1x1x128x128xbf16> to vector<128x128xbf16>
    %c3_135 = arith.constant 3 : index
    %c1_136 = arith.constant 1 : index
    %c0_137 = arith.constant 0 : index
    %c0_138 = arith.constant 0 : index
    %243 = vector.load %arg2[%c3_135, %c1_136, %c0_137, %c0_138] : memref<4x2x128x128xbf16, #tpu.memory_space<vmem>>, vector<1x1x128x128xbf16>
    %244 = vector.shape_cast %243 : vector<1x1x128x128xbf16> to vector<128x128xbf16>
    %245 = vector.extract_strided_slice %230 {offsets = [0, 0], sizes = [1, 128], strides = [1, 1]} : vector<3x128xf32> to vector<1x128xf32>
    %c2_i32_139 = arith.constant 2 : i32
    %246 = tpu.dynamic_rotate %228 by %c2_i32_139 dim 0 : vector<4x128xf32>, i32 -> vector<4x128xf32>
    %c2_i32_140 = arith.constant 2 : i32
    %247 = vector.broadcast %c2_i32_140 : i32 to vector<4x1xi32>
    %248 = arith.cmpi sge, %3, %247 : vector<4x1xi32>
    %cst_141 = arith.constant 0.000000e+00 : f32
    %249 = vector.shape_cast %248 : vector<4x1xi1> to vector<4x1xi1>
    %250 = vector.broadcast %249 : vector<4x1xi1> to vector<4x128xi1>
    %251 = vector.broadcast %cst_141 : f32 to vector<4x128xf32>
    %252 = arith.select %250, %246, %251 : vector<4x128xi1>, vector<4x128xf32>
    %253 = vector.broadcast %245 : vector<1x128xf32> to vector<4x128xf32>
    %254 = arith.mulf %253, %252 : vector<4x128xf32>
    %255 = vector.extract_strided_slice %230 {offsets = [1, 0], sizes = [1, 128], strides = [1, 1]} : vector<3x128xf32> to vector<1x128xf32>
    %256 = vector.broadcast %255 : vector<1x128xf32> to vector<4x128xf32>
    %257 = arith.mulf %256, %228 : vector<4x128xf32>
    %258 = arith.addf %254, %257 : vector<4x128xf32>
    %259 = vector.extract_strided_slice %230 {offsets = [2, 0], sizes = [1, 128], strides = [1, 1]} : vector<3x128xf32> to vector<1x128xf32>
    %c2_i32_142 = arith.constant 2 : i32
    %260 = tpu.dynamic_rotate %228 by %c2_i32_142 dim 0 : vector<4x128xf32>, i32 -> vector<4x128xf32>
    %c2_i32_143 = arith.constant 2 : i32
    %261 = vector.broadcast %c2_i32_143 : i32 to vector<4x1xi32>
    %262 = arith.cmpi slt, %3, %261 : vector<4x1xi32>
    %cst_144 = arith.constant 0.000000e+00 : f32
    %263 = vector.shape_cast %262 : vector<4x1xi1> to vector<4x1xi1>
    %264 = vector.broadcast %263 : vector<4x1xi1> to vector<4x128xi1>
    %265 = vector.broadcast %cst_144 : f32 to vector<4x128xf32>
    %266 = arith.select %264, %260, %265 : vector<4x128xi1>, vector<4x128xf32>
    %267 = vector.broadcast %259 : vector<1x128xf32> to vector<4x128xf32>
    %268 = arith.mulf %267, %266 : vector<4x128xf32>
    %269 = arith.addf %258, %268 : vector<4x128xf32>
    %270 = vector.broadcast %232 : vector<1x128xf32> to vector<4x128xf32>
    %271 = arith.addf %269, %270 : vector<4x128xf32>
    %cst_145 = arith.constant 0.000000e+00 : f32
    %272 = vector.broadcast %cst_145 : f32 to vector<4x128xf32>
    %273 = arith.maximumf %271, %272 : vector<4x128xf32>
    %274 = arith.truncf %273 : vector<4x128xf32> to vector<4x128xbf16>
    %cst_146 = arith.constant dense<0.000000e+00> : vector<4x128xf32>
    %275 = tpu.matmul %274, %242, %cst_146 {dimension_numbers = #tpu.dot_dimension_numbers<[1], [0], [0], [1], [0, 0, 1, 1], [], []>} : vector<4x128xbf16>, vector<128x128xbf16>, vector<4x128xf32> -> vector<4x128xf32>
    %276 = vector.broadcast %234 : vector<1x128xf32> to vector<4x128xf32>
    %277 = arith.addf %275, %276 : vector<4x128xf32>
    %cst_147 = arith.constant 0.000000e+00 : f32
    %278 = vector.broadcast %cst_147 : f32 to vector<4x128xf32>
    %279 = arith.maximumf %277, %278 : vector<4x128xf32>
    %280 = vector.extract_strided_slice %236 {offsets = [0, 0], sizes = [1, 128], strides = [1, 1]} : vector<3x128xf32> to vector<1x128xf32>
    %cst_148 = arith.constant 0.000000e+00 : f32
    %281 = vector.broadcast %cst_148 : f32 to vector<4x128xf32>
    %282 = vector.broadcast %280 : vector<1x128xf32> to vector<4x128xf32>
    %283 = arith.mulf %282, %281 : vector<4x128xf32>
    %284 = vector.extract_strided_slice %236 {offsets = [1, 0], sizes = [1, 128], strides = [1, 1]} : vector<3x128xf32> to vector<1x128xf32>
    %285 = vector.broadcast %284 : vector<1x128xf32> to vector<4x128xf32>
    %286 = arith.mulf %285, %279 : vector<4x128xf32>
    %287 = arith.addf %283, %286 : vector<4x128xf32>
    %288 = vector.extract_strided_slice %236 {offsets = [2, 0], sizes = [1, 128], strides = [1, 1]} : vector<3x128xf32> to vector<1x128xf32>
    %cst_149 = arith.constant 0.000000e+00 : f32
    %289 = vector.broadcast %cst_149 : f32 to vector<4x128xf32>
    %290 = vector.broadcast %288 : vector<1x128xf32> to vector<4x128xf32>
    %291 = arith.mulf %290, %289 : vector<4x128xf32>
    %292 = arith.addf %287, %291 : vector<4x128xf32>
    %293 = vector.broadcast %238 : vector<1x128xf32> to vector<4x128xf32>
    %294 = arith.addf %292, %293 : vector<4x128xf32>
    %cst_150 = arith.constant 0.000000e+00 : f32
    %295 = vector.broadcast %cst_150 : f32 to vector<4x128xf32>
    %296 = arith.maximumf %294, %295 : vector<4x128xf32>
    %297 = arith.truncf %296 : vector<4x128xf32> to vector<4x128xbf16>
    %cst_151 = arith.constant dense<0.000000e+00> : vector<4x128xf32>
    %298 = tpu.matmul %297, %244, %cst_151 {dimension_numbers = #tpu.dot_dimension_numbers<[1], [0], [0], [1], [0, 0, 1, 1], [], []>} : vector<4x128xbf16>, vector<128x128xbf16>, vector<4x128xf32> -> vector<4x128xf32>
    %299 = vector.broadcast %240 : vector<1x128xf32> to vector<4x128xf32>
    %300 = arith.addf %298, %299 : vector<4x128xf32>
    %301 = arith.addf %300, %228 : vector<4x128xf32>
    %cst_152 = arith.constant 0.000000e+00 : f32
    %302 = vector.broadcast %cst_152 : f32 to vector<4x128xf32>
    %303 = arith.maximumf %301, %302 : vector<4x128xf32>
    %304 = arith.truncf %303 : vector<4x128xf32> to vector<4x128xbf16>
    %c0_153 = arith.constant 0 : index
    %c0_154 = arith.constant 0 : index
    %c0_155 = arith.constant 0 : index
    %305 = vector.load %arg4[%c0_153, %c0_154, %c0_155] : memref<1x4x128xbf16, #tpu.memory_space<vmem>>, vector<1x4x128xbf16>
    %306 = vector.shape_cast %305 : vector<1x4x128xbf16> to vector<4x128xbf16>
    %307 = vector.shape_cast %304 : vector<4x128xbf16> to vector<1x4x128xbf16>
    tpu.vector_store %arg4[%c0_153, %c0_154, %c0_155], %307 {strides = array<i32>} : memref<1x4x128xbf16, #tpu.memory_space<vmem>>, vector<1x4x128xbf16>,
    return
  }
  func.func @transform_0(%arg0: i32) -> (i32, i32, i32) {
    %c0_i32 = arith.constant 0 : i32
    %c0_i32_0 = arith.constant 0 : i32
    %c0_i32_1 = arith.constant 0 : i32
    return %arg0, %c0_i32, %c0_i32_0 : i32, i32, i32
  }
  func.func @transform_1(%arg0: i32) -> (i32, i32, i32, i32) {
    %c0_i32 = arith.constant 0 : i32
    %c0_i32_0 = arith.constant 0 : i32
    %c0_i32_1 = arith.constant 0 : i32
    %c0_i32_2 = arith.constant 0 : i32
    %c0_i32_3 = arith.constant 0 : i32
    return %c0_i32, %c0_i32_0, %c0_i32_1, %c0_i32_2 : i32, i32, i32, i32
  }
  func.func @transform_2(%arg0: i32) -> (i32, i32, i32) {
    %c0_i32 = arith.constant 0 : i32
    %c0_i32_0 = arith.constant 0 : i32
    %c0_i32_1 = arith.constant 0 : i32
    %c0_i32_2 = arith.constant 0 : i32
    return %c0_i32, %c0_i32_0, %c0_i32_1 : i32, i32, i32
  }
  func.func @transform_3(%arg0: i32) -> (i32, i32, i32) {
    %c0_i32 = arith.constant 0 : i32
    %c0_i32_0 = arith.constant 0 : i32
    %c0_i32_1 = arith.constant 0 : i32
    return %arg0, %c0_i32, %c0_i32_0 : i32, i32, i32
  }
}

</mosaic_0001>

<bundles_post_ra>
// kernel: _lambda_.5
= control target key start
LH: loop header
LB: loop body
LE: loop exit
PB: predicated region body
PF: predicated region fallthrough
CT: control target
= control target key end

     0   :  { %s538_s12 = smov 0   ;;  %s540_s13 = smov 0   ;;  %s604_s0 = inlined_call_operand.vmem [shape: bf16[2,64,30], index: 0, kind: input, shape index: {}]   ;;  %s605_s1 = inlined_call_operand.vmem [shape: bf16[30,16], index: 1, kind: input, shape index: {}]   ;;  %s606_s2 = inlined_call_operand.vmem [shape: f32[1,16], index: 2, kind: input, shape index: {}]   ;;  %s607_s3 = inlined_call_operand.vmem [shape: bf16[2,64,16], index: 3, kind: output, shape index: {}]  }
   0x1   :  { %s542_s14 = smov 0  }
   0x2 LB: > { %s25_s15 = sadd.s32 1, %s512_s13  ;;  %p420_p0 = scmp.ge.s32.totalorder %s516_s14, 1  ;;  %s516_s14 = sphi %s542_s14, %s13_s14   ;;  %s512_s13 = sphi %s540_s13, %s609_s13   ;;  %s508_s12 = sphi %s538_s12, %s608_s12  }
   0x3   : > { %p27_p1 = scmp.ge.s32.totalorder %s25_s15, 2  ;;  %p158_p2 = scmp.lt.s32.totalorder %s516_s14, 3 }
   0x5   : > { %s611_s15 = smov (%p27_p1, %s25_s15), 0  ;;  %p159_p3 = pnand %p420_p0, %p158_p2 }
   0x6   : > { %p191_p4 = scmp.lt.s32.totalorder (!%p159_p3), %s508_s12, 1 }
   0x7   : > { %162 = sbr.rel (%p159_p3) target bundleno = 172 (0xac), region = 32 }
   0xc   : > { %v447_v0 = vld [vmem:[%s605_s1 + $0x8] sm:$0xf]  ;;  %v462_v1 = vld [vmem:[%s605_s1 + $0x8] sm:$0x70]  ;;  %vm271_vm0 = vcmask 1046528   ;;  %s613_s12 = smov (!%p191_p4, %s508_s12), 1 }
   0xd   : > { %v448_v2 = vor.u32 %v462_v1, %v447_v0  ;;  %v461_v4 = vld [vmem:[%s605_s1] sm:$0xff]  ;;  %s455_s22 = sshll.u32 %s613_s12, 5  ;;  %vm258_vm1 = vcmask 244736   ;;  %vm320_vm2 = vcmask 125952  }
   0xe   : > { %s198_s25 = scalar_lea.vmem %s604_s0, %s455_s22  ;;  %v493_v9 = vld [vmem:[%s606_s2] ss:$0 sm:$0xff]  ;;  %s577_s30 = scalar_lea.vmem %s607_s3, %s455_s22 }
   0xf   : > { %v273_v3 = vsel %vm271_vm0, %v448_v2, 0  ;;  %v457_v5 = vld [vmem:[%s198_s25] sm:$0xff]  ;;  %v458_v6 = vld [vmem:[%s198_s25 + $0x8] sm:$0xff]  ;;  %v459_v7 = vld [vmem:[%s198_s25 + $0x10] sm:$0xff] }
  0x10   : > { %281 = vmatpush.bf16.msra.mxu0 %v273_v3  ;;  %463 = vmatpush.bf16.msra.mxu1 %v273_v3  ;;  %v460_v8 = vld [vmem:[%s198_s25 + $0x18] sm:$0xff] }
  0x11   : > { %464 = vmatpush.bf16.msra.mxu2 %v273_v3  ;;  %465 = vmatpush.bf16.msra.mxu3 %v273_v3 }
  0x14   : > { %282 = vmatpush.bf16.msra.mxu0 %v461_v4  ;;  %466 = vmatpush.bf16.msra.mxu1 %v461_v4 }
  0x15   : > { %467 = vmatpush.bf16.msra.mxu2 %v461_v4  ;;  %468 = vmatpush.bf16.msra.mxu3 %v461_v4 }
  0x17   : > { %449 = vmatmul.msk.bf16.vlgmr.msra.gmra.mxu0 %vm258_vm1, %v457_v5  ;;  %450 = vmatmul.msk.bf16.vlgmr.msra.gmra.mxu1 %vm258_vm1, %v458_v6 }
  0x18   : > { %451 = vmatmul.msk.bf16.vlgmr.msra.gmra.mxu2 %vm258_vm1, %v459_v7  ;;  %452 = vmatmul.msk.bf16.vlgmr.msra.gmra.mxu3 %vm258_vm1, %v460_v8 }
  0x94   : > { %v284_v10 = vpop.f32.mrf.mxu0  ;;  %v289_v11 = vpop.f32.mrf.mxu1 }
  0x95   : > { %v285_v12 = vadd.f32 %v493_v9, %v284_v10  ;;  %v290_v13 = vadd.f32 %v493_v9, %v289_v11 }
  0x97   : > { %v304_v14 = vmax.f32 %v285_v12, 0.0  ;;  %v306_v15 = vmax.f32 %v290_v13, 0.0 }
  0x99   : > { %v312_v16 = vpack.c.bf16 %v304_v14, %v304_v14  ;;  %v314_v17 = vpack.c.bf16 %v306_v15, %v306_v15 }
  0x9b   : > { %321 = vst.msk [vmem:[%s577_s30] sm:$0xf] %vm320_vm2, %v312_v16  ;;  %v294_v18 = vpop.f32.mrf.mxu2  ;;  %v299_v19 = vpop.f32.mrf.mxu3 }
  0x9c   : > { %323 = vst.msk [vmem:[%s577_s30 + $0x8] sm:$0xf] %vm320_vm2, %v314_v17  ;;  %v295_v20 = vadd.f32 %v493_v9, %v294_v18  ;;  %v300_v21 = vadd.f32 %v493_v9, %v299_v19  ;;  %v286_v22 = vpop.f32.mrf.mxu0  ;;  %v291_v23 = vpop.f32.mrf.mxu1 }
  0x9d   : > { %v287_v24 = vadd.f32 %v493_v9, %v286_v22  ;;  %v292_v25 = vadd.f32 %v493_v9, %v291_v23 }
  0x9e   : > { %v308_v26 = vmax.f32 %v295_v20, 0.0  ;;  %v310_v27 = vmax.f32 %v300_v21, 0.0 }
  0x9f   : > { %v305_v28 = vmax.f32 %v287_v24, 0.0  ;;  %v307_v29 = vmax.f32 %v292_v25, 0.0 }
  0xa0   : > { %v316_v30 = vpack.c.bf16 %v308_v26, %v308_v26  ;;  %v318_v31 = vpack.c.bf16 %v310_v27, %v310_v27 }
  0xa1   : > { %v313_v32 = vpack.c.bf16 %v305_v28, %v305_v28  ;;  %v315_v33 = vpack.c.bf16 %v307_v29, %v307_v29 }
  0xa2   : > { %325 = vst.msk [vmem:[%s577_s30 + $0x10] sm:$0xf] %vm320_vm2, %v316_v30 }
  0xa3   : > { %327 = vst.msk [vmem:[%s577_s30 + $0x18] sm:$0xf] %vm320_vm2, %v318_v31  ;;  %v296_v34 = vpop.f32.mrf.mxu2  ;;  %v301_v35 = vpop.f32.mrf.mxu3 }
  0xa4   : > { %322 = vst.msk [vmem:[%s577_s30 + $0x4] sm:$0xf] %vm320_vm2, %v313_v32  ;;  %v297_v36 = vadd.f32 %v493_v9, %v296_v34  ;;  %v302_v37 = vadd.f32 %v493_v9, %v301_v35 }
  0xa5   : > { %324 = vst.msk [vmem:[%s577_s30 + $0xc] sm:$0xf] %vm320_vm2, %v315_v33 }
  0xa6   : > { %v309_v38 = vmax.f32 %v297_v36, 0.0  ;;  %v311_v39 = vmax.f32 %v302_v37, 0.0 }
  0xa8   : > { %v317_v40 = vpack.c.bf16 %v309_v38, %v309_v38  ;;  %v319_v41 = vpack.c.bf16 %v311_v39, %v311_v39 }
  0xaa   : > { %326 = vst.msk [vmem:[%s577_s30 + $0x14] sm:$0xf] %vm320_vm2, %v317_v40 }
  0xab   : > { %328 = vst.msk [vmem:[%s577_s30 + $0x1c] sm:$0xf] %vm320_vm2, %v319_v41 }
  0xac PF: > { %s13_s14 = sadd.s32 1, %s516_s14   ;;  %s608_s12 = smov %s512_s13 }
  0xad   : > { %p10_p5 = scmp.ge.s32.totalorder %s13_s14, 4   ;;  %s609_s13 = smov %s611_s15 }
  0xaf   :  { %12 = sbr.rel (!%p10_p5) target bundleno = 2 (0x2), region = 62 }

// kernel: _lambda_.6
= control target key start
LH: loop header
LB: loop body
LE: loop exit
PB: predicated region body
PF: predicated region fallthrough
CT: control target
= control target key end

     0   :  { %s581_s12 = smov 0   ;;  %s583_s13 = smov 0   ;;  %s651_s0 = inlined_call_operand.vmem [shape: bf16[2,16,160], index: 0, kind: input, shape index: {}]   ;;  %s652_s1 = inlined_call_operand.vmem [shape: bf16[160,64], index: 1, kind: input, shape index: {}]   ;;  %s653_s2 = inlined_call_operand.vmem [shape: f32[1,64], index: 2, kind: input, shape index: {}]   ;;  %s654_s3 = inlined_call_operand.vmem [shape: bf16[2,16,64], index: 3, kind: output, shape index: {}]  }
   0x1   :  { %s585_s14 = smov 0  }
   0x2 LB: > { %s25_s15 = sadd.s32 1, %s555_s13  ;;  %p442_p0 = scmp.ge.s32.totalorder %s559_s14, 1  ;;  %s559_s14 = sphi %s585_s14, %s13_s14   ;;  %s555_s13 = sphi %s583_s13, %s656_s13   ;;  %s551_s12 = sphi %s581_s12, %s655_s12  }
   0x3   : > { %p27_p1 = scmp.ge.s32.totalorder %s25_s15, 2  ;;  %p159_p2 = scmp.lt.s32.totalorder %s559_s14, 3 }
   0x5   : > { %s658_s15 = smov (%p27_p1, %s25_s15), 0  ;;  %p160_p3 = pnand %p442_p0, %p159_p2 }
   0x6   : > { %p193_p4 = scmp.lt.s32.totalorder (!%p160_p3), %s551_s12, 1 }
   0x7   : > { %163 = sbr.rel (%p160_p3) target bundleno = 187 (0xbb), region = 32 }
   0xc   : > { %v509_v0 = vld [vmem:[%s652_s1 + $0x38] sm:$0xff]  ;;  %v511_v1 = vld [vmem:[%s652_s1 + $0x48] sm:$0xff]  ;;  %v508_v2 = vld [vmem:[%s652_s1 + $0x30] sm:$0xff]  ;;  %s660_s12 = smov (!%p193_p4, %s551_s12), 1  ;;  %vm309_vm0 = vcmask 261120   ;;  %vm345_vm1 = vcmask 519168  }
   0xd   : > { %313 = vmatpush.bf16.msra.mxu0 %v509_v0  ;;  %333 = vmatpush.bf16.msra.mxu1 %v511_v1  ;;  %v510_v3 = vld [vmem:[%s652_s1 + $0x40] sm:$0xff]  ;;  %s498_s24 = sshll.u32 %s660_s12, 4  ;;  %v507_v4 = vld [vmem:[%s652_s1 + $0x28] sm:$0xff]  ;;  %v505_v9 = vld [vmem:[%s652_s1 + $0x18] sm:$0xff]  ;;  %s499_s19 = sshll.u32 %s660_s12, 3 }
   0xe   : > { %s201_s27 = scalar_lea.vmem %s651_s0, %s498_s24  ;;  %v506_v8 = vld [vmem:[%s652_s1 + $0x20] sm:$0xff]  ;;  %v504_v10 = vld [vmem:[%s652_s1 + $0x10] sm:$0xff]  ;;  %v503_v11 = vld [vmem:[%s652_s1 + $0x8] sm:$0xff]  ;;  %s211_s22 = scalar_lea.vmem %s654_s3, %s499_s19 }
   0xf   : > { %v500_v5 = vld [vmem:[%s201_s27 + $0x4] sm:$0xf]  ;;  %v451_v6 = vld [vmem:[%s201_s27 + $0x8] sm:$0xf0]  ;;  %v449_v13 = vld [vmem:[%s201_s27] sm:$0xf] }
  0x10   : > { %v454_v7 = vor.u32 %v500_v5, %v451_v6  ;;  %v502_v12 = vld [vmem:[%s652_s1] sm:$0xff]  ;;  %v501_v14 = vld [vmem:[%s201_s27 + $0x4] sm:$0xf0] }
  0x11   : > { %314 = vmatpush.bf16.msra.mxu0 %v508_v2  ;;  %334 = vmatpush.bf16.msra.mxu1 %v510_v3  ;;  %v450_v15 = vor.u32 %v501_v14, %v449_v13  ;;  %v536_v16 = vld [vmem:[%s653_s2] ss:$0 sm:$0xff] }
  0x14   : > { %495 = vmatmul.msk.bf16.vlgmr.msra.gmra.mxu1 %vm309_vm0, %v454_v7 }
  0x15   : > { %315 = vmatpush.bf16.msra.mxu0 %v507_v4 }
  0x19   : > { %316 = vmatpush.bf16.msra.mxu0 %v506_v8 }
  0x1d   : > { %317 = vmatpush.bf16.msra.mxu0 %v505_v9 }
  0x21   : > { %318 = vmatpush.bf16.msra.mxu0 %v504_v10 }
  0x25   : > { %319 = vmatpush.bf16.msra.mxu0 %v503_v11 }
  0x29   : > { %320 = vmatpush.bf16.msra.mxu0 %v502_v12 }
  0x2c   : > { %321 = vmatmul.bf16.vlgmr.msra.gmra.mxu0 %v450_v15 }
  0x91   : > { %v336_v17 = vpop.f32.mrf.mxu1 }
  0x99   : > { %v338_v25 = vpop.f32.mrf.mxu1 }
  0xa9   : > { %v322_v18 = vpop.f32.mrf.mxu0 }
  0xaa   : > { %v323_v19 = vadd.f32 %v536_v16, %v322_v18 }
  0xac   : > { %v337_v20 = vadd.f32 %v336_v17, %v323_v19 }
  0xae   : > { %v341_v21 = vmax.f32 %v337_v20, 0.0 }
  0xb0   : > { %v343_v22 = vpack.c.bf16 %v341_v21, %v341_v21 }
  0xb1   : > { %v324_v23 = vpop.f32.mrf.mxu0 }
  0xb2   : > { %346 = vst.msk [vmem:[%s211_s22] sm:$0xf] %vm345_vm1, %v343_v22  ;;  %v325_v24 = vadd.f32 %v536_v16, %v324_v23 }
  0xb4   : > { %v339_v26 = vadd.f32 %v338_v25, %v325_v24 }
  0xb6   : > { %v342_v27 = vmax.f32 %v339_v26, 0.0 }
  0xb8   : > { %v344_v28 = vpack.c.bf16 %v342_v27, %v342_v27 }
  0xba   : > { %347 = vst.msk [vmem:[%s211_s22 + $0x4] sm:$0xf] %vm345_vm1, %v344_v28 }
  0xbb PF: > { %s13_s14 = sadd.s32 1, %s559_s14   ;;  %s655_s12 = smov %s555_s13 }
  0xbc   : > { %p10_p5 = scmp.ge.s32.totalorder %s13_s14, 4   ;;  %s656_s13 = smov %s658_s15 }
  0xbe   :  { %12 = sbr.rel (!%p10_p5) target bundleno = 2 (0x2), region = 62 }

// kernel: _lambda_.7
= control target key start
LH: loop header
LB: loop body
LE: loop exit
PB: predicated region body
PF: predicated region fallthrough
CT: control target
= control target key end

     0   :  { %s764_s12 = smov 0   ;;  %s936_s0 = inlined_call_operand.vmem [shape: bf16[2,16,64], index: 0, kind: input, shape index: {}]   ;;  %s937_s1 = inlined_call_operand.vmem [shape: bf16[2,2,64,64], index: 1, kind: input, shape index: {}]   ;;  %s938_s2 = inlined_call_operand.vmem [shape: f32[2,10,64], index: 2, kind: input, shape index: {}]   ;;  %s939_s3 = inlined_call_operand.vmem [shape: bf16[2,16,64], index: 3, kind: output, shape index: {}]  }
   0x1 LB: > { %s589_s13 = sadd.s32 4294967295, %s742_s12   ;;  %p593_p0 = scmp.ge.s32.totalorder %s742_s12, 1  ;;  %s742_s12 = sphi %s764_s12, %s13_s12  }
   0x2   : > { %p137_p1 = scmp.lt.s32.totalorder %s742_s12, 3 }
   0x4   : > { %p138_p2 = pnand %p593_p0, %p137_p1 }
   0x5   : > { %p161_p3 = scmp.lt.s32.totalorder (!%p138_p2), %s589_s13, 1 }
   0x6   : > { %141 = sbr.rel (%p138_p2) target bundleno = 652 (0x28c), region = 32 }
   0xb   : > { %v703_v0 = vld [vmem:[%s937_s1 + $0x18] sm:$0xff]  ;;  %v176_v1 = vlaneseq  ;;  %v702_v2 = vld [vmem:[%s937_s1 + $0x10] sm:$0xff]  ;;  %s941_s13 = smov (!%p161_p3, %s589_s13), 1  ;;  %v179_v4 = vld [vmem:[%s938_s2] sm:$0x7]  ;;  %vm267_vm3 = vcmask 523264  }
   0xc   : > { %275 = vmatpush.bf16.msra.mxu0 %v703_v0  ;;  %v701_v5 = vld [vmem:[%s937_s1 + $0x8] sm:$0xff]  ;;  %s698_s22 = sshll.u32 %s941_s13, 3  ;;  %v218_v8 = vperm.slane %v179_v4, 1  ;;  %v215_v11 = vperm.slane %v179_v4, 0  ;;  %v231_v12 = vperm.slane %v179_v4, 2  ;;  %v700_v15 = vld [vmem:[%s937_s1] sm:$0xff] }
   0xd   : > { %v780_v3 = vshrl.u32 %v176_v1, 7  ;;  %s165_s25 = scalar_lea.vmem %s936_s0, %s698_s22  ;;  %v728_v27 = vld [vmem:[%s938_s2 + $0x3] ss:$0 sm:$0xff]  ;;  %v707_v36 = vld [vmem:[%s937_s1 + $0x38] sm:$0xff]  ;;  %v706_v37 = vld [vmem:[%s937_s1 + $0x30] sm:$0xff]  ;;  %s170_s28 = scalar_lea.vmem %s939_s3, %s698_s22  ;;  %vm531_vm4 = vcmask 519168  }
   0xe   : > { %v717_v7 = vld [vmem:[%s165_s25] sm:$0xff]   ;;  %346 = vmatpush.bf16.msra.mxu1 %v707_v36  ;;  %v705_v38 = vld [vmem:[%s937_s1 + $0x28] sm:$0xff] }
   0xf   : > { %v790_v6 = vadd.s32 8, %v780_v3  ;;  %v797_v9 = vunpack.c.l.bf16 %v717_v7  ;;  %v799_v10 = vunpack.c.h.bf16 %v717_v7  ;;  %vm204_vm0 = vcmp.lt.s32.totalorder %v780_v3, 4  ;;  %v704_v39 = vld [vmem:[%s937_s1 + $0x20] sm:$0xff]  ;;  %v730_v63 = vld [vmem:[%s938_s2 + $0x8] ss:$0 sm:$0xff] }
  0x10   : > { %276 = vmatpush.bf16.msra.mxu0 %v702_v2  ;;  %vm207_vm1 = vcmp.ge.s32.totalorder %v780_v3, 4  ;;  %v729_v41 = vld [vmem:[%s938_s2 + $0x4] ss:$0 sm:$0xff]  ;;  %v182_v46 = vld [vmem:[%s938_s2 + $0x5] sm:$0x7] }
  0x11   : > { %v202_v13 = vrot.slane %v797_v9, 4  ;;  %v203_v14 = vrot.slane %v799_v10, 4  ;;  %vm224_vm2 = vcmp.lt.s32.totalorder %v790_v6, 12  ;;  %v220_v16 = vmul.f32 %v799_v10, %v218_v8  ;;  %v735_v6 = vld [vmem:[%s938_s2 + $0x19] ss:$0 sm:$0xff] }
  0x12   : > { %v219_v19 = vmul.f32 %v797_v9, %v218_v8  ;;  %347 = vmatpush.bf16.msra.mxu1 %v706_v37  ;;  %v293_v48 = vperm.slane %v182_v46, 0  ;;  %v296_v50 = vperm.slane %v182_v46, 1  ;;  %v303_v51 = vperm.slane %v182_v46, 2 }
  0x13   : > { %v205_v17 = vsel %vm204_vm0, %v202_v13, %v203_v14  ;;  %v206_v18 = vsel %vm204_vm0, %v203_v14, %v202_v13  ;;  %v711_v13 = vld [vmem:[%s937_s1 + $0x58] sm:$0xff]  ;;  %v710_v14 = vld [vmem:[%s937_s1 + $0x50] sm:$0xff] }
  0x14   : > { %277 = vmatpush.bf16.msra.mxu0 %v701_v5  ;;  %v213_v20 = vsel %vm207_vm1, %v206_v18, 0.0  ;;  %v217_v21 = vmul.f32 %v215_v11, %v205_v17  ;;  %v230_v22 = vsel %vm224_vm2, %v206_v18, 0.0  ;;  %v232_v24 = vmul.f32 %v231_v12, %v205_v17  ;;  %444 = vmatpush.bf16.msra.mxu2 %v711_v13  ;;  %v731_v17 = vld [vmem:[%s938_s2 + $0x9] ss:$0 sm:$0xff] }
  0x15   : > { %v216_v23 = vmul.f32 %v215_v11, %v213_v20  ;;  %v233_v25 = vmul.f32 %v231_v12, %v230_v22 }
  0x16   : > { %v222_v26 = vadd.f32 %v220_v16, %v217_v21  ;;  %348 = vmatpush.bf16.msra.mxu1 %v705_v38  ;;  %v708_v16 = vld [vmem:[%s937_s1 + $0x40] sm:$0xff] }
  0x17   : > { %v221_v28 = vadd.f32 %v219_v19, %v216_v23 }
  0x18   : > { %278 = vmatpush.bf16.msra.mxu0 %v700_v15  ;;  %v235_v29 = vadd.f32 %v233_v25, %v222_v26  ;;  %445 = vmatpush.bf16.msra.mxu2 %v710_v14  ;;  %v709_v15 = vld [vmem:[%s937_s1 + $0x48] sm:$0xff]  ;;  %v640_v25 = vld [vmem:[%s938_s2 + $0x10] sm:$0x7] }
  0x19   : > { %v234_v30 = vadd.f32 %v232_v24, %v221_v28 }
  0x1a   : > { %v238_v31 = vadd.f32 %v728_v27, %v235_v29  ;;  %349 = vmatpush.bf16.msra.mxu1 %v704_v39  ;;  %v394_v29 = vperm.slane %v640_v25, 1 }
  0x1b   : > { %v237_v32 = vadd.f32 %v728_v27, %v234_v30  ;;  %v391_v27 = vperm.slane %v640_v25, 0 }
  0x1c   : > { %v240_v33 = vmax.f32 %v238_v31, 0.0  ;;  %446 = vmatpush.bf16.msra.mxu2 %v709_v15  ;;  %v401_v31 = vperm.slane %v640_v25, 2 }
  0x1d   : > { %v239_v34 = vmax.f32 %v237_v32, 0.0 }
  0x1f   : > { %v241_v35 = vpack.c.bf16 %v240_v33, %v239_v34 }
  0x20   : > { %447 = vmatpush.bf16.msra.mxu2 %v708_v16 }
  0x21   : > { %622 = vmatmul.msk.bf16.vlgmr.msra.gmra.mxu0 %vm267_vm3, %v241_v35 }
  0x9e   : > { %v280_v40 = vpop.f32.mrf.mxu0 }
  0x9f   : > { %v281_v42 = vadd.f32 %v729_v41, %v280_v40  ;;  %v732_v40 = vld [vmem:[%s938_s2 + $0x13] ss:$0 sm:$0xff] }
  0xa1   : > { %v285_v44 = vmax.f32 %v281_v42, 0.0 }
  0xa3   : > { %v287_v49 = vrot.slane %v285_v44, 4  ;;  %v297_v59 = vmul.f32 %v296_v50, %v285_v44 }
  0xa6   : > { %v282_v43 = vpop.f32.mrf.mxu0 }
  0xa7   : > { %v283_v45 = vadd.f32 %v729_v41, %v282_v43 }
  0xa9   : > { %v286_v47 = vmax.f32 %v283_v45, 0.0 }
  0xab   : > { %v288_v52 = vrot.slane %v286_v47, 4  ;;  %v298_v57 = vmul.f32 %v296_v50, %v286_v47  ;;  %v715_v50 = vld [vmem:[%s937_s1 + $0x78] sm:$0xff] }
  0xac   : > { %515 = vmatpush.bf16.msra.mxu3 %v715_v50 }
  0xad   : > { %v289_v53 = vsel %vm204_vm0, %v287_v49, %v288_v52  ;;  %v290_v54 = vsel %vm204_vm0, %v288_v52, %v287_v49  ;;  %v713_v52 = vld [vmem:[%s937_s1 + $0x68] sm:$0xff] }
  0xae   : > { %v291_v55 = vsel %vm207_vm1, %v290_v54, 0.0  ;;  %v295_v56 = vmul.f32 %v293_v48, %v289_v53  ;;  %v302_v58 = vsel %vm224_vm2, %v290_v54, 0.0  ;;  %v304_v0 = vmul.f32 %v303_v51, %v289_v53  ;;  %v712_v53 = vld [vmem:[%s937_s1 + $0x60] sm:$0xff] }
  0xaf   : > { %v294_v60 = vmul.f32 %v293_v48, %v291_v55  ;;  %v305_v61 = vmul.f32 %v303_v51, %v302_v58  ;;  %v714_v51 = vld [vmem:[%s937_s1 + $0x70] sm:$0xff] }
  0xb0   : > { %v300_v62 = vadd.f32 %v298_v57, %v295_v56  ;;  %516 = vmatpush.bf16.msra.mxu3 %v714_v51  ;;  %v733_v55 = vld [vmem:[%s938_s2 + $0x14] ss:$0 sm:$0xff] }
  0xb1   : > { %v299_v1 = vadd.f32 %v297_v59, %v294_v60  ;;  %v643_v60 = vld [vmem:[%s938_s2 + $0x15] sm:$0x7] }
  0xb2   : > { %v307_v2 = vadd.f32 %v305_v61, %v300_v62  ;;  %v462_v62 = vperm.slane %v643_v60, 0 }
  0xb3   : > { %v306_v4 = vadd.f32 %v304_v0, %v299_v1  ;;  %v465_v0 = vperm.slane %v643_v60, 1  ;;  %v472_v1 = vperm.slane %v643_v60, 2 }
  0xb4   : > { %v310_v5 = vadd.f32 %v730_v63, %v307_v2  ;;  %517 = vmatpush.bf16.msra.mxu3 %v713_v52 }
  0xb5   : > { %v309_v7 = vadd.f32 %v730_v63, %v306_v4 }
  0xb6   : > { %v312_v8 = vmax.f32 %v310_v5, 0.0 }
  0xb7   : > { %v311_v11 = vmax.f32 %v309_v7, 0.0 }
  0xb8   : > { %518 = vmatpush.bf16.msra.mxu3 %v712_v53 }
  0xb9   : > { %v313_v12 = vpack.c.bf16 %v312_v8, %v311_v11 }
  0xbb   : > { %639 = vmatmul.msk.bf16.vlgmr.msra.gmra.mxu1 %vm267_vm3, %v313_v12 }
 0x138   : > { %v351_v18 = vpop.f32.mrf.mxu1 }
 0x139   : > { %v352_v19 = vadd.f32 %v731_v17, %v351_v18 }
 0x13b   : > { %v356_v20 = vadd.f32 %v797_v9, %v352_v19 }
 0x13d   : > { %v869_v23 = vmax.f32 %v356_v20, 0.0 }
 0x13f   : > { %v385_v28 = vrot.slane %v869_v23, 4  ;;  %v395_v36 = vmul.f32 %v394_v29, %v869_v23 }
 0x140   : > { %v353_v21 = vpop.f32.mrf.mxu1 }
 0x141   : > { %v354_v22 = vadd.f32 %v731_v17, %v353_v21  ;;  %v734_v17 = vld [vmem:[%s938_s2 + $0x18] ss:$0 sm:$0xff] }
 0x143   : > { %v357_v24 = vadd.f32 %v799_v10, %v354_v22 }
 0x145   : > { %v875_v26 = vmax.f32 %v357_v24, 0.0 }
 0x147   : > { %v386_v30 = vrot.slane %v875_v26, 4  ;;  %v396_v34 = vmul.f32 %v394_v29, %v875_v26 }
 0x149   : > { %v387_v9 = vsel %vm204_vm0, %v385_v28, %v386_v30  ;;  %v388_v32 = vsel %vm204_vm0, %v386_v30, %v385_v28 }
 0x14a   : > { %v389_v10 = vsel %vm207_vm1, %v388_v32, 0.0  ;;  %v393_v33 = vmul.f32 %v391_v27, %v387_v9  ;;  %v400_v35 = vsel %vm224_vm2, %v388_v32, 0.0  ;;  %v402_v42 = vmul.f32 %v401_v31, %v387_v9 }
 0x14b   : > { %v392_v37 = vmul.f32 %v391_v27, %v389_v10  ;;  %v403_v38 = vmul.f32 %v401_v31, %v400_v35 }
 0x14c   : > { %v398_v39 = vadd.f32 %v396_v34, %v393_v33 }
 0x14d   : > { %v397_v41 = vadd.f32 %v395_v36, %v392_v37 }
 0x14e   : > { %v405_v43 = vadd.f32 %v403_v38, %v398_v39 }
 0x14f   : > { %v404_v44 = vadd.f32 %v402_v42, %v397_v41 }
 0x150   : > { %v408_v45 = vadd.f32 %v732_v40, %v405_v43 }
 0x151   : > { %v407_v46 = vadd.f32 %v732_v40, %v404_v44 }
 0x152   : > { %v410_v47 = vmax.f32 %v408_v45, 0.0 }
 0x153   : > { %v409_v48 = vmax.f32 %v407_v46, 0.0 }
 0x155   : > { %v411_v49 = vpack.c.bf16 %v410_v47, %v409_v48 }
 0x157   : > { %678 = vmatmul.msk.bf16.vlgmr.msra.gmra.mxu2 %vm267_vm3, %v411_v49 }
 0x1da   : > { %v449_v54 = vpop.f32.mrf.mxu2 }
 0x1db   : > { %v450_v56 = vadd.f32 %v733_v55, %v449_v54 }
 0x1dd   : > { %v454_v58 = vmax.f32 %v450_v56, 0.0 }
 0x1df   : > { %v456_v63 = vrot.slane %v454_v58, 4  ;;  %v466_v13 = vmul.f32 %v465_v0, %v454_v58 }
 0x1e2   : > { %v451_v57 = vpop.f32.mrf.mxu2 }
 0x1e3   : > { %v452_v59 = vadd.f32 %v733_v55, %v451_v57 }
 0x1e5   : > { %v455_v61 = vmax.f32 %v452_v59, 0.0 }
 0x1e7   : > { %v457_v2 = vrot.slane %v455_v61, 4  ;;  %v467_v11 = vmul.f32 %v465_v0, %v455_v61 }
 0x1e9   : > { %v458_v4 = vsel %vm204_vm0, %v456_v63, %v457_v2  ;;  %v459_v5 = vsel %vm204_vm0, %v457_v2, %v456_v63 }
 0x1ea   : > { %v460_v7 = vsel %vm207_vm1, %v459_v5, 0.0  ;;  %v464_v8 = vmul.f32 %v462_v62, %v458_v4  ;;  %v471_v12 = vsel %vm224_vm2, %v459_v5, 0.0  ;;  %v473_v18 = vmul.f32 %v472_v1, %v458_v4 }
 0x1eb   : > { %v463_v14 = vmul.f32 %v462_v62, %v460_v7  ;;  %v474_v15 = vmul.f32 %v472_v1, %v471_v12 }
 0x1ec   : > { %v469_v16 = vadd.f32 %v467_v11, %v464_v8 }
 0x1ed   : > { %v468_v19 = vadd.f32 %v466_v13, %v463_v14 }
 0x1ee   : > { %v476_v20 = vadd.f32 %v474_v15, %v469_v16 }
 0x1ef   : > { %v475_v21 = vadd.f32 %v473_v18, %v468_v19 }
 0x1f0   : > { %v479_v3 = vadd.f32 %v734_v17, %v476_v20 }
 0x1f1   : > { %v478_v22 = vadd.f32 %v734_v17, %v475_v21 }
 0x1f2   : > { %v481_v24 = vmax.f32 %v479_v3, 0.0 }
 0x1f3   : > { %v480_v25 = vmax.f32 %v478_v22, 0.0 }
 0x1f5   : > { %v482_v27 = vpack.c.bf16 %v481_v24, %v480_v25 }
 0x1f7   : > { %695 = vmatmul.msk.bf16.vlgmr.msra.gmra.mxu3 %vm267_vm3, %v482_v27 }
 0x27a   : > { %v520_v28 = vpop.f32.mrf.mxu3 }
 0x27b   : > { %v521_v29 = vadd.f32 %v735_v6, %v520_v28 }
 0x27d   : > { %v525_v30 = vadd.f32 %v521_v29, %v869_v23 }
 0x27f   : > { %v527_v31 = vmax.f32 %v525_v30, 0.0 }
 0x281   : > { %v529_v9 = vpack.c.bf16 %v527_v31, %v527_v31 }
 0x282   : > { %v522_v32 = vpop.f32.mrf.mxu3 }
 0x283   : > { %532 = vst.msk [vmem:[%s170_s28] sm:$0xf] %vm531_vm4, %v529_v9  ;;  %v523_v10 = vadd.f32 %v735_v6, %v522_v32 }
 0x285   : > { %v526_v33 = vadd.f32 %v523_v10, %v875_v26 }
 0x287   : > { %v528_v34 = vmax.f32 %v526_v33, 0.0 }
 0x289   : > { %v530_v35 = vpack.c.bf16 %v528_v34, %v528_v34 }
 0x28b   : > { %533 = vst.msk [vmem:[%s170_s28 + $0x4] sm:$0xf] %vm531_vm4, %v530_v35 }
 0x28c PF: > { %s13_s12 = sadd.s32 1, %s742_s12  }
 0x28d   : > { %p10_p4 = scmp.ge.s32.totalorder %s13_s12, 4  }
 0x28f   :  { %12 = sbr.rel (!%p10_p4) target bundleno = 1 (0x1), region = 66 }

// kernel: _lambda_.8
= control target key start
LH: loop header
LB: loop body
LE: loop exit
PB: predicated region body
PF: predicated region fallthrough
CT: control target
= control target key end

     0   :  { %s1107_s15 = smov 0   ;;  %s1301_s0 = inlined_call_operand.vmem [shape: bf16[2,4,4,64], index: 0, kind: input, shape index: {}]   ;;  %s1302_s1 = inlined_call_operand.vmem [shape: bf16[9,64,64], index: 1, kind: input, shape index: {}]   ;;  %s1303_s2 = inlined_call_operand.vmem [shape: f32[1,128], index: 2, kind: input, shape index: {}]   ;;  %s1304_s3 = inlined_call_operand.vmem [shape: f32[1,64], index: 3, kind: input, shape index: {}]   ;;  %s1305_s4 = inlined_call_operand.vmem [shape: bf16[2,4,128], index: 4, kind: output, shape index: {}]  }
   0x1 LB: > { %s795_s16 = sadd.s32 4294967295, %s1079_s15   ;;  %p799_p0 = scmp.ge.s32.totalorder %s1079_s15, 1  ;;  %s1079_s15 = sphi %s1107_s15, %s14_s15  }
   0x2   : > { %p162_p1 = scmp.lt.s32.totalorder %s1079_s15, 3 }
   0x4   : > { %p163_p2 = pnand %p799_p0, %p162_p1 }
   0x5   : > { %p187_p3 = scmp.lt.s32.totalorder (!%p163_p2), %s795_s16, 1  ;;  %s1081_s17 = smov (!%p163_p2), 64  }
   0x6   : > { %166 = sbr.rel (%p163_p2) target bundleno = 197 (0xc5), region = 36 }
   0xb   : > { %v1033_v0 = vld [vmem:[%s1302_s1 + $0x38] sm:$0xff]  ;;  %v197_v3 = vlaneseq  ;;  %v1032_v5 = vld [vmem:[%s1302_s1 + $0x30] sm:$0xff]  ;;  %s1309_s16 = smov (!%p187_p3, %s795_s16), 1  ;;  %v1031_v10 = vld [vmem:[%s1302_s1 + $0x28] sm:$0xff]  ;;  %vm216_vm0 = vcmask 1047556   ;;  %vm284_vm4 = vcmask 523264  }
   0xc   : > { %v1029_v1 = vld [vmem:[%s1302_s1 + $0x18] sm:$0xff]  ;;  %292 = vmatpush.bf16.msra.mxu0 %v1033_v0  ;;  %v1028_v6 = vld [vmem:[%s1302_s1 + $0x10] sm:$0xff]  ;;  %s1025_s7 = sshll.u32 %s1309_s16, 3  ;;  %v1027_v11 = vld [vmem:[%s1302_s1 + $0x8] sm:$0xff]  ;;  %s802_s26 = sshll.u32 %s1309_s16, 1 }
   0xd   : > { %v1037_v2 = vld [vmem:[%s1302_s1 + $0x58] sm:$0xff]  ;;  %332 = vmatpush.bf16.msra.mxu1 %v1029_v1  ;;  %v1036_v7 = vld [vmem:[%s1302_s1 + $0x50] sm:$0xff]  ;;  %v198_v9 = vshrl.u32 %v197_v3, 7  ;;  %s1148_s12 = scalar_lea.vmem %s1301_s0, %s1025_s7  ;;  %v1035_v14 = vld [vmem:[%s1302_s1 + $0x48] sm:$0xff]  ;;  %s195_s29 = scalar_lea.vmem %s1305_s4, %s802_s26 }
   0xe   : > { %v1041_v4 = vld [vmem:[%s1302_s1 + $0x78] sm:$0xff]  ;;  %385 = vmatpush.bf16.msra.mxu2 %v1037_v2  ;;  %v1040_v8 = vld [vmem:[%s1302_s1 + $0x70] sm:$0xff]  ;;  %v1154_v12 = vld [vmem:[%s1148_s12 + $0x4] sm:$0x3] }
   0xf   : > { %449 = vmatpush.bf16.msra.mxu3 %v1041_v4  ;;  %v1157_v13 = vld [vmem:[%s1148_s12 + $0x6] sm:$0x3]  ;;  %v1039_v15 = vld [vmem:[%s1302_s1 + $0x68] sm:$0xff]  ;;  %v1166_v16 = vunpack.c.l.bf16 %v1154_v12  ;;  %v204_v17 = vand.u32 1, %v198_v9  ;;  %v1172_v19 = vld [vmem:[%s1148_s12 + $0x2] sm:$0x3] }
  0x10   : > { %293 = vmatpush.bf16.msra.mxu0 %v1032_v5  ;;  %v1169_v18 = vunpack.c.l.bf16 %v1157_v13  ;;  %v397_v20 = vunpack.c.l.bf16 %v1172_v19  ;;  %v1030_v23 = vld [vmem:[%s1302_s1 + $0x20] sm:$0xff]  ;;  %vm199_vm1 = vcmp.ge.s32.totalorder %v198_v9, 2  ;;  %v1045_v34 = vld [vmem:[%s1302_s1 + $0x98] sm:$0xff]  ;;  %v1044_v55 = vld [vmem:[%s1302_s1 + $0x90] sm:$0xff] }
  0x11   : > { %333 = vmatpush.bf16.msra.mxu1 %v1028_v6  ;;  %v240_v21 = vrot.slane %v1166_v16, 4  ;;  %v1026_v24 = vld [vmem:[%s1302_s1] sm:$0xff]  ;;  %vm1191_vm2 = vcmp.ne.s32.totalorder %v204_v17, 0  ;;  %v1053_v35 = vld [vmem:[%s1302_s1 + $0xd8] sm:$0xff]  ;;  %v1052_v56 = vld [vmem:[%s1302_s1 + $0xd0] sm:$0xff] }
  0x12   : > { %386 = vmatpush.bf16.msra.mxu2 %v1036_v7  ;;  %v217_v22 = vrot.slane %v1169_v18, 4  ;;  %v398_v25 = vrot.slane %v397_v20, 4  ;;  %v1034_v26 = vld [vmem:[%s1302_s1 + $0x40] sm:$0xff]  ;;  %v1057_v37 = vld [vmem:[%s1302_s1 + $0xf8] sm:$0xff]  ;;  %vm221_vm3 = vmand %vm199_vm1, %vm1191_vm2  ;;  %v717_v61 = vmax.f32 %v1166_v16, %v1169_v18 }
  0x13   : > { %450 = vmatpush.bf16.msra.mxu3 %v1040_v8  ;;  %v1038_v27 = vld [vmem:[%s1302_s1 + $0x60] sm:$0xff]  ;;  %v241_v28 = vsel %vm216_vm0, %v240_v21, %v1166_v16  ;;  %v1049_v38 = vld [vmem:[%s1302_s1 + $0xb8] sm:$0xff]  ;;  %v1056_v58 = vld [vmem:[%s1302_s1 + $0xf0] sm:$0xff] }
  0x14   : > { %294 = vmatpush.bf16.msra.mxu0 %v1031_v10  ;;  %v218_v30 = vsel %vm216_vm0, %v217_v22, %v1169_v18  ;;  %v242_v31 = vrot.slane %v241_v28, 4  ;;  %v399_v33 = vsel %vm216_vm0, %v398_v25, %v397_v20  ;;  %v459_v45 = vld [vmem:[%s1148_s12] sm:$0x3]  ;;  %v1048_v59 = vld [vmem:[%s1302_s1 + $0xb0] sm:$0xff]  ;;  %v1043_v62 = vld [vmem:[%s1302_s1 + $0x88] sm:$0xff] }
  0x15   : > { %334 = vmatpush.bf16.msra.mxu1 %v1027_v11  ;;  %v219_v32 = vrot.slane %v218_v30, 4  ;;  %v400_v36 = vrot.slane %v399_v33, 4  ;;  %v714_v47 = vunpack.c.l.bf16 %v459_v45  ;;  %v1051_v63 = vld [vmem:[%s1302_s1 + $0xc8] sm:$0xff]  ;;  %v1071_v4 = vld [vmem:[%s1304_s3] ss:$0 sm:$0xff]  ;;  %v1061_v11 = vld [vmem:[%s1302_s1 + $0x118] sm:$0xff] }
  0x16   : > { %387 = vmatpush.bf16.msra.mxu2 %v1035_v14  ;;  %v243_v39 = vsel %vm216_vm0, %v242_v31, %v1166_v16  ;;  %v1055_v1 = vld [vmem:[%s1302_s1 + $0xe8] sm:$0xff]  ;;  %v1042_v5 = vld [vmem:[%s1302_s1 + $0x80] sm:$0xff]  ;;  %v1060_v17 = vld [vmem:[%s1302_s1 + $0x110] sm:$0xff] }
  0x17   : > { %451 = vmatpush.bf16.msra.mxu3 %v1039_v15  ;;  %v220_v40 = vsel %vm216_vm0, %v219_v32, %v1169_v18  ;;  %v247_v41 = vrot.slane %v243_v39, 2  ;;  %v401_v44 = vsel %vm216_vm0, %v400_v36, %v397_v20  ;;  %v715_v60 = vmax.f32 %v714_v47, %v397_v20  ;;  %v1047_v2 = vld [vmem:[%s1302_s1 + $0xa8] sm:$0xff]  ;;  %v1050_v6 = vld [vmem:[%s1302_s1 + $0xc0] sm:$0xff] }
  0x18   : > { %295 = vmatpush.bf16.msra.mxu0 %v1030_v23  ;;  %v225_v42 = vrot.slane %v220_v40, 1  ;;  %v341_v43 = vrot.slane %v220_v40, 2  ;;  %v405_v46 = vrot.slane %v401_v44, 3  ;;  %v560_v7 = vrot.slane %v220_v40, 3  ;;  %v1054_v9 = vld [vmem:[%s1302_s1 + $0xe0] sm:$0xff]  ;;  %v1059_v18 = vld [vmem:[%s1302_s1 + $0x108] sm:$0xff] }
  0x19   : > { %335 = vmatpush.bf16.msra.mxu1 %v1026_v24  ;;  %v249_v48 = vsel %vm199_vm1, %v247_v41, 0.0  ;;  %v721_v0 = vmax.f32 %v715_v60, %v717_v61  ;;  %v1046_v10 = vld [vmem:[%s1302_s1 + $0xa0] sm:$0xff] }
  0x1a   : > { %388 = vmatpush.bf16.msra.mxu2 %v1034_v26  ;;  %v227_v49 = vsel %vm221_vm3, %v225_v42, 0.0  ;;  %v343_v50 = vsel %vm199_vm1, %v341_v43, 0.0  ;;  %v250_v51 = vpack.c.bf16 %v249_v48, %v249_v48  ;;  %v407_v54 = vsel %vm1191_vm2, %v405_v46, 0.0  ;;  %v1058_v20 = vld [vmem:[%s1302_s1 + $0x100] sm:$0xff] }
  0x1b   : > { %452 = vmatpush.bf16.msra.mxu3 %v1038_v27  ;;  %v228_v52 = vpack.c.bf16 %v227_v49, %v227_v49  ;;  %v344_v53 = vpack.c.bf16 %v343_v50, %v343_v50  ;;  %v408_v57 = vpack.c.bf16 %v407_v54, %v407_v54  ;;  %v722_v3 = vpack.c.bf16 %v721_v0, %v721_v0  ;;  %v1072_v43 = vld [vmem:[%s1303_s2] ss:$0 sm:$0xff] }
  0x1c   : > { %500 = vmatpush.bf16.msrb.mxu0 %v1045_v34  ;;  %v562_v15 = vsel %vm1191_vm2, %v560_v7, 0.0 }
  0x1d   : > { %550 = vmatpush.bf16.msrb.mxu1 %v1049_v38  ;;  %829 = vmatmul.msk.bf16.vlgmr.msra.gmra.mxu0 %vm284_vm4, %v250_v51  ;;  %v723_v8 = vunpack.c.l.bf16 %v722_v3  ;;  %v563_v16 = vpack.c.bf16 %v562_v15, %v562_v15 }
  0x1e   : > { %604 = vmatpush.bf16.msrb.mxu2 %v1053_v35  ;;  %846 = vmatmul.msk.bf16.vlgmr.msra.gmra.mxu1 %vm284_vm4, %v228_v52 }
  0x1f   : > { %654 = vmatpush.bf16.msrb.mxu3 %v1057_v37  ;;  %871 = vmatmul.msk.bf16.vlgmr.msra.gmra.mxu2 %vm284_vm4, %v344_v53  ;;  %v728_v14 = vmul.f32 %v1071_v4, %v723_v8 }
  0x20   : > { %897 = vmatmul.msk.bf16.vlgmr.msra.gmra.mxu3 %vm284_vm4, %v408_v57  ;;  %501 = vmatpush.bf16.msrb.mxu0 %v1044_v55 }
  0x21   : > { %551 = vmatpush.bf16.msrb.mxu1 %v1048_v59  ;;  %730 = vrot.lane.b32.xlu0 %v728_v14, %s1081_s17 }
  0x22   : > { %605 = vmatpush.bf16.msrb.mxu2 %v1052_v56 }
  0x23   : > { %655 = vmatpush.bf16.msrb.mxu3 %v1056_v58 }
  0x24   : > { %502 = vmatpush.bf16.msrb.mxu0 %v1043_v62 }
  0x25   : > { %552 = vmatpush.bf16.msrb.mxu1 %v1047_v2 }
  0x26   : > { %606 = vmatpush.bf16.msrb.mxu2 %v1051_v63 }
  0x27   : > { %656 = vmatpush.bf16.msrb.mxu3 %v1055_v1 }
  0x28   : > { %503 = vmatpush.bf16.msrb.mxu0 %v1042_v5 }
  0x29   : > { %553 = vmatpush.bf16.msrb.mxu1 %v1046_v10 }
  0x2a   : > { %607 = vmatpush.bf16.msrb.mxu2 %v1050_v6 }
  0x2b   : > { %657 = vmatpush.bf16.msrb.mxu3 %v1054_v9 }
  0x2c   : > { %704 = vmatpush.bf16.msra.mxu0 %v1061_v11 }
  0x2d   : > { %922 = vmatmul.msk.bf16.vlgmr.msrb.gmra.mxu0 %vm284_vm4, %v459_v45 }
  0x2e   : > { %947 = vmatmul.msk.bf16.vlgmr.msrb.gmra.mxu1 %vm284_vm4, %v1172_v19 }
  0x2f   : > { %972 = vmatmul.msk.bf16.vlgmr.msrb.gmra.mxu2 %vm284_vm4, %v563_v16 }
  0x30   : > { %997 = vmatmul.msk.bf16.vlgmr.msrb.gmra.mxu3 %vm284_vm4, %v1154_v12  ;;  %705 = vmatpush.bf16.msra.mxu0 %v1060_v17 }
  0x34   : > { %706 = vmatpush.bf16.msra.mxu0 %v1059_v18 }
  0x38   : > { %707 = vmatpush.bf16.msra.mxu0 %v1058_v20 }
  0x3d   : > { %1022 = vmatmul.msk.bf16.vlgmr.msra.gmra.mxu0 %vm284_vm4, %v1157_v13 }
  0x93   : > { %v731_v42 = vpop.permute.xlu0 %730 }
  0x9a   : > { %v297_v19 = vpop.f32.mrf.mxu0 }
  0x9b   : > { %v337_v21 = vpop.f32.mrf.mxu1 }
  0x9c   : > { %v338_v25 = vadd.f32 %v337_v21, %v297_v19 }
  0xa2   : > { %v390_v22 = vpop.f32.mrf.mxu2  ;;  %v299_v24 = vpop.f32.mrf.mxu0 }
  0xa3   : > { %v454_v23 = vpop.f32.mrf.mxu3  ;;  %v339_v12 = vpop.f32.mrf.mxu1  ;;  %v394_v26 = vadd.f32 %v390_v22, %v338_v25 }
  0xa5   : > { %v458_v31 = vadd.f32 %v454_v23, %v394_v26 }
  0xaa   : > { %v392_v27 = vpop.f32.mrf.mxu2  ;;  %v505_v29 = vpop.f32.mrf.mxu0 }
  0xab   : > { %v456_v28 = vpop.f32.mrf.mxu3  ;;  %v555_v30 = vpop.f32.mrf.mxu1  ;;  %v509_v32 = vadd.f32 %v505_v29, %v458_v31 }
  0xad   : > { %v559_v13 = vadd.f32 %v555_v30, %v509_v32 }
  0xb2   : > { %v609_v33 = vpop.f32.mrf.mxu2  ;;  %v507_v35 = vpop.f32.mrf.mxu0 }
  0xb3   : > { %v659_v34 = vpop.f32.mrf.mxu3  ;;  %v557_v36 = vpop.f32.mrf.mxu1  ;;  %v613_v37 = vadd.f32 %v609_v33, %v559_v13 }
  0xb5   : > { %v663_v38 = vadd.f32 %v659_v34, %v613_v37 }
  0xba   : > { %v611_v39 = vpop.f32.mrf.mxu2  ;;  %v709_v41 = vpop.f32.mrf.mxu0 }
  0xbb   : > { %v661_v40 = vpop.f32.mrf.mxu3  ;;  %v713_v44 = vadd.f32 %v709_v41, %v663_v38 }
  0xbd   : > { %v733_v45 = vsel %vm284_vm4, %v713_v44, %v731_v42 }
  0xbe   : > { %v738_v46 = vadd.f32 %v1072_v43, %v733_v45 }
  0xc0   : > { %v739_v47 = vmax.f32 %v738_v46, 0.0 }
  0xc2   : > { %v740_v48 = vpack.c.bf16 %v739_v47, %v739_v47  ;;  %v711_v49 = vpop.f32.mrf.mxu0 }
  0xc4   : > { %741 = vst [vmem:[%s195_s29] sm:$0x3] %v740_v48 }
  0xc5 PF: > { %s14_s15 = sadd.s32 1, %s1079_s15  }
  0xc6   : > { %p11_p4 = scmp.ge.s32.totalorder %s14_s15, 4  }
  0xc8   :  { %13 = sbr.rel (!%p11_p4) target bundleno = 1 (0x1), region = 77 }

// kernel: _lambda_.9
= control target key start
LH: loop header
LB: loop body
LE: loop exit
PB: predicated region body
PF: predicated region fallthrough
CT: control target
= control target key end

     0   :  { %s1545_s12 = smov 0   ;;  %s1882_s0 = inlined_call_operand.vmem [shape: bf16[2,4,128], index: 0, kind: input, shape index: {}]   ;;  %s1883_s1 = inlined_call_operand.vmem [shape: bf16[4,2,128,128], index: 1, kind: input, shape index: {}]   ;;  %s1884_s2 = inlined_call_operand.vmem [shape: f32[4,10,128], index: 2, kind: input, shape index: {}]   ;;  %s1885_s3 = inlined_call_operand.vmem [shape: bf16[2,4,128], index: 3, kind: output, shape index: {}]  }
   0x1 LB: > { %s1034_s13 = sadd.s32 4294967295, %s1523_s12   ;;  %p1038_p0 = scmp.ge.s32.totalorder %s1523_s12, 1  ;;  %s1523_s12 = sphi %s1545_s12, %s13_s12  }
   0x2   : > { %p136_p1 = scmp.lt.s32.totalorder %s1523_s12, 3 }
   0x4   : > { %p137_p2 = pnand %p1038_p0, %p136_p1 }
   0x5   : > { %p158_p3 = scmp.lt.s32.totalorder (!%p137_p2), %s1034_s13, 1 }
   0x6   : > { %140 = sbr.rel (%p137_p2) target bundleno = 1229 (0x4cd), region = 32 }
   0xb   : > { %v1436_v0 = vld [vmem:[%s1883_s1 + $0x38] sm:$0xff]  ;;  %v1435_v1 = vld [vmem:[%s1883_s1 + $0x30] sm:$0xff]  ;;  %s1887_s13 = smov (!%p158_p3, %s1034_s13), 1  ;;  %v168_v2 = vlaneseq  ;;  %v1434_v5 = vld [vmem:[%s1883_s1 + $0x28] sm:$0xff]  ;;  %vm209_vm0 = vcmask 1047556  }
   0xc   : > { %286 = vmatpush.bf16.msra.mxu0 %v1436_v0  ;;  %v1444_v3 = vld [vmem:[%s1883_s1 + $0x78] sm:$0xff]  ;;  %s1039_s20 = sshll.u32 %s1887_s13, 1  ;;  %v1443_v4 = vld [vmem:[%s1883_s1 + $0x70] sm:$0xff]  ;;  %v170_v9 = vld [vmem:[%s1884_s2] sm:$0x7] }
   0xd   : > { %s161_s23 = scalar_lea.vmem %s1882_s0, %s1039_s20  ;;  %361 = vmatpush.bf16.msra.mxu1 %v1444_v3  ;;  %v1576_v7 = vshrl.u32 %v168_v2, 7  ;;  %v1433_v10 = vld [vmem:[%s1883_s1 + $0x20] sm:$0xff]  ;;  %v1442_v12 = vld [vmem:[%s1883_s1 + $0x68] sm:$0xff]  ;;  %v223_v15 = vperm.slane %v170_v9, 1  ;;  %v221_v16 = vperm.slane %v170_v9, 0  ;;  %v1432_v18 = vld [vmem:[%s1883_s1 + $0x18] sm:$0xff]  ;;  %s165_s28 = scalar_lea.vmem %s1885_s3, %s1039_s20 }
   0xe   : > { %v166_v6 = vld [vmem:[%s161_s23] sm:$0x3]  ;;  %v230_v20 = vperm.slane %v170_v9, 2  ;;  %v1431_v25 = vld [vmem:[%s1883_s1 + $0x10] sm:$0xff]  ;;  %v1501_v29 = vld [vmem:[%s1884_s2 + $0x3] ss:$0 sm:$0xff] }
   0xf   : > { %v1578_v8 = vunpack.c.l.bf16 %v166_v6  ;;  %v1441_v17 = vld [vmem:[%s1883_s1 + $0x60] sm:$0xff]  ;;  %vm214_vm1 = vcmp.ge.s32.totalorder %v1576_v7, 2  ;;  %vm226_vm2 = vcmp.lt.s32.totalorder %v1576_v7, 2  ;;  %v1430_v30 = vld [vmem:[%s1883_s1 + $0x8] sm:$0xff]  ;;  %v1440_v36 = vld [vmem:[%s1883_s1 + $0x58] sm:$0xff] }
  0x10   : > { %287 = vmatpush.bf16.msra.mxu0 %v1435_v1  ;;  %v1429_v33 = vld [vmem:[%s1883_s1] sm:$0xff]  ;;  %v1439_v37 = vld [vmem:[%s1883_s1 + $0x50] sm:$0xff]  ;;  %v1438_v38 = vld [vmem:[%s1883_s1 + $0x48] sm:$0xff] }
  0x11   : > { %v210_v11 = vrot.slane %v1578_v8, 4  ;;  %362 = vmatpush.bf16.msra.mxu1 %v1443_v4  ;;  %v224_v22 = vmul.f32 %v223_v15, %v1578_v8  ;;  %v1437_v39 = vld [vmem:[%s1883_s1 + $0x40] sm:$0xff]  ;;  %v1452_v40 = vld [vmem:[%s1883_s1 + $0xb8] sm:$0xff]  ;;  %v1503_v53 = vld [vmem:[%s1884_s2 + $0x8] ss:$0 sm:$0xff] }
  0x12   : > { %487 = vmatpush.bf16.msra.mxu2 %v1452_v40  ;;  %v173_v41 = vld [vmem:[%s1884_s2 + $0x5] sm:$0x7]  ;;  %v1502_v42 = vld [vmem:[%s1884_s2 + $0x4] ss:$0 sm:$0xff]  ;;  %v1451_v59 = vld [vmem:[%s1883_s1 + $0xb0] sm:$0xff] }
  0x13   : > { %v211_v13 = vsel %vm209_vm0, %v210_v11, %v1578_v8  ;;  %v300_v43 = vperm.slane %v173_v41, 0  ;;  %v302_v46 = vperm.slane %v173_v41, 1  ;;  %v305_v47 = vperm.slane %v173_v41, 2  ;;  %v1450_v60 = vld [vmem:[%s1883_s1 + $0xa8] sm:$0xff]  ;;  %v1449_v61 = vld [vmem:[%s1883_s1 + $0xa0] sm:$0xff]  ;;  %v1448_v62 = vld [vmem:[%s1883_s1 + $0x98] sm:$0xff] }
  0x14   : > { %288 = vmatpush.bf16.msra.mxu0 %v1434_v5  ;;  %v212_v14 = vrot.slane %v211_v13, 4  ;;  %v1447_v63 = vld [vmem:[%s1883_s1 + $0x90] sm:$0xff]  ;;  %v1446_v0 = vld [vmem:[%s1883_s1 + $0x88] sm:$0xff]  ;;  %v1445_v1 = vld [vmem:[%s1883_s1 + $0x80] sm:$0xff] }
  0x15   : > { %363 = vmatpush.bf16.msra.mxu1 %v1442_v12  ;;  %v301_v49 = vmul.f32 0.0, %v300_v43  ;;  %v306_v51 = vmul.f32 0.0, %v305_v47  ;;  %v1460_v2 = vld [vmem:[%s1883_s1 + $0xf8] sm:$0xff]  ;;  %v1504_v3 = vld [vmem:[%s1884_s2 + $0x9] ss:$0 sm:$0xff]  ;;  %v1459_v4 = vld [vmem:[%s1883_s1 + $0xf0] sm:$0xff] }
  0x16   : > { %v213_v19 = vsel %vm209_vm0, %v212_v14, %v1578_v8  ;;  %488 = vmatpush.bf16.msra.mxu2 %v1451_v59  ;;  %562 = vmatpush.bf16.msra.mxu3 %v1460_v2  ;;  %v1458_v9 = vld [vmem:[%s1883_s1 + $0xe8] sm:$0xff]  ;;  %v1457_v12 = vld [vmem:[%s1883_s1 + $0xe0] sm:$0xff]  ;;  %v1121_v15 = vld [vmem:[%s1884_s2 + $0x10] sm:$0x7] }
  0x17   : > { %v218_v21 = vrot.slane %v213_v19, 2  ;;  %v427_v19 = vperm.slane %v1121_v15, 1  ;;  %v1464_v59 = vld [vmem:[%s1883_s1 + $0x118] sm:$0xff]  ;;  %v1487_v7 = vld [vmem:[%s1883_s1 + $0x1d0] sm:$0xff] }
  0x18   : > { %289 = vmatpush.bf16.msra.mxu0 %v1433_v10 }
  0x19   : > { %v220_v23 = vsel %vm214_vm1, %v218_v21, 0.0  ;;  %v229_v24 = vsel %vm226_vm2, %v218_v21, 0.0  ;;  %364 = vmatpush.bf16.msra.mxu1 %v1441_v17  ;;  %v431_v21 = vperm.slane %v1121_v15, 2 }
  0x1a   : > { %v222_v26 = vmul.f32 %v221_v16, %v220_v23  ;;  %v231_v27 = vmul.f32 %v230_v20, %v229_v24  ;;  %489 = vmatpush.bf16.msra.mxu2 %v1450_v60  ;;  %563 = vmatpush.bf16.msra.mxu3 %v1459_v4  ;;  %v1463_v60 = vld [vmem:[%s1883_s1 + $0x110] sm:$0xff]  ;;  %v1474_v4 = vld [vmem:[%s1883_s1 + $0x168] sm:$0xff] }
  0x1c   : > { %290 = vmatpush.bf16.msra.mxu0 %v1432_v18  ;;  %v225_v28 = vadd.f32 %v224_v22, %v222_v26  ;;  %v425_v18 = vperm.slane %v1121_v15, 0 }
  0x1d   : > { %365 = vmatpush.bf16.msra.mxu1 %v1440_v36  ;;  %v1453_v36 = vld [vmem:[%s1883_s1 + $0xc0] sm:$0xff] }
  0x1e   : > { %v232_v31 = vadd.f32 %v231_v27, %v225_v28  ;;  %490 = vmatpush.bf16.msra.mxu2 %v1449_v61  ;;  %564 = vmatpush.bf16.msra.mxu3 %v1458_v9  ;;  %v1505_v28 = vld [vmem:[%s1884_s2 + $0x13] ss:$0 sm:$0xff]  ;;  %v1462_v61 = vld [vmem:[%s1883_s1 + $0x108] sm:$0xff]  ;;  %v1473_v9 = vld [vmem:[%s1883_s1 + $0x160] sm:$0xff] }
  0x20   : > { %291 = vmatpush.bf16.msra.mxu0 %v1431_v25  ;;  %v234_v32 = vadd.f32 %v1501_v29, %v232_v31 }
  0x21   : > { %366 = vmatpush.bf16.msra.mxu1 %v1439_v37  ;;  %v1468_v37 = vld [vmem:[%s1883_s1 + $0x138] sm:$0xff] }
  0x22   : > { %v235_v34 = vmax.f32 %v234_v32, 0.0  ;;  %491 = vmatpush.bf16.msra.mxu2 %v1448_v62  ;;  %565 = vmatpush.bf16.msra.mxu3 %v1457_v12  ;;  %v1461_v62 = vld [vmem:[%s1883_s1 + $0x100] sm:$0xff] }
  0x24   : > { %292 = vmatpush.bf16.msra.mxu0 %v1430_v30  ;;  %v236_v35 = vpack.c.bf16 %v235_v34, %v235_v34  ;;  %v1455_v34 = vld [vmem:[%s1883_s1 + $0xd0] sm:$0xff] }
  0x25   : > { %367 = vmatpush.bf16.msra.mxu1 %v1438_v38  ;;  %v1124_v38 = vld [vmem:[%s1884_s2 + $0x15] sm:$0x7] }
  0x26   : > { %492 = vmatpush.bf16.msra.mxu2 %v1447_v63  ;;  %v501_v40 = vperm.slane %v1124_v38, 0  ;;  %v503_v43 = vperm.slane %v1124_v38, 1  ;;  %v1476_v63 = vld [vmem:[%s1883_s1 + $0x178] sm:$0xff] }
  0x28   : > { %293 = vmatpush.bf16.msra.mxu0 %v1429_v33  ;;  %v1456_v33 = vld [vmem:[%s1883_s1 + $0xd8] sm:$0xff] }
  0x29   : > { %368 = vmatpush.bf16.msra.mxu1 %v1437_v39  ;;  %566 = vmatpush.bf16.msra.mxu3 %v1456_v33  ;;  %v1506_v39 = vld [vmem:[%s1884_s2 + $0x14] ss:$0 sm:$0xff]  ;;  %v1469_v33 = vld [vmem:[%s1883_s1 + $0x140] sm:$0xff] }
  0x2a   : > { %493 = vmatpush.bf16.msra.mxu2 %v1446_v0  ;;  %v1508_v0 = vld [vmem:[%s1884_s2 + $0x19] ss:$0 sm:$0xff] }
  0x2b   : > { %294 = vmatmul.bf16.vlgmr.msra.gmra.mxu0 %v236_v35  ;;  %v1454_v35 = vld [vmem:[%s1883_s1 + $0xc8] sm:$0xff] }
  0x2c   : > { %688 = vmatpush.bf16.msrb.mxu0 %v1468_v37 }
  0x2d   : > { %567 = vmatpush.bf16.msra.mxu3 %v1455_v34  ;;  %763 = vmatpush.bf16.msrb.mxu1 %v1476_v63  ;;  %v1484_v34 = vld [vmem:[%s1883_s1 + $0x1b8] sm:$0xff] }
  0x2e   : > { %494 = vmatpush.bf16.msra.mxu2 %v1445_v1  ;;  %v1475_v1 = vld [vmem:[%s1883_s1 + $0x170] sm:$0xff] }
  0x31   : > { %568 = vmatpush.bf16.msra.mxu3 %v1454_v35  ;;  %764 = vmatpush.bf16.msrb.mxu1 %v1475_v1  ;;  %v1226_v35 = vld [vmem:[%s1884_s2 + $0x25] sm:$0x7]  ;;  %v1490_v1 = vld [vmem:[%s1883_s1 + $0x1e8] sm:$0xff] }
  0x32   : > { %889 = vmatpush.bf16.msrb.mxu2 %v1484_v34  ;;  %v702_v37 = vperm.slane %v1226_v35, 0 }
  0x35   : > { %569 = vmatpush.bf16.msra.mxu3 %v1453_v36  ;;  %765 = vmatpush.bf16.msrb.mxu1 %v1474_v4  ;;  %v1510_v36 = vld [vmem:[%s1884_s2 + $0x24] ss:$0 sm:$0xff] }
  0x36   : > { %v1489_v4 = vld [vmem:[%s1883_s1 + $0x1e0] sm:$0xff] }
  0x39   : > { %766 = vmatpush.bf16.msrb.mxu1 %v1473_v9 }
  0xa8   : > { %v295_v44 = vpop.f32.mrf.mxu0 }
  0xa9   : > { %v296_v45 = vadd.f32 %v1502_v42, %v295_v44  ;;  %v506_v44 = vperm.slane %v1124_v38, 2 }
  0xab   : > { %v299_v48 = vmax.f32 %v296_v45, 0.0 }
  0xad   : > { %v303_v50 = vmul.f32 %v302_v46, %v299_v48  ;;  %v502_v46 = vmul.f32 0.0, %v501_v40  ;;  %v507_v48 = vmul.f32 0.0, %v506_v44  ;;  %v704_v40 = vperm.slane %v1226_v35, 1 }
  0xaf   : > { %v304_v52 = vadd.f32 %v303_v50, %v301_v49  ;;  %v1507_v50 = vld [vmem:[%s1884_s2 + $0x18] ss:$0 sm:$0xff] }
  0xb0   : > { %v297_v54 = vpop.f32.mrf.mxu0 }
  0xb1   : > { %v307_v55 = vadd.f32 %v306_v51, %v304_v52 }
  0xb3   : > { %v309_v56 = vadd.f32 %v1503_v53, %v307_v55 }
  0xb5   : > { %v310_v57 = vmax.f32 %v309_v56, 0.0  ;;  %v1467_v56 = vld [vmem:[%s1883_s1 + $0x130] sm:$0xff] }
  0xb6   : > { %689 = vmatpush.bf16.msrb.mxu0 %v1467_v56  ;;  %v1480_v56 = vld [vmem:[%s1883_s1 + $0x198] sm:$0xff] }
  0xb7   : > { %v311_v58 = vpack.c.bf16 %v310_v57, %v310_v57  ;;  %v1466_v57 = vld [vmem:[%s1883_s1 + $0x128] sm:$0xff] }
  0xb9   : > { %369 = vmatmul.bf16.vlgmr.msra.gmra.mxu1 %v311_v58  ;;  %v1465_v58 = vld [vmem:[%s1883_s1 + $0x120] sm:$0xff] }
  0xba   : > { %690 = vmatpush.bf16.msrb.mxu0 %v1466_v57  ;;  %v1479_v57 = vld [vmem:[%s1883_s1 + $0x190] sm:$0xff] }
  0xbe   : > { %691 = vmatpush.bf16.msrb.mxu0 %v1465_v58  ;;  %v1478_v58 = vld [vmem:[%s1883_s1 + $0x188] sm:$0xff] }
  0xc2   : > { %692 = vmatpush.bf16.msrb.mxu0 %v1464_v59  ;;  %v1477_v59 = vld [vmem:[%s1883_s1 + $0x180] sm:$0xff] }
  0xc6   : > { %693 = vmatpush.bf16.msrb.mxu0 %v1463_v60  ;;  %v1492_v60 = vld [vmem:[%s1883_s1 + $0x1f8] sm:$0xff] }
  0xc7   : > { %964 = vmatpush.bf16.msrb.mxu3 %v1492_v60 }
  0xca   : > { %694 = vmatpush.bf16.msrb.mxu0 %v1462_v61  ;;  %v1512_v61 = vld [vmem:[%s1884_s2 + $0x29] ss:$0 sm:$0xff] }
  0xce   : > { %695 = vmatpush.bf16.msrb.mxu0 %v1461_v62  ;;  %v1491_v62 = vld [vmem:[%s1883_s1 + $0x1f0] sm:$0xff] }
  0xcf   : > { %965 = vmatpush.bf16.msrb.mxu3 %v1491_v62 }
  0xd3   : > { %966 = vmatpush.bf16.msrb.mxu3 %v1490_v1 }
  0xd7   : > { %967 = vmatpush.bf16.msrb.mxu3 %v1489_v4 }
 0x136   : > { %v370_v5 = vpop.f32.mrf.mxu1 }
 0x137   : > { %v371_v6 = vadd.f32 %v1504_v3, %v370_v5 }
 0x139   : > { %v374_v10 = vadd.f32 %v371_v6, %v1578_v8 }
 0x13b   : > { %v1677_v11 = vmax.f32 %v374_v10, 0.0 }
 0x13d   : > { %v417_v13 = vrot.slane %v1677_v11, 4  ;;  %v428_v25 = vmul.f32 %v427_v19, %v1677_v11 }
 0x13e   : > { %v372_v14 = vpop.f32.mrf.mxu1 }
 0x13f   : > { %v418_v16 = vsel %vm209_vm0, %v417_v13, %v1677_v11  ;;  %v1223_v14 = vld [vmem:[%s1884_s2 + $0x20] sm:$0x7] }
 0x140   : > { %v419_v17 = vrot.slane %v418_v16, 4  ;;  %v626_v16 = vperm.slane %v1223_v14, 0 }
 0x142   : > { %v420_v8 = vsel %vm209_vm0, %v419_v17, %v1677_v11  ;;  %v628_v17 = vperm.slane %v1223_v14, 1 }
 0x143   : > { %v422_v20 = vrot.slane %v420_v8, 2 }
 0x145   : > { %v424_v22 = vsel %vm214_vm1, %v422_v20, 0.0  ;;  %v430_v23 = vsel %vm226_vm2, %v422_v20, 0.0 }
 0x146   : > { %v426_v24 = vmul.f32 %v425_v18, %v424_v22  ;;  %v432_v27 = vmul.f32 %v431_v21, %v430_v23  ;;  %v632_v18 = vperm.slane %v1223_v14, 2 }
 0x148   : > { %v429_v26 = vadd.f32 %v428_v25, %v426_v24  ;;  %v1509_v25 = vld [vmem:[%s1884_s2 + $0x23] ss:$0 sm:$0xff] }
 0x14a   : > { %v433_v29 = vadd.f32 %v432_v27, %v429_v26 }
 0x14c   : > { %v435_v30 = vadd.f32 %v1505_v28, %v433_v29 }
 0x14e   : > { %v436_v31 = vmax.f32 %v435_v30, 0.0  ;;  %v1472_v30 = vld [vmem:[%s1883_s1 + $0x158] sm:$0xff] }
 0x14f   : > { %767 = vmatpush.bf16.msrb.mxu1 %v1472_v30  ;;  %v1328_v30 = vld [vmem:[%s1884_s2 + $0x35] sm:$0x7] }
 0x150   : > { %v437_v32 = vpack.c.bf16 %v436_v31, %v436_v31  ;;  %v1471_v31 = vld [vmem:[%s1883_s1 + $0x150] sm:$0xff] }
 0x152   : > { %495 = vmatmul.bf16.vlgmr.msra.gmra.mxu2 %v437_v32  ;;  %v1470_v32 = vld [vmem:[%s1883_s1 + $0x148] sm:$0xff] }
 0x153   : > { %768 = vmatpush.bf16.msrb.mxu1 %v1471_v31  ;;  %v1514_v31 = vld [vmem:[%s1884_s2 + $0x34] ss:$0 sm:$0xff] }
 0x157   : > { %769 = vmatpush.bf16.msrb.mxu1 %v1470_v32  ;;  %v903_v32 = vperm.slane %v1328_v30, 0 }
 0x15b   : > { %770 = vmatpush.bf16.msrb.mxu1 %v1469_v33 }
 0x1d5   : > { %v496_v41 = vpop.f32.mrf.mxu2 }
 0x1d6   : > { %v497_v42 = vadd.f32 %v1506_v39, %v496_v41  ;;  %v707_v41 = vperm.slane %v1226_v35, 2  ;;  %v905_v35 = vperm.slane %v1328_v30, 1 }
 0x1d8   : > { %v500_v45 = vmax.f32 %v497_v42, 0.0 }
 0x1da   : > { %v504_v47 = vmul.f32 %v503_v43, %v500_v45  ;;  %v703_v43 = vmul.f32 0.0, %v702_v37  ;;  %v708_v45 = vmul.f32 0.0, %v707_v41 }
 0x1dc   : > { %v505_v49 = vadd.f32 %v504_v47, %v502_v46  ;;  %v1511_v47 = vld [vmem:[%s1884_s2 + $0x28] ss:$0 sm:$0xff] }
 0x1dd   : > { %v498_v51 = vpop.f32.mrf.mxu2 }
 0x1de   : > { %v508_v52 = vadd.f32 %v507_v48, %v505_v49 }
 0x1e0   : > { %v510_v53 = vadd.f32 %v1507_v50, %v508_v52 }
 0x1e2   : > { %v511_v54 = vmax.f32 %v510_v53, 0.0  ;;  %v1483_v53 = vld [vmem:[%s1883_s1 + $0x1b0] sm:$0xff] }
 0x1e3   : > { %890 = vmatpush.bf16.msrb.mxu2 %v1483_v53 }
 0x1e4   : > { %v512_v55 = vpack.c.bf16 %v511_v54, %v511_v54  ;;  %v1482_v54 = vld [vmem:[%s1883_s1 + $0x1a8] sm:$0xff] }
 0x1e6   : > { %570 = vmatmul.bf16.vlgmr.msra.gmra.mxu3 %v512_v55  ;;  %v1481_v55 = vld [vmem:[%s1883_s1 + $0x1a0] sm:$0xff] }
 0x1e7   : > { %891 = vmatpush.bf16.msrb.mxu2 %v1482_v54 }
 0x1eb   : > { %892 = vmatpush.bf16.msrb.mxu2 %v1481_v55 }
 0x1ef   : > { %893 = vmatpush.bf16.msrb.mxu2 %v1480_v56 }
 0x1f3   : > { %894 = vmatpush.bf16.msrb.mxu2 %v1479_v57 }
 0x1f7   : > { %895 = vmatpush.bf16.msrb.mxu2 %v1478_v58 }
 0x1fb   : > { %896 = vmatpush.bf16.msrb.mxu2 %v1477_v59 }
 0x269   : > { %v571_v2 = vpop.f32.mrf.mxu3 }
 0x26a   : > { %v572_v3 = vadd.f32 %v1508_v0, %v571_v2 }
 0x26c   : > { %v575_v5 = vadd.f32 %v572_v3, %v1677_v11 }
 0x26e   : > { %v1756_v6 = vmax.f32 %v575_v5, 0.0 }
 0x270   : > { %v618_v10 = vrot.slane %v1756_v6, 4  ;;  %v629_v22 = vmul.f32 %v628_v17, %v1756_v6 }
 0x271   : > { %v573_v12 = vpop.f32.mrf.mxu3 }
 0x272   : > { %v619_v13 = vsel %vm209_vm0, %v618_v10, %v1756_v6  ;;  %v1325_v12 = vld [vmem:[%s1884_s2 + $0x30] sm:$0x7] }
 0x273   : > { %v620_v15 = vrot.slane %v619_v13, 4 }
 0x275   : > { %v621_v11 = vsel %vm209_vm0, %v620_v15, %v1756_v6  ;;  %v827_v15 = vperm.slane %v1325_v12, 0 }
 0x276   : > { %v623_v8 = vrot.slane %v621_v11, 2 }
 0x278   : > { %v625_v19 = vsel %vm214_vm1, %v623_v8, 0.0  ;;  %v631_v20 = vsel %vm226_vm2, %v623_v8, 0.0 }
 0x279   : > { %v627_v21 = vmul.f32 %v626_v16, %v625_v19  ;;  %v633_v24 = vmul.f32 %v632_v18, %v631_v20  ;;  %v833_v16 = vperm.slane %v1325_v12, 2 }
 0x27b   : > { %v630_v23 = vadd.f32 %v629_v22, %v627_v21  ;;  %v1513_v22 = vld [vmem:[%s1884_s2 + $0x33] ss:$0 sm:$0xff] }
 0x27d   : > { %v634_v26 = vadd.f32 %v633_v24, %v630_v23 }
 0x27f   : > { %v636_v27 = vadd.f32 %v1509_v25, %v634_v26 }
 0x281   : > { %v637_v28 = vmax.f32 %v636_v27, 0.0  ;;  %v1488_v27 = vld [vmem:[%s1883_s1 + $0x1d8] sm:$0xff] }
 0x282   : > { %968 = vmatpush.bf16.msrb.mxu3 %v1488_v27 }
 0x283   : > { %v638_v29 = vpack.c.bf16 %v637_v28, %v637_v28  ;;  %v1486_v28 = vld [vmem:[%s1883_s1 + $0x1c8] sm:$0xff] }
 0x285   : > { %696 = vmatmul.bf16.vlgmr.msrb.gmra.mxu0 %v638_v29  ;;  %v1485_v29 = vld [vmem:[%s1883_s1 + $0x1c0] sm:$0xff] }
 0x286   : > { %969 = vmatpush.bf16.msrb.mxu3 %v1487_v7 }
 0x28a   : > { %970 = vmatpush.bf16.msrb.mxu3 %v1486_v28 }
 0x28e   : > { %971 = vmatpush.bf16.msrb.mxu3 %v1485_v29 }
 0x302   : > { %v697_v38 = vpop.f32.mrf.mxu0 }
 0x303   : > { %v698_v39 = vadd.f32 %v1510_v36, %v697_v38  ;;  %v908_v36 = vperm.slane %v1328_v30, 2  ;;  %v904_v38 = vmul.f32 0.0, %v903_v32 }
 0x305   : > { %v701_v42 = vmax.f32 %v698_v39, 0.0 }
 0x307   : > { %v705_v44 = vmul.f32 %v704_v40, %v701_v42  ;;  %v909_v40 = vmul.f32 0.0, %v908_v36  ;;  %v1515_v42 = vld [vmem:[%s1884_s2 + $0x38] ss:$0 sm:$0xff] }
 0x309   : > { %v706_v46 = vadd.f32 %v705_v44, %v703_v43 }
 0x30a   : > { %v699_v48 = vpop.f32.mrf.mxu0 }
 0x30b   : > { %v709_v49 = vadd.f32 %v708_v45, %v706_v46  ;;  %v1516_v48 = vld [vmem:[%s1884_s2 + $0x39] ss:$0 sm:$0xff] }
 0x30d   : > { %v711_v50 = vadd.f32 %v1511_v47, %v709_v49 }
 0x30f   : > { %v712_v51 = vmax.f32 %v711_v50, 0.0 }
 0x311   : > { %v713_v52 = vpack.c.bf16 %v712_v51, %v712_v51 }
 0x313   : > { %771 = vmatmul.bf16.vlgmr.msrb.gmra.mxu1 %v713_v52 }
 0x390   : > { %v772_v63 = vpop.f32.mrf.mxu1 }
 0x391   : > { %v773_v0 = vadd.f32 %v1512_v61, %v772_v63 }
 0x393   : > { %v776_v2 = vadd.f32 %v773_v0, %v1756_v6  ;;  %v829_v6 = vperm.slane %v1325_v12, 1 }
 0x395   : > { %v777_v3 = vmax.f32 %v776_v2, 0.0 }
 0x397   : > { %v819_v5 = vrot.slane %v777_v3, 4  ;;  %v830_v19 = vmul.f32 %v829_v6, %v777_v3 }
 0x398   : > { %v774_v9 = vpop.f32.mrf.mxu1 }
 0x399   : > { %v820_v10 = vsel %vm209_vm0, %v819_v5, %v777_v3 }
 0x39a   : > { %v821_v13 = vrot.slane %v820_v10, 4 }
 0x39c   : > { %v822_v14 = vsel %vm209_vm0, %v821_v13, %v777_v3 }
 0x39d   : > { %v824_v11 = vrot.slane %v822_v14, 2 }
 0x39f   : > { %v826_v17 = vsel %vm214_vm1, %v824_v11, 0.0  ;;  %v832_v8 = vsel %vm226_vm2, %v824_v11, 0.0 }
 0x3a0   : > { %v828_v18 = vmul.f32 %v827_v15, %v826_v17  ;;  %v834_v21 = vmul.f32 %v833_v16, %v832_v8 }
 0x3a2   : > { %v831_v20 = vadd.f32 %v830_v19, %v828_v18 }
 0x3a4   : > { %v835_v23 = vadd.f32 %v834_v21, %v831_v20 }
 0x3a6   : > { %v837_v24 = vadd.f32 %v1513_v22, %v835_v23 }
 0x3a8   : > { %v838_v25 = vmax.f32 %v837_v24, 0.0 }
 0x3aa   : > { %v839_v26 = vpack.c.bf16 %v838_v25, %v838_v25 }
 0x3ac   : > { %897 = vmatmul.bf16.vlgmr.msrb.gmra.mxu2 %v839_v26 }
 0x42f   : > { %v898_v33 = vpop.f32.mrf.mxu2 }
 0x430   : > { %v899_v34 = vadd.f32 %v1514_v31, %v898_v33 }
 0x432   : > { %v902_v37 = vmax.f32 %v899_v34, 0.0 }
 0x434   : > { %v906_v39 = vmul.f32 %v905_v35, %v902_v37 }
 0x436   : > { %v907_v41 = vadd.f32 %v906_v39, %v904_v38 }
 0x437   : > { %v900_v43 = vpop.f32.mrf.mxu2 }
 0x438   : > { %v910_v44 = vadd.f32 %v909_v40, %v907_v41 }
 0x43a   : > { %v912_v45 = vadd.f32 %v1515_v42, %v910_v44 }
 0x43c   : > { %v913_v46 = vmax.f32 %v912_v45, 0.0 }
 0x43e   : > { %v914_v47 = vpack.c.bf16 %v913_v46, %v913_v46 }
 0x440   : > { %972 = vmatmul.bf16.vlgmr.msrb.gmra.mxu3 %v914_v47 }
 0x4c3   : > { %v973_v49 = vpop.f32.mrf.mxu3 }
 0x4c4   : > { %v974_v50 = vadd.f32 %v1516_v48, %v973_v49 }
 0x4c6   : > { %v977_v51 = vadd.f32 %v974_v50, %v777_v3 }
 0x4c8   : > { %v978_v52 = vmax.f32 %v977_v51, 0.0 }
 0x4ca   : > { %v979_v53 = vpack.c.bf16 %v978_v52, %v978_v52 }
 0x4cb   : > { %v975_v54 = vpop.f32.mrf.mxu3 }
 0x4cc   : > { %980 = vst [vmem:[%s165_s28] sm:$0x3] %v979_v53 }
 0x4cd PF: > { %s13_s12 = sadd.s32 1, %s1523_s12  }
 0x4ce   : > { %p10_p4 = scmp.ge.s32.totalorder %s13_s12, 4  }
 0x4d0   :  { %12 = sbr.rel (!%p10_p4) target bundleno = 1 (0x1), region = 72 }

</bundles_post_ra>
